<compile_context>
chip_gen: v7x
topology: tpu7x:2x2x1
jax: 0.10.0
libtpu: 0.0.40
codegen_flags: <defaults>
</compile_context>

<pallas_src>
import numpy as np

import jax
import jax.numpy as jnp
from jax import lax
from jax.experimental import pallas as pl
from jax.experimental.pallas import tpu as pltpu


# ----------------------------------------------------------------------------
# Constant pooling matrices (numpy, built once at import time)
# ----------------------------------------------------------------------------

def _avgpool_matrix(out_h, out_w, row_stride, n_src):
    """(n_src, out_h*out_w) right-mul matrix implementing 2x2/stride-2 average
    pooling of a row-major spatial layout whose rows are `row_stride` lanes
    apart."""
    m = np.zeros((n_src, out_h * out_w), np.float32)
    for a in range(out_h):
        for b in range(out_w):
            q = a * out_w + b
            for di in (0, 1):
                for dj in (0, 1):
                    m[(2 * a + di) * row_stride + (2 * b + dj), q] = 0.25
    return m


_POOL1_T = _avgpool_matrix(14, 14, 28, 28 * 28)   # (784, 196): 28x28 -> 14x14
# conv2 results live at lanes oh*14+ow (oh, ow < 10) of a 136-lane accumulator
# (see kernel); this pools the valid 10x10 region down to 5x5.
_POOL2_T = _avgpool_matrix(5, 5, 14, 136)         # (136, 25)


# ----------------------------------------------------------------------------
# Fused kernel: one image per grid step.
# ----------------------------------------------------------------------------

def _lenet5_kernel(p1_ref, w1_ref, b1_ref, pool1_ref,
                   w2_ref, b2_ref, pool2_ref,
                   wf1_ref, bf1_ref, wf2_ref, bf2_ref, wf3_ref, bf3_ref,
                   o_ref):
    f32 = jnp.float32

    # conv1 + tanh: (6, 75) @ (75, 784) -> (6, 784)   [spatial lane = oh*28+ow]
    patches1 = p1_ref[0]                                        # (75, 784)
    h1 = jnp.tanh(
        jnp.dot(w1_ref[...], patches1, preferred_element_type=f32)
        + b1_ref[...])                                          # (6, 784)

    # pool1 (2x2 avg): (6, 784) @ (784, 196) -> (6, 196)  [lane = ph*14+pw]
    pooled1 = jnp.dot(h1, pool1_ref[...], preferred_element_type=f32)

    # conv2: accumulate the 25 kernel taps as shifted lane-slices of pooled1.
    # Tap (i, j) contributes to output (oh, ow) from source lane
    # (oh+i)*14 + (ow+j) = (i*14+j) + (oh*14+ow); a single 136-lane slice
    # starting at base = i*14+j therefore aligns every output at relative
    # lane r = oh*14+ow (oh, ow < 10).  Lanes whose ow-part is >= 10 are junk
    # and receive zero weight in the pool2 matrix below.
    acc = jnp.zeros((16, 136), f32)
    for i in range(5):
        for j in range(5):
            base = i * 14 + j
            acc = acc + jnp.dot(w2_ref[i, j],                   # (16, 6)
                                pooled1[:, base:base + 136],    # (6, 136)
                                preferred_element_type=f32)
    a2 = jnp.tanh(acc + b2_ref[...])                            # (16, 136)

    # pool2 (2x2 avg over the valid 10x10 lanes): (16, 136) @ (136, 25)
    pooled2 = jnp.dot(a2, pool2_ref[...], preferred_element_type=f32)  # (16, 25)

    # fc1 + tanh.  torch.flatten(NCHW) order is (c, h, w); wf1_ref[c] is the
    # (25, 120) weight slice for channel c, so contract channel by channel.
    fc1 = bf1_ref[...]                                          # (1, 120)
    for c in range(16):
        fc1 = fc1 + jnp.dot(pooled2[c:c + 1, :], wf1_ref[c],
                            preferred_element_type=f32)
    h3 = jnp.tanh(fc1)                                          # (1, 120)

    # fc2 + tanh
    h4 = jnp.tanh(jnp.dot(h3, wf2_ref[...], preferred_element_type=f32)
                  + bf2_ref[...])                               # (1, 84)

    # fc3 + log_softmax (stable, max-shifted)
    logits = jnp.dot(h4, wf3_ref[...], preferred_element_type=f32) + bf3_ref[...]
    m = jnp.max(logits, axis=-1, keepdims=True)
    shifted = logits - m
    lse = jnp.log(jnp.sum(jnp.exp(shifted), axis=-1, keepdims=True))
    o_ref[0] = (shifted - lse).astype(o_ref.dtype)              # (1, 10)


# ----------------------------------------------------------------------------
# Host-side wrappers
# ----------------------------------------------------------------------------

def _im2col_T(x):
    """NCHW -> (B, 75, 784) conv1 patches, feature order (c, kh, kw) matching
    the PyTorch conv weight layout; spatial order oh*28 + ow.  One-time
    boundary glue in plain JAX."""
    B, C, H, W = x.shape
    K = 5
    OH, OW = H - K + 1, W - K + 1
    cols = [x[:, :, i:i + OH, j:j + OW] for i in range(K) for j in range(K)]
    p = jnp.stack(cols, axis=2)                    # (B, C, 25, OH, OW)
    return p.reshape(B, C * K * K, OH * OW).astype(jnp.float32)


def prepare_params(params):
    """One-time re-layout of the PyTorch-style parameters for the kernel."""
    return {
        "w1": params["conv1_w"].reshape(6, 75).astype(jnp.float32),          # (6, 75)
        "b1": params["conv1_b"].reshape(6, 1).astype(jnp.float32),
        "pool1": jnp.asarray(_POOL1_T),                                       # (784, 196)
        "w2": params["conv2_w"].transpose(2, 3, 0, 1).astype(jnp.float32),    # (5, 5, 16, 6)
        "b2": params["conv2_b"].reshape(16, 1).astype(jnp.float32),
        "pool2": jnp.asarray(_POOL2_T),                                       # (136, 25)
        "wf1": params["fc1_w"].reshape(120, 16, 25).transpose(1, 2, 0).astype(jnp.float32),  # (16, 25, 120)
        "bf1": params["fc1_b"].reshape(1, 120).astype(jnp.float32),
        "wf2": params["fc2_w"].T.astype(jnp.float32),                         # (120, 84)
        "bf2": params["fc2_b"].reshape(1, 84).astype(jnp.float32),
        "wf3": params["fc3_w"].T.astype(jnp.float32),                         # (84, 10)
        "bf3": params["fc3_b"].reshape(1, 10).astype(jnp.float32),
    }


_WEIGHT_ORDER = ("w1", "b1", "pool1", "w2", "b2", "pool2",
                 "wf1", "bf1", "wf2", "bf2", "wf3", "bf3")


def _resident_spec(arr):
    """Full-array VMEM block with a constant index map: fetched once, kept
    resident across all grid steps."""
    n = arr.ndim
    return pl.BlockSpec(arr.shape, lambda b, _n=n: (0,) * _n)


def lenet5_forward(prep, x):
    """x: (B, 3, 32, 32) float32 NCHW -> (B, 10) log-probabilities."""
    B = x.shape[0]
    patches1 = _im2col_T(x)                                    # (B, 75, 784)
    weights = [prep[k] for k in _WEIGHT_ORDER]

    in_specs = [pl.BlockSpec((1, 75, 784), lambda b: (b, 0, 0))]
    in_specs += [_resident_spec(w) for w in weights]

    out = pl.pallas_call(
        _lenet5_kernel,
        grid=(B,),
        out_shape=jax.ShapeDtypeStruct((B, 1, 10), jnp.float32),
        in_specs=in_specs,
        out_specs=pl.BlockSpec((1, 1, 10), lambda b: (b, 0, 0)),
        compiler_params=pltpu.CompilerParams(
            dimension_semantics=("parallel",)),    # megacore split on v7x
    )(patches1, *weights)
    return out.reshape(B, 10)


# ----------------------------------------------------------------------------
# Parameters + pure-JAX reference
# ----------------------------------------------------------------------------

def init_params(key):
    ks = jax.random.split(key, 10)
    s = 0.1  # deterministic small-scale init (synthetic; not a checkpoint)
    return {
        "conv1_w": s * jax.random.normal(ks[0], (6, 3, 5, 5), jnp.float32),
        "conv1_b": s * jax.random.normal(ks[1], (6,), jnp.float32),
        "conv2_w": s * jax.random.normal(ks[2], (16, 6, 5, 5), jnp.float32),
        "conv2_b": s * jax.random.normal(ks[3], (16,), jnp.float32),
        "fc1_w": s * jax.random.normal(ks[4], (120, 16 * 5 * 5), jnp.float32),
        "fc1_b": s * jax.random.normal(ks[5], (120,), jnp.float32),
        "fc2_w": s * jax.random.normal(ks[6], (84, 120), jnp.float32),
        "fc2_b": s * jax.random.normal(ks[7], (84,), jnp.float32),
        "fc3_w": s * jax.random.normal(ks[8], (10, 84), jnp.float32),
        "fc3_b": s * jax.random.normal(ks[9], (10,), jnp.float32),
    }


def _reference_forward(params, x):
    """Pure-JAX (no Pallas) reference used for a numerical sanity check."""
    dn = ("NCHW", "OIHW", "NCHW")
    h = jnp.tanh(
        lax.conv_general_dilated(x, params["conv1_w"], (1, 1), "VALID",
                                 dimension_numbers=dn)
        + params["conv1_b"][None, :, None, None])
    h = h.reshape(h.shape[0], 6, 14, 2, 14, 2).mean(axis=(3, 5))
    h = jnp.tanh(
        lax.conv_general_dilated(h, params["conv2_w"], (1, 1), "VALID",
                                 dimension_numbers=dn)
        + params["conv2_b"][None, :, None, None])
    h = h.reshape(h.shape[0], 16, 5, 2, 5, 2).mean(axis=(3, 5))
    h = h.reshape(h.shape[0], -1)
    h = jnp.tanh(h @ params["fc1_w"].T + params["fc1_b"])
    h = jnp.tanh(h @ params["fc2_w"].T + params["fc2_b"])
    logits = h @ params["fc3_w"].T + params["fc3_b"]
    return jax.nn.log_softmax(logits, axis=-1)


if __name__ == "__main__":
    key = jax.random.PRNGKey(0)
    k_param, k_x = jax.random.split(key)
    params = init_params(k_param)
    prep = prepare_params(params)
    # LeNet5's 16*5*5 FC input implies 3x32x32 inputs (CIFAR-sized).
    x = jax.random.normal(k_x, (2, 3, 32, 32), jnp.float32)

    fwd = jax.jit(lenet5_forward)
    out = jax.block_until_ready(fwd(prep, x))

    assert out.shape == (2, 10)
    # rows are log-probabilities -> exponentials sum to 1
    assert jnp.allclose(jnp.sum(jnp.exp(out), axis=1), 1.0, atol=1e-3)
    # match the pure-JAX reference implementation
    ref = _reference_forward(params, x)
    max_err = float(jnp.max(jnp.abs(out - ref)))
    assert max_err < 5e-2, max_err
    print("KERNEL_OK")
</pallas_src>

<mosaic_0001>
module attributes {stable_mosaic.version = 11 : i64} {
  func.func @_lenet5_kernel(%arg0: i32, %arg1: memref<1x75x784xf32, #tpu.memory_space<vmem>>, %arg2: memref<6x75xf32, #tpu.memory_space<vmem>>, %arg3: memref<6x1xf32, #tpu.memory_space<vmem>>, %arg4: memref<784x196xf32, #tpu.memory_space<vmem>>, %arg5: memref<5x5x16x6xf32, #tpu.memory_space<vmem>>, %arg6: memref<16x1xf32, #tpu.memory_space<vmem>>, %arg7: memref<136x25xf32, #tpu.memory_space<vmem>>, %arg8: memref<16x25x120xf32, #tpu.memory_space<vmem>>, %arg9: memref<1x120xf32, #tpu.memory_space<vmem>>, %arg10: memref<120x84xf32, #tpu.memory_space<vmem>>, %arg11: memref<1x84xf32, #tpu.memory_space<vmem>>, %arg12: memref<84x10xf32, #tpu.memory_space<vmem>>, %arg13: memref<1x10xf32, #tpu.memory_space<vmem>>, %arg14: memref<1x1x10xf32, #tpu.memory_space<vmem>>) attributes {dimension_semantics = [#tpu.dimension_semantics<parallel>], iteration_bounds = array<i64: 2>, scalar_prefetch = 0 : i64, scratch_operands = 0 : i64, tpu.core_type = #tpu.core_type<tc>, window_params = [{transform_indices = @transform_0, window_bounds = array<i64: 1, 75, 784>}, {pipeline_mode = #tpu.pipeline_mode<synchronous>, transform_indices = @transform_1, window_bounds = array<i64: 6, 75>}, {pipeline_mode = #tpu.pipeline_mode<synchronous>, transform_indices = @transform_2, window_bounds = array<i64: 6, 1>}, {pipeline_mode = #tpu.pipeline_mode<synchronous>, transform_indices = @transform_3, window_bounds = array<i64: 784, 196>}, {pipeline_mode = #tpu.pipeline_mode<synchronous>, transform_indices = @transform_4, window_bounds = array<i64: 5, 5, 16, 6>}, {pipeline_mode = #tpu.pipeline_mode<synchronous>, transform_indices = @transform_5, window_bounds = array<i64: 16, 1>}, {pipeline_mode = #tpu.pipeline_mode<synchronous>, transform_indices = @transform_6, window_bounds = array<i64: 136, 25>}, {pipeline_mode = #tpu.pipeline_mode<synchronous>, transform_indices = @transform_7, window_bounds = array<i64: 16, 25, 120>}, {pipeline_mode = #tpu.pipeline_mode<synchronous>, transform_indices = @transform_8, window_bounds = array<i64: 1, 120>}, {pipeline_mode = #tpu.pipeline_mode<synchronous>, transform_indices = @transform_9, window_bounds = array<i64: 120, 84>}, {pipeline_mode = #tpu.pipeline_mode<synchronous>, transform_indices = @transform_10, window_bounds = array<i64: 1, 84>}, {pipeline_mode = #tpu.pipeline_mode<synchronous>, transform_indices = @transform_11, window_bounds = array<i64: 84, 10>}, {pipeline_mode = #tpu.pipeline_mode<synchronous>, transform_indices = @transform_12, window_bounds = array<i64: 1, 10>}, {transform_indices = @transform_13, window_bounds = array<i64: 1, 1, 10>}]} {
    %c0 = arith.constant 0 : index
    %c0_0 = arith.constant 0 : index
    %c0_1 = arith.constant 0 : index
    %0 = vector.load %arg1[%c0, %c0_0, %c0_1] : memref<1x75x784xf32, #tpu.memory_space<vmem>>, vector<1x75x784xf32>
    %1 = vector.shape_cast %0 : vector<1x75x784xf32> to vector<75x784xf32>
    %c0_2 = arith.constant 0 : index
    %c0_3 = arith.constant 0 : index
    %2 = vector.load %arg2[%c0_2, %c0_3] : memref<6x75xf32, #tpu.memory_space<vmem>>, vector<6x75xf32>
    %cst = arith.constant dense<0.000000e+00> : vector<6x784xf32>
    %3 = tpu.matmul %2, %1, %cst {dimension_numbers = #tpu.dot_dimension_numbers<[1], [0], [0], [1], [0, 0, 1, 1], [], []>} : vector<6x75xf32>, vector<75x784xf32>, vector<6x784xf32> -> vector<6x784xf32>
    %c0_4 = arith.constant 0 : index
    %c0_5 = arith.constant 0 : index
    %4 = vector.load %arg3[%c0_4, %c0_5] : memref<6x1xf32, #tpu.memory_space<vmem>>, vector<6x1xf32>
    %5 = vector.broadcast %4 : vector<6x1xf32> to vector<6x784xf32>
    %6 = arith.addf %3, %5 : vector<6x784xf32>
    %7 = math.tanh %6 : vector<6x784xf32>
    %c0_6 = arith.constant 0 : index
    %c0_7 = arith.constant 0 : index
    %8 = vector.load %arg4[%c0_6, %c0_7] : memref<784x196xf32, #tpu.memory_space<vmem>>, vector<784x196xf32>
    %cst_8 = arith.constant dense<0.000000e+00> : vector<6x196xf32>
    %9 = tpu.matmul %7, %8, %cst_8 {dimension_numbers = #tpu.dot_dimension_numbers<[1], [0], [0], [1], [0, 0, 1, 1], [], []>} : vector<6x784xf32>, vector<784x196xf32>, vector<6x196xf32> -> vector<6x196xf32>
    %cst_9 = arith.constant 0.000000e+00 : f32
    %10 = vector.broadcast %cst_9 : f32 to vector<16x136xf32>
    %c0_10 = arith.constant 0 : index
    %c0_11 = arith.constant 0 : index
    %c0_12 = arith.constant 0 : index
    %c0_13 = arith.constant 0 : index
    %11 = vector.load %arg5[%c0_10, %c0_11, %c0_12, %c0_13] : memref<5x5x16x6xf32, #tpu.memory_space<vmem>>, vector<1x1x16x6xf32>
    %12 = vector.shape_cast %11 : vector<1x1x16x6xf32> to vector<16x6xf32>
    %13 = vector.extract_strided_slice %9 {offsets = [0, 0], sizes = [6, 136], strides = [1, 1]} : vector<6x196xf32> to vector<6x136xf32>
    %cst_14 = arith.constant dense<0.000000e+00> : vector<16x136xf32>
    %14 = tpu.matmul %12, %13, %cst_14 {dimension_numbers = #tpu.dot_dimension_numbers<[1], [0], [0], [1], [0, 0, 1, 1], [], []>} : vector<16x6xf32>, vector<6x136xf32>, vector<16x136xf32> -> vector<16x136xf32>
    %15 = arith.addf %10, %14 : vector<16x136xf32>
    %c0_15 = arith.constant 0 : index
    %c1 = arith.constant 1 : index
    %c0_16 = arith.constant 0 : index
    %c0_17 = arith.constant 0 : index
    %16 = vector.load %arg5[%c0_15, %c1, %c0_16, %c0_17] : memref<5x5x16x6xf32, #tpu.memory_space<vmem>>, vector<1x1x16x6xf32>
    %17 = vector.shape_cast %16 : vector<1x1x16x6xf32> to vector<16x6xf32>
    %18 = vector.extract_strided_slice %9 {offsets = [0, 1], sizes = [6, 136], strides = [1, 1]} : vector<6x196xf32> to vector<6x136xf32>
    %cst_18 = arith.constant dense<0.000000e+00> : vector<16x136xf32>
    %19 = tpu.matmul %17, %18, %cst_18 {dimension_numbers = #tpu.dot_dimension_numbers<[1], [0], [0], [1], [0, 0, 1, 1], [], []>} : vector<16x6xf32>, vector<6x136xf32>, vector<16x136xf32> -> vector<16x136xf32>
    %20 = arith.addf %15, %19 : vector<16x136xf32>
    %c0_19 = arith.constant 0 : index
    %c2 = arith.constant 2 : index
    %c0_20 = arith.constant 0 : index
    %c0_21 = arith.constant 0 : index
    %21 = vector.load %arg5[%c0_19, %c2, %c0_20, %c0_21] : memref<5x5x16x6xf32, #tpu.memory_space<vmem>>, vector<1x1x16x6xf32>
    %22 = vector.shape_cast %21 : vector<1x1x16x6xf32> to vector<16x6xf32>
    %23 = vector.extract_strided_slice %9 {offsets = [0, 2], sizes = [6, 136], strides = [1, 1]} : vector<6x196xf32> to vector<6x136xf32>
    %cst_22 = arith.constant dense<0.000000e+00> : vector<16x136xf32>
    %24 = tpu.matmul %22, %23, %cst_22 {dimension_numbers = #tpu.dot_dimension_numbers<[1], [0], [0], [1], [0, 0, 1, 1], [], []>} : vector<16x6xf32>, vector<6x136xf32>, vector<16x136xf32> -> vector<16x136xf32>
    %25 = arith.addf %20, %24 : vector<16x136xf32>
    %c0_23 = arith.constant 0 : index
    %c3 = arith.constant 3 : index
    %c0_24 = arith.constant 0 : index
    %c0_25 = arith.constant 0 : index
    %26 = vector.load %arg5[%c0_23, %c3, %c0_24, %c0_25] : memref<5x5x16x6xf32, #tpu.memory_space<vmem>>, vector<1x1x16x6xf32>
    %27 = vector.shape_cast %26 : vector<1x1x16x6xf32> to vector<16x6xf32>
    %28 = vector.extract_strided_slice %9 {offsets = [0, 3], sizes = [6, 136], strides = [1, 1]} : vector<6x196xf32> to vector<6x136xf32>
    %cst_26 = arith.constant dense<0.000000e+00> : vector<16x136xf32>
    %29 = tpu.matmul %27, %28, %cst_26 {dimension_numbers = #tpu.dot_dimension_numbers<[1], [0], [0], [1], [0, 0, 1, 1], [], []>} : vector<16x6xf32>, vector<6x136xf32>, vector<16x136xf32> -> vector<16x136xf32>
    %30 = arith.addf %25, %29 : vector<16x136xf32>
    %c0_27 = arith.constant 0 : index
    %c4 = arith.constant 4 : index
    %c0_28 = arith.constant 0 : index
    %c0_29 = arith.constant 0 : index
    %31 = vector.load %arg5[%c0_27, %c4, %c0_28, %c0_29] : memref<5x5x16x6xf32, #tpu.memory_space<vmem>>, vector<1x1x16x6xf32>
    %32 = vector.shape_cast %31 : vector<1x1x16x6xf32> to vector<16x6xf32>
    %33 = vector.extract_strided_slice %9 {offsets = [0, 4], sizes = [6, 136], strides = [1, 1]} : vector<6x196xf32> to vector<6x136xf32>
    %cst_30 = arith.constant dense<0.000000e+00> : vector<16x136xf32>
    %34 = tpu.matmul %32, %33, %cst_30 {dimension_numbers = #tpu.dot_dimension_numbers<[1], [0], [0], [1], [0, 0, 1, 1], [], []>} : vector<16x6xf32>, vector<6x136xf32>, vector<16x136xf32> -> vector<16x136xf32>
    %35 = arith.addf %30, %34 : vector<16x136xf32>
    %c1_31 = arith.constant 1 : index
    %c0_32 = arith.constant 0 : index
    %c0_33 = arith.constant 0 : index
    %c0_34 = arith.constant 0 : index
    %36 = vector.load %arg5[%c1_31, %c0_32, %c0_33, %c0_34] : memref<5x5x16x6xf32, #tpu.memory_space<vmem>>, vector<1x1x16x6xf32>
    %37 = vector.shape_cast %36 : vector<1x1x16x6xf32> to vector<16x6xf32>
    %38 = vector.extract_strided_slice %9 {offsets = [0, 14], sizes = [6, 136], strides = [1, 1]} : vector<6x196xf32> to vector<6x136xf32>
    %cst_35 = arith.constant dense<0.000000e+00> : vector<16x136xf32>
    %39 = tpu.matmul %37, %38, %cst_35 {dimension_numbers = #tpu.dot_dimension_numbers<[1], [0], [0], [1], [0, 0, 1, 1], [], []>} : vector<16x6xf32>, vector<6x136xf32>, vector<16x136xf32> -> vector<16x136xf32>
    %40 = arith.addf %35, %39 : vector<16x136xf32>
    %c1_36 = arith.constant 1 : index
    %c1_37 = arith.constant 1 : index
    %c0_38 = arith.constant 0 : index
    %c0_39 = arith.constant 0 : index
    %41 = vector.load %arg5[%c1_36, %c1_37, %c0_38, %c0_39] : memref<5x5x16x6xf32, #tpu.memory_space<vmem>>, vector<1x1x16x6xf32>
    %42 = vector.shape_cast %41 : vector<1x1x16x6xf32> to vector<16x6xf32>
    %43 = vector.extract_strided_slice %9 {offsets = [0, 15], sizes = [6, 136], strides = [1, 1]} : vector<6x196xf32> to vector<6x136xf32>
    %cst_40 = arith.constant dense<0.000000e+00> : vector<16x136xf32>
    %44 = tpu.matmul %42, %43, %cst_40 {dimension_numbers = #tpu.dot_dimension_numbers<[1], [0], [0], [1], [0, 0, 1, 1], [], []>} : vector<16x6xf32>, vector<6x136xf32>, vector<16x136xf32> -> vector<16x136xf32>
    %45 = arith.addf %40, %44 : vector<16x136xf32>
    %c1_41 = arith.constant 1 : index
    %c2_42 = arith.constant 2 : index
    %c0_43 = arith.constant 0 : index
    %c0_44 = arith.constant 0 : index
    %46 = vector.load %arg5[%c1_41, %c2_42, %c0_43, %c0_44] : memref<5x5x16x6xf32, #tpu.memory_space<vmem>>, vector<1x1x16x6xf32>
    %47 = vector.shape_cast %46 : vector<1x1x16x6xf32> to vector<16x6xf32>
    %48 = vector.extract_strided_slice %9 {offsets = [0, 16], sizes = [6, 136], strides = [1, 1]} : vector<6x196xf32> to vector<6x136xf32>
    %cst_45 = arith.constant dense<0.000000e+00> : vector<16x136xf32>
    %49 = tpu.matmul %47, %48, %cst_45 {dimension_numbers = #tpu.dot_dimension_numbers<[1], [0], [0], [1], [0, 0, 1, 1], [], []>} : vector<16x6xf32>, vector<6x136xf32>, vector<16x136xf32> -> vector<16x136xf32>
    %50 = arith.addf %45, %49 : vector<16x136xf32>
    %c1_46 = arith.constant 1 : index
    %c3_47 = arith.constant 3 : index
    %c0_48 = arith.constant 0 : index
    %c0_49 = arith.constant 0 : index
    %51 = vector.load %arg5[%c1_46, %c3_47, %c0_48, %c0_49] : memref<5x5x16x6xf32, #tpu.memory_space<vmem>>, vector<1x1x16x6xf32>
    %52 = vector.shape_cast %51 : vector<1x1x16x6xf32> to vector<16x6xf32>
    %53 = vector.extract_strided_slice %9 {offsets = [0, 17], sizes = [6, 136], strides = [1, 1]} : vector<6x196xf32> to vector<6x136xf32>
    %cst_50 = arith.constant dense<0.000000e+00> : vector<16x136xf32>
    %54 = tpu.matmul %52, %53, %cst_50 {dimension_numbers = #tpu.dot_dimension_numbers<[1], [0], [0], [1], [0, 0, 1, 1], [], []>} : vector<16x6xf32>, vector<6x136xf32>, vector<16x136xf32> -> vector<16x136xf32>
    %55 = arith.addf %50, %54 : vector<16x136xf32>
    %c1_51 = arith.constant 1 : index
    %c4_52 = arith.constant 4 : index
    %c0_53 = arith.constant 0 : index
    %c0_54 = arith.constant 0 : index
    %56 = vector.load %arg5[%c1_51, %c4_52, %c0_53, %c0_54] : memref<5x5x16x6xf32, #tpu.memory_space<vmem>>, vector<1x1x16x6xf32>
    %57 = vector.shape_cast %56 : vector<1x1x16x6xf32> to vector<16x6xf32>
    %58 = vector.extract_strided_slice %9 {offsets = [0, 18], sizes = [6, 136], strides = [1, 1]} : vector<6x196xf32> to vector<6x136xf32>
    %cst_55 = arith.constant dense<0.000000e+00> : vector<16x136xf32>
    %59 = tpu.matmul %57, %58, %cst_55 {dimension_numbers = #tpu.dot_dimension_numbers<[1], [0], [0], [1], [0, 0, 1, 1], [], []>} : vector<16x6xf32>, vector<6x136xf32>, vector<16x136xf32> -> vector<16x136xf32>
    %60 = arith.addf %55, %59 : vector<16x136xf32>
    %c2_56 = arith.constant 2 : index
    %c0_57 = arith.constant 0 : index
    %c0_58 = arith.constant 0 : index
    %c0_59 = arith.constant 0 : index
    %61 = vector.load %arg5[%c2_56, %c0_57, %c0_58, %c0_59] : memref<5x5x16x6xf32, #tpu.memory_space<vmem>>, vector<1x1x16x6xf32>
    %62 = vector.shape_cast %61 : vector<1x1x16x6xf32> to vector<16x6xf32>
    %63 = vector.extract_strided_slice %9 {offsets = [0, 28], sizes = [6, 136], strides = [1, 1]} : vector<6x196xf32> to vector<6x136xf32>
    %cst_60 = arith.constant dense<0.000000e+00> : vector<16x136xf32>
    %64 = tpu.matmul %62, %63, %cst_60 {dimension_numbers = #tpu.dot_dimension_numbers<[1], [0], [0], [1], [0, 0, 1, 1], [], []>} : vector<16x6xf32>, vector<6x136xf32>, vector<16x136xf32> -> vector<16x136xf32>
    %65 = arith.addf %60, %64 : vector<16x136xf32>
    %c2_61 = arith.constant 2 : index
    %c1_62 = arith.constant 1 : index
    %c0_63 = arith.constant 0 : index
    %c0_64 = arith.constant 0 : index
    %66 = vector.load %arg5[%c2_61, %c1_62, %c0_63, %c0_64] : memref<5x5x16x6xf32, #tpu.memory_space<vmem>>, vector<1x1x16x6xf32>
    %67 = vector.shape_cast %66 : vector<1x1x16x6xf32> to vector<16x6xf32>
    %68 = vector.extract_strided_slice %9 {offsets = [0, 29], sizes = [6, 136], strides = [1, 1]} : vector<6x196xf32> to vector<6x136xf32>
    %cst_65 = arith.constant dense<0.000000e+00> : vector<16x136xf32>
    %69 = tpu.matmul %67, %68, %cst_65 {dimension_numbers = #tpu.dot_dimension_numbers<[1], [0], [0], [1], [0, 0, 1, 1], [], []>} : vector<16x6xf32>, vector<6x136xf32>, vector<16x136xf32> -> vector<16x136xf32>
    %70 = arith.addf %65, %69 : vector<16x136xf32>
    %c2_66 = arith.constant 2 : index
    %c2_67 = arith.constant 2 : index
    %c0_68 = arith.constant 0 : index
    %c0_69 = arith.constant 0 : index
    %71 = vector.load %arg5[%c2_66, %c2_67, %c0_68, %c0_69] : memref<5x5x16x6xf32, #tpu.memory_space<vmem>>, vector<1x1x16x6xf32>
    %72 = vector.shape_cast %71 : vector<1x1x16x6xf32> to vector<16x6xf32>
    %73 = vector.extract_strided_slice %9 {offsets = [0, 30], sizes = [6, 136], strides = [1, 1]} : vector<6x196xf32> to vector<6x136xf32>
    %cst_70 = arith.constant dense<0.000000e+00> : vector<16x136xf32>
    %74 = tpu.matmul %72, %73, %cst_70 {dimension_numbers = #tpu.dot_dimension_numbers<[1], [0], [0], [1], [0, 0, 1, 1], [], []>} : vector<16x6xf32>, vector<6x136xf32>, vector<16x136xf32> -> vector<16x136xf32>
    %75 = arith.addf %70, %74 : vector<16x136xf32>
    %c2_71 = arith.constant 2 : index
    %c3_72 = arith.constant 3 : index
    %c0_73 = arith.constant 0 : index
    %c0_74 = arith.constant 0 : index
    %76 = vector.load %arg5[%c2_71, %c3_72, %c0_73, %c0_74] : memref<5x5x16x6xf32, #tpu.memory_space<vmem>>, vector<1x1x16x6xf32>
    %77 = vector.shape_cast %76 : vector<1x1x16x6xf32> to vector<16x6xf32>
    %78 = vector.extract_strided_slice %9 {offsets = [0, 31], sizes = [6, 136], strides = [1, 1]} : vector<6x196xf32> to vector<6x136xf32>
    %cst_75 = arith.constant dense<0.000000e+00> : vector<16x136xf32>
    %79 = tpu.matmul %77, %78, %cst_75 {dimension_numbers = #tpu.dot_dimension_numbers<[1], [0], [0], [1], [0, 0, 1, 1], [], []>} : vector<16x6xf32>, vector<6x136xf32>, vector<16x136xf32> -> vector<16x136xf32>
    %80 = arith.addf %75, %79 : vector<16x136xf32>
    %c2_76 = arith.constant 2 : index
    %c4_77 = arith.constant 4 : index
    %c0_78 = arith.constant 0 : index
    %c0_79 = arith.constant 0 : index
    %81 = vector.load %arg5[%c2_76, %c4_77, %c0_78, %c0_79] : memref<5x5x16x6xf32, #tpu.memory_space<vmem>>, vector<1x1x16x6xf32>
    %82 = vector.shape_cast %81 : vector<1x1x16x6xf32> to vector<16x6xf32>
    %83 = vector.extract_strided_slice %9 {offsets = [0, 32], sizes = [6, 136], strides = [1, 1]} : vector<6x196xf32> to vector<6x136xf32>
    %cst_80 = arith.constant dense<0.000000e+00> : vector<16x136xf32>
    %84 = tpu.matmul %82, %83, %cst_80 {dimension_numbers = #tpu.dot_dimension_numbers<[1], [0], [0], [1], [0, 0, 1, 1], [], []>} : vector<16x6xf32>, vector<6x136xf32>, vector<16x136xf32> -> vector<16x136xf32>
    %85 = arith.addf %80, %84 : vector<16x136xf32>
    %c3_81 = arith.constant 3 : index
    %c0_82 = arith.constant 0 : index
    %c0_83 = arith.constant 0 : index
    %c0_84 = arith.constant 0 : index
    %86 = vector.load %arg5[%c3_81, %c0_82, %c0_83, %c0_84] : memref<5x5x16x6xf32, #tpu.memory_space<vmem>>, vector<1x1x16x6xf32>
    %87 = vector.shape_cast %86 : vector<1x1x16x6xf32> to vector<16x6xf32>
    %88 = vector.extract_strided_slice %9 {offsets = [0, 42], sizes = [6, 136], strides = [1, 1]} : vector<6x196xf32> to vector<6x136xf32>
    %cst_85 = arith.constant dense<0.000000e+00> : vector<16x136xf32>
    %89 = tpu.matmul %87, %88, %cst_85 {dimension_numbers = #tpu.dot_dimension_numbers<[1], [0], [0], [1], [0, 0, 1, 1], [], []>} : vector<16x6xf32>, vector<6x136xf32>, vector<16x136xf32> -> vector<16x136xf32>
    %90 = arith.addf %85, %89 : vector<16x136xf32>
    %c3_86 = arith.constant 3 : index
    %c1_87 = arith.constant 1 : index
    %c0_88 = arith.constant 0 : index
    %c0_89 = arith.constant 0 : index
    %91 = vector.load %arg5[%c3_86, %c1_87, %c0_88, %c0_89] : memref<5x5x16x6xf32, #tpu.memory_space<vmem>>, vector<1x1x16x6xf32>
    %92 = vector.shape_cast %91 : vector<1x1x16x6xf32> to vector<16x6xf32>
    %93 = vector.extract_strided_slice %9 {offsets = [0, 43], sizes = [6, 136], strides = [1, 1]} : vector<6x196xf32> to vector<6x136xf32>
    %cst_90 = arith.constant dense<0.000000e+00> : vector<16x136xf32>
    %94 = tpu.matmul %92, %93, %cst_90 {dimension_numbers = #tpu.dot_dimension_numbers<[1], [0], [0], [1], [0, 0, 1, 1], [], []>} : vector<16x6xf32>, vector<6x136xf32>, vector<16x136xf32> -> vector<16x136xf32>
    %95 = arith.addf %90, %94 : vector<16x136xf32>
    %c3_91 = arith.constant 3 : index
    %c2_92 = arith.constant 2 : index
    %c0_93 = arith.constant 0 : index
    %c0_94 = arith.constant 0 : index
    %96 = vector.load %arg5[%c3_91, %c2_92, %c0_93, %c0_94] : memref<5x5x16x6xf32, #tpu.memory_space<vmem>>, vector<1x1x16x6xf32>
    %97 = vector.shape_cast %96 : vector<1x1x16x6xf32> to vector<16x6xf32>
    %98 = vector.extract_strided_slice %9 {offsets = [0, 44], sizes = [6, 136], strides = [1, 1]} : vector<6x196xf32> to vector<6x136xf32>
    %cst_95 = arith.constant dense<0.000000e+00> : vector<16x136xf32>
    %99 = tpu.matmul %97, %98, %cst_95 {dimension_numbers = #tpu.dot_dimension_numbers<[1], [0], [0], [1], [0, 0, 1, 1], [], []>} : vector<16x6xf32>, vector<6x136xf32>, vector<16x136xf32> -> vector<16x136xf32>
    %100 = arith.addf %95, %99 : vector<16x136xf32>
    %c3_96 = arith.constant 3 : index
    %c3_97 = arith.constant 3 : index
    %c0_98 = arith.constant 0 : index
    %c0_99 = arith.constant 0 : index
    %101 = vector.load %arg5[%c3_96, %c3_97, %c0_98, %c0_99] : memref<5x5x16x6xf32, #tpu.memory_space<vmem>>, vector<1x1x16x6xf32>
    %102 = vector.shape_cast %101 : vector<1x1x16x6xf32> to vector<16x6xf32>
    %103 = vector.extract_strided_slice %9 {offsets = [0, 45], sizes = [6, 136], strides = [1, 1]} : vector<6x196xf32> to vector<6x136xf32>
    %cst_100 = arith.constant dense<0.000000e+00> : vector<16x136xf32>
    %104 = tpu.matmul %102, %103, %cst_100 {dimension_numbers = #tpu.dot_dimension_numbers<[1], [0], [0], [1], [0, 0, 1, 1], [], []>} : vector<16x6xf32>, vector<6x136xf32>, vector<16x136xf32> -> vector<16x136xf32>
    %105 = arith.addf %100, %104 : vector<16x136xf32>
    %c3_101 = arith.constant 3 : index
    %c4_102 = arith.constant 4 : index
    %c0_103 = arith.constant 0 : index
    %c0_104 = arith.constant 0 : index
    %106 = vector.load %arg5[%c3_101, %c4_102, %c0_103, %c0_104] : memref<5x5x16x6xf32, #tpu.memory_space<vmem>>, vector<1x1x16x6xf32>
    %107 = vector.shape_cast %106 : vector<1x1x16x6xf32> to vector<16x6xf32>
    %108 = vector.extract_strided_slice %9 {offsets = [0, 46], sizes = [6, 136], strides = [1, 1]} : vector<6x196xf32> to vector<6x136xf32>
    %cst_105 = arith.constant dense<0.000000e+00> : vector<16x136xf32>
    %109 = tpu.matmul %107, %108, %cst_105 {dimension_numbers = #tpu.dot_dimension_numbers<[1], [0], [0], [1], [0, 0, 1, 1], [], []>} : vector<16x6xf32>, vector<6x136xf32>, vector<16x136xf32> -> vector<16x136xf32>
    %110 = arith.addf %105, %109 : vector<16x136xf32>
    %c4_106 = arith.constant 4 : index
    %c0_107 = arith.constant 0 : index
    %c0_108 = arith.constant 0 : index
    %c0_109 = arith.constant 0 : index
    %111 = vector.load %arg5[%c4_106, %c0_107, %c0_108, %c0_109] : memref<5x5x16x6xf32, #tpu.memory_space<vmem>>, vector<1x1x16x6xf32>
    %112 = vector.shape_cast %111 : vector<1x1x16x6xf32> to vector<16x6xf32>
    %113 = vector.extract_strided_slice %9 {offsets = [0, 56], sizes = [6, 136], strides = [1, 1]} : vector<6x196xf32> to vector<6x136xf32>
    %cst_110 = arith.constant dense<0.000000e+00> : vector<16x136xf32>
    %114 = tpu.matmul %112, %113, %cst_110 {dimension_numbers = #tpu.dot_dimension_numbers<[1], [0], [0], [1], [0, 0, 1, 1], [], []>} : vector<16x6xf32>, vector<6x136xf32>, vector<16x136xf32> -> vector<16x136xf32>
    %115 = arith.addf %110, %114 : vector<16x136xf32>
    %c4_111 = arith.constant 4 : index
    %c1_112 = arith.constant 1 : index
    %c0_113 = arith.constant 0 : index
    %c0_114 = arith.constant 0 : index
    %116 = vector.load %arg5[%c4_111, %c1_112, %c0_113, %c0_114] : memref<5x5x16x6xf32, #tpu.memory_space<vmem>>, vector<1x1x16x6xf32>
    %117 = vector.shape_cast %116 : vector<1x1x16x6xf32> to vector<16x6xf32>
    %118 = vector.extract_strided_slice %9 {offsets = [0, 57], sizes = [6, 136], strides = [1, 1]} : vector<6x196xf32> to vector<6x136xf32>
    %cst_115 = arith.constant dense<0.000000e+00> : vector<16x136xf32>
    %119 = tpu.matmul %117, %118, %cst_115 {dimension_numbers = #tpu.dot_dimension_numbers<[1], [0], [0], [1], [0, 0, 1, 1], [], []>} : vector<16x6xf32>, vector<6x136xf32>, vector<16x136xf32> -> vector<16x136xf32>
    %120 = arith.addf %115, %119 : vector<16x136xf32>
    %c4_116 = arith.constant 4 : index
    %c2_117 = arith.constant 2 : index
    %c0_118 = arith.constant 0 : index
    %c0_119 = arith.constant 0 : index
    %121 = vector.load %arg5[%c4_116, %c2_117, %c0_118, %c0_119] : memref<5x5x16x6xf32, #tpu.memory_space<vmem>>, vector<1x1x16x6xf32>
    %122 = vector.shape_cast %121 : vector<1x1x16x6xf32> to vector<16x6xf32>
    %123 = vector.extract_strided_slice %9 {offsets = [0, 58], sizes = [6, 136], strides = [1, 1]} : vector<6x196xf32> to vector<6x136xf32>
    %cst_120 = arith.constant dense<0.000000e+00> : vector<16x136xf32>
    %124 = tpu.matmul %122, %123, %cst_120 {dimension_numbers = #tpu.dot_dimension_numbers<[1], [0], [0], [1], [0, 0, 1, 1], [], []>} : vector<16x6xf32>, vector<6x136xf32>, vector<16x136xf32> -> vector<16x136xf32>
    %125 = arith.addf %120, %124 : vector<16x136xf32>
    %c4_121 = arith.constant 4 : index
    %c3_122 = arith.constant 3 : index
    %c0_123 = arith.constant 0 : index
    %c0_124 = arith.constant 0 : index
    %126 = vector.load %arg5[%c4_121, %c3_122, %c0_123, %c0_124] : memref<5x5x16x6xf32, #tpu.memory_space<vmem>>, vector<1x1x16x6xf32>
    %127 = vector.shape_cast %126 : vector<1x1x16x6xf32> to vector<16x6xf32>
    %128 = vector.extract_strided_slice %9 {offsets = [0, 59], sizes = [6, 136], strides = [1, 1]} : vector<6x196xf32> to vector<6x136xf32>
    %cst_125 = arith.constant dense<0.000000e+00> : vector<16x136xf32>
    %129 = tpu.matmul %127, %128, %cst_125 {dimension_numbers = #tpu.dot_dimension_numbers<[1], [0], [0], [1], [0, 0, 1, 1], [], []>} : vector<16x6xf32>, vector<6x136xf32>, vector<16x136xf32> -> vector<16x136xf32>
    %130 = arith.addf %125, %129 : vector<16x136xf32>
    %c4_126 = arith.constant 4 : index
    %c4_127 = arith.constant 4 : index
    %c0_128 = arith.constant 0 : index
    %c0_129 = arith.constant 0 : index
    %131 = vector.load %arg5[%c4_126, %c4_127, %c0_128, %c0_129] : memref<5x5x16x6xf32, #tpu.memory_space<vmem>>, vector<1x1x16x6xf32>
    %132 = vector.shape_cast %131 : vector<1x1x16x6xf32> to vector<16x6xf32>
    %133 = vector.extract_strided_slice %9 {offsets = [0, 60], sizes = [6, 136], strides = [1, 1]} : vector<6x196xf32> to vector<6x136xf32>
    %cst_130 = arith.constant dense<0.000000e+00> : vector<16x136xf32>
    %134 = tpu.matmul %132, %133, %cst_130 {dimension_numbers = #tpu.dot_dimension_numbers<[1], [0], [0], [1], [0, 0, 1, 1], [], []>} : vector<16x6xf32>, vector<6x136xf32>, vector<16x136xf32> -> vector<16x136xf32>
    %135 = arith.addf %130, %134 : vector<16x136xf32>
    %c0_131 = arith.constant 0 : index
    %c0_132 = arith.constant 0 : index
    %136 = vector.load %arg6[%c0_131, %c0_132] : memref<16x1xf32, #tpu.memory_space<vmem>>, vector<16x1xf32>
    %137 = vector.broadcast %136 : vector<16x1xf32> to vector<16x136xf32>
    %138 = arith.addf %135, %137 : vector<16x136xf32>
    %139 = math.tanh %138 : vector<16x136xf32>
    %c0_133 = arith.constant 0 : index
    %c0_134 = arith.constant 0 : index
    %140 = vector.load %arg7[%c0_133, %c0_134] : memref<136x25xf32, #tpu.memory_space<vmem>>, vector<136x25xf32>
    %cst_135 = arith.constant dense<0.000000e+00> : vector<16x25xf32>
    %141 = tpu.matmul %139, %140, %cst_135 {dimension_numbers = #tpu.dot_dimension_numbers<[1], [0], [0], [1], [0, 0, 1, 1], [], []>} : vector<16x136xf32>, vector<136x25xf32>, vector<16x25xf32> -> vector<16x25xf32>
    %c0_136 = arith.constant 0 : index
    %c0_137 = arith.constant 0 : index
    %142 = vector.load %arg9[%c0_136, %c0_137] : memref<1x120xf32, #tpu.memory_space<vmem>>, vector<1x120xf32>
    %143 = vector.extract_strided_slice %141 {offsets = [0, 0], sizes = [1, 25], strides = [1, 1]} : vector<16x25xf32> to vector<1x25xf32>
    %c0_138 = arith.constant 0 : index
    %c0_139 = arith.constant 0 : index
    %c0_140 = arith.constant 0 : index
    %144 = vector.load %arg8[%c0_138, %c0_139, %c0_140] : memref<16x25x120xf32, #tpu.memory_space<vmem>>, vector<1x25x120xf32>
    %145 = vector.shape_cast %144 : vector<1x25x120xf32> to vector<25x120xf32>
    %cst_141 = arith.constant dense<0.000000e+00> : vector<1x120xf32>
    %146 = tpu.matmul %143, %145, %cst_141 {dimension_numbers = #tpu.dot_dimension_numbers<[1], [0], [0], [1], [0, 0, 1, 1], [], []>} : vector<1x25xf32>, vector<25x120xf32>, vector<1x120xf32> -> vector<1x120xf32>
    %147 = arith.addf %142, %146 : vector<1x120xf32>
    %148 = vector.extract_strided_slice %141 {offsets = [1, 0], sizes = [1, 25], strides = [1, 1]} : vector<16x25xf32> to vector<1x25xf32>
    %c1_142 = arith.constant 1 : index
    %c0_143 = arith.constant 0 : index
    %c0_144 = arith.constant 0 : index
    %149 = vector.load %arg8[%c1_142, %c0_143, %c0_144] : memref<16x25x120xf32, #tpu.memory_space<vmem>>, vector<1x25x120xf32>
    %150 = vector.shape_cast %149 : vector<1x25x120xf32> to vector<25x120xf32>
    %cst_145 = arith.constant dense<0.000000e+00> : vector<1x120xf32>
    %151 = tpu.matmul %148, %150, %cst_145 {dimension_numbers = #tpu.dot_dimension_numbers<[1], [0], [0], [1], [0, 0, 1, 1], [], []>} : vector<1x25xf32>, vector<25x120xf32>, vector<1x120xf32> -> vector<1x120xf32>
    %152 = arith.addf %147, %151 : vector<1x120xf32>
    %153 = vector.extract_strided_slice %141 {offsets = [2, 0], sizes = [1, 25], strides = [1, 1]} : vector<16x25xf32> to vector<1x25xf32>
    %c2_146 = arith.constant 2 : index
    %c0_147 = arith.constant 0 : index
    %c0_148 = arith.constant 0 : index
    %154 = vector.load %arg8[%c2_146, %c0_147, %c0_148] : memref<16x25x120xf32, #tpu.memory_space<vmem>>, vector<1x25x120xf32>
    %155 = vector.shape_cast %154 : vector<1x25x120xf32> to vector<25x120xf32>
    %cst_149 = arith.constant dense<0.000000e+00> : vector<1x120xf32>
    %156 = tpu.matmul %153, %155, %cst_149 {dimension_numbers = #tpu.dot_dimension_numbers<[1], [0], [0], [1], [0, 0, 1, 1], [], []>} : vector<1x25xf32>, vector<25x120xf32>, vector<1x120xf32> -> vector<1x120xf32>
    %157 = arith.addf %152, %156 : vector<1x120xf32>
    %158 = vector.extract_strided_slice %141 {offsets = [3, 0], sizes = [1, 25], strides = [1, 1]} : vector<16x25xf32> to vector<1x25xf32>
    %c3_150 = arith.constant 3 : index
    %c0_151 = arith.constant 0 : index
    %c0_152 = arith.constant 0 : index
    %159 = vector.load %arg8[%c3_150, %c0_151, %c0_152] : memref<16x25x120xf32, #tpu.memory_space<vmem>>, vector<1x25x120xf32>
    %160 = vector.shape_cast %159 : vector<1x25x120xf32> to vector<25x120xf32>
    %cst_153 = arith.constant dense<0.000000e+00> : vector<1x120xf32>
    %161 = tpu.matmul %158, %160, %cst_153 {dimension_numbers = #tpu.dot_dimension_numbers<[1], [0], [0], [1], [0, 0, 1, 1], [], []>} : vector<1x25xf32>, vector<25x120xf32>, vector<1x120xf32> -> vector<1x120xf32>
    %162 = arith.addf %157, %161 : vector<1x120xf32>
    %163 = vector.extract_strided_slice %141 {offsets = [4, 0], sizes = [1, 25], strides = [1, 1]} : vector<16x25xf32> to vector<1x25xf32>
    %c4_154 = arith.constant 4 : index
    %c0_155 = arith.constant 0 : index
    %c0_156 = arith.constant 0 : index
    %164 = vector.load %arg8[%c4_154, %c0_155, %c0_156] : memref<16x25x120xf32, #tpu.memory_space<vmem>>, vector<1x25x120xf32>
    %165 = vector.shape_cast %164 : vector<1x25x120xf32> to vector<25x120xf32>
    %cst_157 = arith.constant dense<0.000000e+00> : vector<1x120xf32>
    %166 = tpu.matmul %163, %165, %cst_157 {dimension_numbers = #tpu.dot_dimension_numbers<[1], [0], [0], [1], [0, 0, 1, 1], [], []>} : vector<1x25xf32>, vector<25x120xf32>, vector<1x120xf32> -> vector<1x120xf32>
    %167 = arith.addf %162, %166 : vector<1x120xf32>
    %168 = vector.extract_strided_slice %141 {offsets = [5, 0], sizes = [1, 25], strides = [1, 1]} : vector<16x25xf32> to vector<1x25xf32>
    %c5 = arith.constant 5 : index
    %c0_158 = arith.constant 0 : index
    %c0_159 = arith.constant 0 : index
    %169 = vector.load %arg8[%c5, %c0_158, %c0_159] : memref<16x25x120xf32, #tpu.memory_space<vmem>>, vector<1x25x120xf32>
    %170 = vector.shape_cast %169 : vector<1x25x120xf32> to vector<25x120xf32>
    %cst_160 = arith.constant dense<0.000000e+00> : vector<1x120xf32>
    %171 = tpu.matmul %168, %170, %cst_160 {dimension_numbers = #tpu.dot_dimension_numbers<[1], [0], [0], [1], [0, 0, 1, 1], [], []>} : vector<1x25xf32>, vector<25x120xf32>, vector<1x120xf32> -> vector<1x120xf32>
    %172 = arith.addf %167, %171 : vector<1x120xf32>
    %173 = vector.extract_strided_slice %141 {offsets = [6, 0], sizes = [1, 25], strides = [1, 1]} : vector<16x25xf32> to vector<1x25xf32>
    %c6 = arith.constant 6 : index
    %c0_161 = arith.constant 0 : index
    %c0_162 = arith.constant 0 : index
    %174 = vector.load %arg8[%c6, %c0_161, %c0_162] : memref<16x25x120xf32, #tpu.memory_space<vmem>>, vector<1x25x120xf32>
    %175 = vector.shape_cast %174 : vector<1x25x120xf32> to vector<25x120xf32>
    %cst_163 = arith.constant dense<0.000000e+00> : vector<1x120xf32>
    %176 = tpu.matmul %173, %175, %cst_163 {dimension_numbers = #tpu.dot_dimension_numbers<[1], [0], [0], [1], [0, 0, 1, 1], [], []>} : vector<1x25xf32>, vector<25x120xf32>, vector<1x120xf32> -> vector<1x120xf32>
    %177 = arith.addf %172, %176 : vector<1x120xf32>
    %178 = vector.extract_strided_slice %141 {offsets = [7, 0], sizes = [1, 25], strides = [1, 1]} : vector<16x25xf32> to vector<1x25xf32>
    %c7 = arith.constant 7 : index
    %c0_164 = arith.constant 0 : index
    %c0_165 = arith.constant 0 : index
    %179 = vector.load %arg8[%c7, %c0_164, %c0_165] : memref<16x25x120xf32, #tpu.memory_space<vmem>>, vector<1x25x120xf32>
    %180 = vector.shape_cast %179 : vector<1x25x120xf32> to vector<25x120xf32>
    %cst_166 = arith.constant dense<0.000000e+00> : vector<1x120xf32>
    %181 = tpu.matmul %178, %180, %cst_166 {dimension_numbers = #tpu.dot_dimension_numbers<[1], [0], [0], [1], [0, 0, 1, 1], [], []>} : vector<1x25xf32>, vector<25x120xf32>, vector<1x120xf32> -> vector<1x120xf32>
    %182 = arith.addf %177, %181 : vector<1x120xf32>
    %183 = vector.extract_strided_slice %141 {offsets = [8, 0], sizes = [1, 25], strides = [1, 1]} : vector<16x25xf32> to vector<1x25xf32>
    %c8 = arith.constant 8 : index
    %c0_167 = arith.constant 0 : index
    %c0_168 = arith.constant 0 : index
    %184 = vector.load %arg8[%c8, %c0_167, %c0_168] : memref<16x25x120xf32, #tpu.memory_space<vmem>>, vector<1x25x120xf32>
    %185 = vector.shape_cast %184 : vector<1x25x120xf32> to vector<25x120xf32>
    %cst_169 = arith.constant dense<0.000000e+00> : vector<1x120xf32>
    %186 = tpu.matmul %183, %185, %cst_169 {dimension_numbers = #tpu.dot_dimension_numbers<[1], [0], [0], [1], [0, 0, 1, 1], [], []>} : vector<1x25xf32>, vector<25x120xf32>, vector<1x120xf32> -> vector<1x120xf32>
    %187 = arith.addf %182, %186 : vector<1x120xf32>
    %188 = vector.extract_strided_slice %141 {offsets = [9, 0], sizes = [1, 25], strides = [1, 1]} : vector<16x25xf32> to vector<1x25xf32>
    %c9 = arith.constant 9 : index
    %c0_170 = arith.constant 0 : index
    %c0_171 = arith.constant 0 : index
    %189 = vector.load %arg8[%c9, %c0_170, %c0_171] : memref<16x25x120xf32, #tpu.memory_space<vmem>>, vector<1x25x120xf32>
    %190 = vector.shape_cast %189 : vector<1x25x120xf32> to vector<25x120xf32>
    %cst_172 = arith.constant dense<0.000000e+00> : vector<1x120xf32>
    %191 = tpu.matmul %188, %190, %cst_172 {dimension_numbers = #tpu.dot_dimension_numbers<[1], [0], [0], [1], [0, 0, 1, 1], [], []>} : vector<1x25xf32>, vector<25x120xf32>, vector<1x120xf32> -> vector<1x120xf32>
    %192 = arith.addf %187, %191 : vector<1x120xf32>
    %193 = vector.extract_strided_slice %141 {offsets = [10, 0], sizes = [1, 25], strides = [1, 1]} : vector<16x25xf32> to vector<1x25xf32>
    %c10 = arith.constant 10 : index
    %c0_173 = arith.constant 0 : index
    %c0_174 = arith.constant 0 : index
    %194 = vector.load %arg8[%c10, %c0_173, %c0_174] : memref<16x25x120xf32, #tpu.memory_space<vmem>>, vector<1x25x120xf32>
    %195 = vector.shape_cast %194 : vector<1x25x120xf32> to vector<25x120xf32>
    %cst_175 = arith.constant dense<0.000000e+00> : vector<1x120xf32>
    %196 = tpu.matmul %193, %195, %cst_175 {dimension_numbers = #tpu.dot_dimension_numbers<[1], [0], [0], [1], [0, 0, 1, 1], [], []>} : vector<1x25xf32>, vector<25x120xf32>, vector<1x120xf32> -> vector<1x120xf32>
    %197 = arith.addf %192, %196 : vector<1x120xf32>
    %198 = vector.extract_strided_slice %141 {offsets = [11, 0], sizes = [1, 25], strides = [1, 1]} : vector<16x25xf32> to vector<1x25xf32>
    %c11 = arith.constant 11 : index
    %c0_176 = arith.constant 0 : index
    %c0_177 = arith.constant 0 : index
    %199 = vector.load %arg8[%c11, %c0_176, %c0_177] : memref<16x25x120xf32, #tpu.memory_space<vmem>>, vector<1x25x120xf32>
    %200 = vector.shape_cast %199 : vector<1x25x120xf32> to vector<25x120xf32>
    %cst_178 = arith.constant dense<0.000000e+00> : vector<1x120xf32>
    %201 = tpu.matmul %198, %200, %cst_178 {dimension_numbers = #tpu.dot_dimension_numbers<[1], [0], [0], [1], [0, 0, 1, 1], [], []>} : vector<1x25xf32>, vector<25x120xf32>, vector<1x120xf32> -> vector<1x120xf32>
    %202 = arith.addf %197, %201 : vector<1x120xf32>
    %203 = vector.extract_strided_slice %141 {offsets = [12, 0], sizes = [1, 25], strides = [1, 1]} : vector<16x25xf32> to vector<1x25xf32>
    %c12 = arith.constant 12 : index
    %c0_179 = arith.constant 0 : index
    %c0_180 = arith.constant 0 : index
    %204 = vector.load %arg8[%c12, %c0_179, %c0_180] : memref<16x25x120xf32, #tpu.memory_space<vmem>>, vector<1x25x120xf32>
    %205 = vector.shape_cast %204 : vector<1x25x120xf32> to vector<25x120xf32>
    %cst_181 = arith.constant dense<0.000000e+00> : vector<1x120xf32>
    %206 = tpu.matmul %203, %205, %cst_181 {dimension_numbers = #tpu.dot_dimension_numbers<[1], [0], [0], [1], [0, 0, 1, 1], [], []>} : vector<1x25xf32>, vector<25x120xf32>, vector<1x120xf32> -> vector<1x120xf32>
    %207 = arith.addf %202, %206 : vector<1x120xf32>
    %208 = vector.extract_strided_slice %141 {offsets = [13, 0], sizes = [1, 25], strides = [1, 1]} : vector<16x25xf32> to vector<1x25xf32>
    %c13 = arith.constant 13 : index
    %c0_182 = arith.constant 0 : index
    %c0_183 = arith.constant 0 : index
    %209 = vector.load %arg8[%c13, %c0_182, %c0_183] : memref<16x25x120xf32, #tpu.memory_space<vmem>>, vector<1x25x120xf32>
    %210 = vector.shape_cast %209 : vector<1x25x120xf32> to vector<25x120xf32>
    %cst_184 = arith.constant dense<0.000000e+00> : vector<1x120xf32>
    %211 = tpu.matmul %208, %210, %cst_184 {dimension_numbers = #tpu.dot_dimension_numbers<[1], [0], [0], [1], [0, 0, 1, 1], [], []>} : vector<1x25xf32>, vector<25x120xf32>, vector<1x120xf32> -> vector<1x120xf32>
    %212 = arith.addf %207, %211 : vector<1x120xf32>
    %213 = vector.extract_strided_slice %141 {offsets = [14, 0], sizes = [1, 25], strides = [1, 1]} : vector<16x25xf32> to vector<1x25xf32>
    %c14 = arith.constant 14 : index
    %c0_185 = arith.constant 0 : index
    %c0_186 = arith.constant 0 : index
    %214 = vector.load %arg8[%c14, %c0_185, %c0_186] : memref<16x25x120xf32, #tpu.memory_space<vmem>>, vector<1x25x120xf32>
    %215 = vector.shape_cast %214 : vector<1x25x120xf32> to vector<25x120xf32>
    %cst_187 = arith.constant dense<0.000000e+00> : vector<1x120xf32>
    %216 = tpu.matmul %213, %215, %cst_187 {dimension_numbers = #tpu.dot_dimension_numbers<[1], [0], [0], [1], [0, 0, 1, 1], [], []>} : vector<1x25xf32>, vector<25x120xf32>, vector<1x120xf32> -> vector<1x120xf32>
    %217 = arith.addf %212, %216 : vector<1x120xf32>
    %218 = vector.extract_strided_slice %141 {offsets = [15, 0], sizes = [1, 25], strides = [1, 1]} : vector<16x25xf32> to vector<1x25xf32>
    %c15 = arith.constant 15 : index
    %c0_188 = arith.constant 0 : index
    %c0_189 = arith.constant 0 : index
    %219 = vector.load %arg8[%c15, %c0_188, %c0_189] : memref<16x25x120xf32, #tpu.memory_space<vmem>>, vector<1x25x120xf32>
    %220 = vector.shape_cast %219 : vector<1x25x120xf32> to vector<25x120xf32>
    %cst_190 = arith.constant dense<0.000000e+00> : vector<1x120xf32>
    %221 = tpu.matmul %218, %220, %cst_190 {dimension_numbers = #tpu.dot_dimension_numbers<[1], [0], [0], [1], [0, 0, 1, 1], [], []>} : vector<1x25xf32>, vector<25x120xf32>, vector<1x120xf32> -> vector<1x120xf32>
    %222 = arith.addf %217, %221 : vector<1x120xf32>
    %223 = math.tanh %222 : vector<1x120xf32>
    %c0_191 = arith.constant 0 : index
    %c0_192 = arith.constant 0 : index
    %224 = vector.load %arg10[%c0_191, %c0_192] : memref<120x84xf32, #tpu.memory_space<vmem>>, vector<120x84xf32>
    %cst_193 = arith.constant dense<0.000000e+00> : vector<1x84xf32>
    %225 = tpu.matmul %223, %224, %cst_193 {dimension_numbers = #tpu.dot_dimension_numbers<[1], [0], [0], [1], [0, 0, 1, 1], [], []>} : vector<1x120xf32>, vector<120x84xf32>, vector<1x84xf32> -> vector<1x84xf32>
    %c0_194 = arith.constant 0 : index
    %c0_195 = arith.constant 0 : index
    %226 = vector.load %arg11[%c0_194, %c0_195] : memref<1x84xf32, #tpu.memory_space<vmem>>, vector<1x84xf32>
    %227 = arith.addf %225, %226 : vector<1x84xf32>
    %228 = math.tanh %227 : vector<1x84xf32>
    %c0_196 = arith.constant 0 : index
    %c0_197 = arith.constant 0 : index
    %229 = vector.load %arg12[%c0_196, %c0_197] : memref<84x10xf32, #tpu.memory_space<vmem>>, vector<84x10xf32>
    %cst_198 = arith.constant dense<0.000000e+00> : vector<1x10xf32>
    %230 = tpu.matmul %228, %229, %cst_198 {dimension_numbers = #tpu.dot_dimension_numbers<[1], [0], [0], [1], [0, 0, 1, 1], [], []>} : vector<1x84xf32>, vector<84x10xf32>, vector<1x10xf32> -> vector<1x10xf32>
    %c0_199 = arith.constant 0 : index
    %c0_200 = arith.constant 0 : index
    %231 = vector.load %arg13[%c0_199, %c0_200] : memref<1x10xf32, #tpu.memory_space<vmem>>, vector<1x10xf32>
    %232 = arith.addf %230, %231 : vector<1x10xf32>
    %cst_201 = arith.constant dense<0xFF800000> : vector<1xf32>
    %233 = vector.multi_reduction <maximumf>, %232, %cst_201 [1] : vector<1x10xf32> to vector<1xf32>
    %234 = vector.shape_cast %233 : vector<1xf32> to vector<1x1xf32>
    %235 = vector.broadcast %234 : vector<1x1xf32> to vector<1x10xf32>
    %236 = arith.subf %232, %235 : vector<1x10xf32>
    %237 = math.exp %236 : vector<1x10xf32>
    %cst_202 = arith.constant dense<0.000000e+00> : vector<1xf32>
    %238 = vector.multi_reduction <add>, %237, %cst_202 [1] : vector<1x10xf32> to vector<1xf32>
    %239 = vector.shape_cast %238 : vector<1xf32> to vector<1x1xf32>
    %240 = math.log %239 : vector<1x1xf32>
    %241 = vector.broadcast %240 : vector<1x1xf32> to vector<1x10xf32>
    %242 = arith.subf %236, %241 : vector<1x10xf32>
    %c0_203 = arith.constant 0 : index
    %c0_204 = arith.constant 0 : index
    %c0_205 = arith.constant 0 : index
    %243 = vector.load %arg14[%c0_203, %c0_204, %c0_205] : memref<1x1x10xf32, #tpu.memory_space<vmem>>, vector<1x1x10xf32>
    %244 = vector.shape_cast %243 : vector<1x1x10xf32> to vector<1x10xf32>
    %245 = vector.shape_cast %242 : vector<1x10xf32> to vector<1x1x10xf32>
    tpu.vector_store %arg14[%c0_203, %c0_204, %c0_205], %245 {strides = array<i32>} : memref<1x1x10xf32, #tpu.memory_space<vmem>>, vector<1x1x10xf32>,
    return
  }
  func.func @transform_0(%arg0: i32) -> (i32, i32, i32) {
    %c0_i32 = arith.constant 0 : i32
    %c0_i32_0 = arith.constant 0 : i32
    %c0_i32_1 = arith.constant 0 : i32
    return %arg0, %c0_i32, %c0_i32_0 : i32, i32, i32
  }
  func.func @transform_1(%arg0: i32) -> (i32, i32) {
    %c0_i32 = arith.constant 0 : i32
    %c0_i32_0 = arith.constant 0 : i32
    %c0_i32_1 = arith.constant 0 : i32
    return %c0_i32, %c0_i32_0 : i32, i32
  }
  func.func @transform_2(%arg0: i32) -> (i32, i32) {
    %c0_i32 = arith.constant 0 : i32
    %c0_i32_0 = arith.constant 0 : i32
    %c0_i32_1 = arith.constant 0 : i32
    return %c0_i32, %c0_i32_0 : i32, i32
  }
  func.func @transform_3(%arg0: i32) -> (i32, i32) {
    %c0_i32 = arith.constant 0 : i32
    %c0_i32_0 = arith.constant 0 : i32
    %c0_i32_1 = arith.constant 0 : i32
    return %c0_i32, %c0_i32_0 : i32, i32
  }
  func.func @transform_4(%arg0: i32) -> (i32, i32, i32, i32) {
    %c0_i32 = arith.constant 0 : i32
    %c0_i32_0 = arith.constant 0 : i32
    %c0_i32_1 = arith.constant 0 : i32
    %c0_i32_2 = arith.constant 0 : i32
    %c0_i32_3 = arith.constant 0 : i32
    return %c0_i32, %c0_i32_0, %c0_i32_1, %c0_i32_2 : i32, i32, i32, i32
  }
  func.func @transform_5(%arg0: i32) -> (i32, i32) {
    %c0_i32 = arith.constant 0 : i32
    %c0_i32_0 = arith.constant 0 : i32
    %c0_i32_1 = arith.constant 0 : i32
    return %c0_i32, %c0_i32_0 : i32, i32
  }
  func.func @transform_6(%arg0: i32) -> (i32, i32) {
    %c0_i32 = arith.constant 0 : i32
    %c0_i32_0 = arith.constant 0 : i32
    %c0_i32_1 = arith.constant 0 : i32
    return %c0_i32, %c0_i32_0 : i32, i32
  }
  func.func @transform_7(%arg0: i32) -> (i32, i32, i32) {
    %c0_i32 = arith.constant 0 : i32
    %c0_i32_0 = arith.constant 0 : i32
    %c0_i32_1 = arith.constant 0 : i32
    %c0_i32_2 = arith.constant 0 : i32
    return %c0_i32, %c0_i32_0, %c0_i32_1 : i32, i32, i32
  }
  func.func @transform_8(%arg0: i32) -> (i32, i32) {
    %c0_i32 = arith.constant 0 : i32
    %c0_i32_0 = arith.constant 0 : i32
    %c0_i32_1 = arith.constant 0 : i32
    return %c0_i32, %c0_i32_0 : i32, i32
  }
  func.func @transform_9(%arg0: i32) -> (i32, i32) {
    %c0_i32 = arith.constant 0 : i32
    %c0_i32_0 = arith.constant 0 : i32
    %c0_i32_1 = arith.constant 0 : i32
    return %c0_i32, %c0_i32_0 : i32, i32
  }
  func.func @transform_10(%arg0: i32) -> (i32, i32) {
    %c0_i32 = arith.constant 0 : i32
    %c0_i32_0 = arith.constant 0 : i32
    %c0_i32_1 = arith.constant 0 : i32
    return %c0_i32, %c0_i32_0 : i32, i32
  }
  func.func @transform_11(%arg0: i32) -> (i32, i32) {
    %c0_i32 = arith.constant 0 : i32
    %c0_i32_0 = arith.constant 0 : i32
    %c0_i32_1 = arith.constant 0 : i32
    return %c0_i32, %c0_i32_0 : i32, i32
  }
  func.func @transform_12(%arg0: i32) -> (i32, i32) {
    %c0_i32 = arith.constant 0 : i32
    %c0_i32_0 = arith.constant 0 : i32
    %c0_i32_1 = arith.constant 0 : i32
    return %c0_i32, %c0_i32_0 : i32, i32
  }
  func.func @transform_13(%arg0: i32) -> (i32, i32, i32) {
    %c0_i32 = arith.constant 0 : i32
    %c0_i32_0 = arith.constant 0 : i32
    %c0_i32_1 = arith.constant 0 : i32
    return %arg0, %c0_i32, %c0_i32_0 : i32, i32, i32
  }
}

</mosaic_0001>

<bundles_post_ra>
// kernel: lenet5_forward.1
= control target key start
LH: loop header
LB: loop body
LE: loop exit
PB: predicated region body
PF: predicated region fallthrough
CT: control target
= control target key end

     0   :  { %s8672_s0 = inlined_call_operand.vmem [shape: f32[2,75,784], index: 0, kind: input, shape index: {}]   ;;  %s8673_s1 = inlined_call_operand.vmem [shape: f32[6,75], index: 1, kind: input, shape index: {}]   ;;  %s8674_s2 = inlined_call_operand.vmem [shape: f32[6,1], index: 2, kind: input, shape index: {}]   ;;  %s8675_s3 = inlined_call_operand.vmem [shape: f32[784,196], index: 3, kind: input, shape index: {}]   ;;  %s8676_s4 = inlined_call_operand.vmem [shape: f32[5,5,16,6], index: 4, kind: input, shape index: {}]   ;;  %s8677_s5 = inlined_call_operand.vmem [shape: f32[16,1], index: 5, kind: input, shape index: {}]   ;;  %s8678_s6 = inlined_call_operand.vmem [shape: f32[136,25], index: 6, kind: input, shape index: {}]   ;;  %s8679_s7 = inlined_call_operand.vmem [shape: f32[16,25,120], index: 7, kind: input, shape index: {}]   ;;  %s8680_s8 = inlined_call_operand.vmem [shape: f32[1,120], index: 8, kind: input, shape index: {}]   ;;  %s8681_s9 = inlined_call_operand.vmem [shape: f32[120,84], index: 9, kind: input, shape index: {}]   ;;  %s8682_s10 = inlined_call_operand.vmem [shape: f32[1,84], index: 10, kind: input, shape index: {}]   ;;  %s8683_s11 = inlined_call_operand.vmem [shape: f32[84,10], index: 11, kind: input, shape index: {}]   ;;  %s8684_s12 = inlined_call_operand.vmem [shape: f32[1,10], index: 12, kind: input, shape index: {}]   ;;  %s8685_s13 = inlined_call_operand.hbm [shape: f32[2,1,10], index: 13, kind: output, shape index: {}]  }
   0x1   :  { %8686 = sst [smem:[#allocation5_spill]] %s8672_s0 }
   0x2   :  { %8687 = sst [smem:[#allocation6_spill]] %s8673_s1 }
   0x3   :  { %8688 = sst [smem:[#allocation7_spill]] %s8674_s2 }
   0x4   :  { %18 = vsyncpa [#allocation3], 0 }
   0x5   :  { %20 = vsyncpa [#allocation3 + $0x1], 0  ;;  %s6989_s25 = smov 0   ;;  %s6991_s26 = smov 0  }
   0x6   :  { %s6993_s27 = smov 0   ;;  %s6995_s28 = smov 0  }
   0x7 LB: > { %s7010_s29 = sadd.s32 4294967295, %s6887_s28   ;;  %s5500_s30 = sadd.s32 4294967294, %s6887_s28   ;;  %s6887_s28 = sphi %s6995_s28, %s8701_s28   ;;  %s6883_s27 = sphi %s6993_s27, %s8700_s27   ;;  %s6879_s26 = sphi %s6991_s26, %s8699_s26   ;;  %s6875_s25 = sphi %s6989_s25, %s8698_s25  }
   0x8   : > { %s7014_s14 = sadd.s32 1, %s6887_s28   ;;  %s311_s15 = sadd.s32 1, %s6883_s27 }
   0x9   : > { %s308_s16 = ssub.s32 %s6887_s28, %s7014_s14  ;;  %p321_p0 = scmp.ne.s32.totalorder %s6883_s27, %s6879_s26 }
   0xa   : > { %p309_p1 = scmp.eq.s32.totalorder %s308_s16, 0  ;;  %p322_p2 = scmp.eq.s32.totalorder %s7010_s29, 1 }
   0xb   : > { %p327_p3 = scmp.ne.s32.totalorder %s6879_s26, %s6875_s25  ;;  %p328_p4 = scmp.eq.s32.totalorder %s5500_s30, 1 }
   0xc   : > { %s7025_s17 = scalar_select %p309_p1, %s6883_s27, %s311_s15  }
   0xd   : > { %p7027_p5 = por %p322_p2, %p321_p0  ;;  %p7031_p6 = por %p328_p4, %p327_p3 }
   0xe   : > { %p5503_p7 = scmp.ge.s32.totalorder %s6887_s28, 1  ;;  %p390_p8 = scmp.lt.s32.totalorder %s6887_s28, 3 }
  0x10   : > { %p391_p9 = pnand %p5503_p7, %p390_p8 }
  0x11   : > { %p433_p10 = scmp.lt.s32.totalorder (!%p391_p9), %s7010_s29, 1  ;;  %v6889_v0 = vmov (!%p391_p9), 0.0|0.0   ;;  %v6890_v1 = vmov (!%p391_p9), 0.0   ;;  %vm6891_vm0 = vmmov (!%p391_p9), 0   ;;  %s8691_s2 = sld [smem:[#allocation7_spill]] (!%p391_p9)  ;;  %v6892_v3 = vmov (!%p391_p9), 0  }
  0x12   : > { %394 = sbr.rel (%p391_p9) target bundleno = 2491 (0x9bb), region = 72  ;;  %6207 = vmatprep.subr.bf16.mxu1 (!%p391_p9), %v6889_v0  ;;  %605 = vmatprep.mubr.f32.mxu0 (!%p391_p9), %v6890_v1  ;;  %s8692_s0 = sld [smem:[#allocation5_spill]] (!%p391_p9)  ;;  %vm519_vm1 = vcmask (!%p391_p9), 1042432   ;;  %vm6893_vm2 = vmmov (!%p391_p9), 1   ;;  %vm515_vm4 = vcmask (!%p391_p9), 613376   ;;  %v842_v47 = vld [vmem:[%s8675_s3 + $0x58] sm:$0xff] (!%p391_p9) }
  0x13   : > { %5904 = vmatprep.mubr.msk.f32.mxu1 (!%p391_p9), %vm6891_vm0, %v6890_v1  ;;  %6793 = vset.pattern.permute.xlu0 (!%p391_p9), %v6892_v3  ;;  %vm7085_vm3 = vmpackc.low (!%p391_p9), %vm519_vm1, %vm6893_vm2  ;;  %s8695_s1 = sld [smem:[#allocation6_spill]] (!%p391_p9)  ;;  %vm1027_vm5 = vcmask (!%p391_p9), 130048   ;;  %s6896_s21 = smov (!%p391_p9), 125   ;;  %vm1326_vm6 = vcmask (!%p391_p9), 1039360   ;;  %vm1335_vm7 = vcmask (!%p391_p9), 1045504   ;;  %vm1328_vm8 = vcmask (!%p391_p9), 48128  }
  0x14   : > { %6794 = vset.pattern.permute.xlu1 (!%p391_p9), %v6892_v3  ;;  %s6897_s22 = smov (!%p391_p9), 124   ;;  %s6899_s24 = smov (!%p391_p9), 113   ;;  %vm1511_vm9 = vcmask (!%p391_p9), 1031168   ;;  %vm1611_vm10 = vcmask (!%p391_p9), 1022976   ;;  %vm1711_vm11 = vcmask (!%p391_p9), 1014784   ;;  %vm1811_vm12 = vcmask (!%p391_p9), 932864  }
  0x15   : > { %s6902_s30 = smov (!%p391_p9), 110   ;;  %s6903_s16 = smov (!%p391_p9), 100   ;;  %vm1911_vm13 = vcmask (!%p391_p9), 924672   ;;  %vm2011_vm14 = vcmask (!%p391_p9), 916480   ;;  %vm2111_vm15 = vcmask (!%p391_p9), 908288   ;;  %vm2211_vm1 = vcmask (!%p391_p9), 900096  }
  0x17   : > { %v509_v2 = vld [vmem:[%s8691_s2] sm:$0x3f] (!%p391_p9) }
  0x18   : > { %512 = vperm.xlu0 (!%p391_p9), %6793, %v509_v2  }
  0x19   : > { %s434_s20 = scalar_select %p433_p10, %s7010_s29, 1  ;;  %v7105_v57 = vld [vmem:[%s8695_s1] sm:$0x3f] }
  0x1a   : > { %s6901_s1 = smov 111  }
  0x1b   : > { %s6724_s23 = smul.u32 560, %s434_s20  ;;  %s6894_s20 = smov 127  }
  0x1d   : > { %s7049_s15 = scalar_lea.vmem %s8692_s0, %s6724_s23  ;;  %s6898_s23 = smov 114  }
  0x1e   : > { %v439_v4 = vld [vmem:[%s7049_s15 + $0x8] sm:$0xff]  ;;  %v446_v5 = vld [vmem:[%s7049_s15 + $0x40] sm:$0xff]  ;;  %v445_v8 = vld [vmem:[%s7049_s15 + $0x38] sm:$0xff]  ;;  %s6900_s0 = smov 112  }
  0x1f   : > { %v438_v6 = vld [vmem:[%s7049_s15] sm:$0xff]  ;;  %v6141_v7 = vpack.c.bf16 %v446_v5, %v439_v4  ;;  %v444_v9 = vld [vmem:[%s7049_s15 + $0x30] sm:$0xff]  ;;  %v451_v10 = vld [vmem:[%s7049_s15 + $0x68] sm:$0xff] }
  0x20   : > { %v6143_v11 = vpack.c.bf16 %v445_v8, %v438_v6  ;;  %v6208_v12 = vpack.c.bf16 %v451_v10, %v444_v9  ;;  %v453_v13 = vld [vmem:[%s7049_s15 + $0x78] sm:$0xff]  ;;  %v460_v14 = vld [vmem:[%s7049_s15 + $0xb0] sm:$0xff]  ;;  %v459_v17 = vld [vmem:[%s7049_s15 + $0xa8] sm:$0xff] }
  0x21   : > { %v452_v15 = vld [vmem:[%s7049_s15 + $0x70] sm:$0xff]  ;;  %6142 = vmatprep.subr.bf16.mxu0 %v6141_v7  ;;  %v6145_v16 = vpack.c.bf16 %v460_v14, %v453_v13  ;;  %v458_v18 = vld [vmem:[%s7049_s15 + $0xa0] sm:$0xff]  ;;  %v465_v19 = vld [vmem:[%s7049_s15 + $0xd8] sm:$0xff] }
  0x22   : > { %6144 = vmatpush1.bf16.msra.mxu0 %v6143_v11  ;;  %6209 = vmatpush3.bf16.msra.mxu1 %v6208_v12  ;;  %v6147_v20 = vpack.c.bf16 %v459_v17, %v452_v15  ;;  %v6211_v21 = vpack.c.bf16 %v465_v19, %v458_v18  ;;  %v467_v22 = vld [vmem:[%s7049_s15 + $0xe8] sm:$0xff]  ;;  %v474_v23 = vld [vmem:[%s7049_s15 + $0x120] sm:$0xff]  ;;  %v473_v26 = vld [vmem:[%s7049_s15 + $0x118] sm:$0xff] }
  0x23   : > { %v466_v24 = vld [vmem:[%s7049_s15 + $0xe0] sm:$0xff]  ;;  %6146 = vmatprep.subr.bf16.mxu0 %v6145_v16  ;;  %6210 = vmatprep.subr.bf16.mxu1 %v6889_v0  ;;  %v6149_v25 = vpack.c.bf16 %v474_v23, %v467_v22  ;;  %v472_v27 = vld [vmem:[%s7049_s15 + $0x110] sm:$0xff]  ;;  %v479_v28 = vld [vmem:[%s7049_s15 + $0x148] sm:$0xff] }
  0x24   : > { %v481_v29 = vld [vmem:[%s7049_s15 + $0x158] sm:$0xff]  ;;  %v488_v30 = vld [vmem:[%s7049_s15 + $0x190] sm:$0xff]  ;;  %v6151_v31 = vpack.c.bf16 %v473_v26, %v466_v24  ;;  %v6214_v32 = vpack.c.bf16 %v479_v28, %v472_v27  ;;  %v487_v35 = vld [vmem:[%s7049_s15 + $0x188] sm:$0xff] }
  0x25   : > { %v480_v33 = vld [vmem:[%s7049_s15 + $0x150] sm:$0xff]  ;;  %v6153_v34 = vpack.c.bf16 %v488_v30, %v481_v29  ;;  %v486_v36 = vld [vmem:[%s7049_s15 + $0x180] sm:$0xff]  ;;  %v493_v37 = vld [vmem:[%s7049_s15 + $0x1b8] sm:$0xff] }
  0x26   : > { %6148 = vmatpush1.bf16.msra.mxu0 %v6147_v20  ;;  %6212 = vmatpush3.bf16.msra.mxu1 %v6211_v21  ;;  %v495_v38 = vld [vmem:[%s7049_s15 + $0x1c8] sm:$0xff]  ;;  %v502_v39 = vld [vmem:[%s7049_s15 + $0x200] sm:$0x7]  ;;  %v6155_v40 = vpack.c.bf16 %v487_v35, %v480_v33  ;;  %v6217_v41 = vpack.c.bf16 %v493_v37, %v486_v36  ;;  %v501_v44 = vld [vmem:[%s7049_s15 + $0x1f8] sm:$0x7] }
  0x27   : > { %6150 = vmatprep.subr.bf16.mxu0 %v6149_v25  ;;  %6213 = vmatprep.subr.bf16.mxu1 %v6889_v0  ;;  %v494_v42 = vld [vmem:[%s7049_s15 + $0x1c0] sm:$0xff]  ;;  %v6157_v43 = vpack.c.bf16 %v502_v39, %v495_v38  ;;  %v500_v45 = vld [vmem:[%s7049_s15 + $0x1f0] sm:$0xff]  ;;  %v507_v46 = vld [vmem:[%s7049_s15 + $0x228] sm:$0x7] }
  0x28   : > { %v441_v48 = vld [vmem:[%s7049_s15 + $0x18] sm:$0xff]  ;;  %v448_v49 = vld [vmem:[%s7049_s15 + $0x50] sm:$0xff]  ;;  %v6160_v50 = vpack.c.bf16 %v501_v44, %v494_v42  ;;  %v6220_v51 = vpack.c.bf16 %v507_v46, %v500_v45  ;;  %v447_v54 = vld [vmem:[%s7049_s15 + $0x48] sm:$0xff] }
  0x29   : > { %v6163_v52 = vpack.c.bf16 %v448_v49, %v441_v48  ;;  %v440_v53 = vld [vmem:[%s7049_s15 + $0x10] sm:$0xff]  ;;  %v455_v55 = vld [vmem:[%s7049_s15 + $0x88] sm:$0xff]  ;;  %v462_v56 = vld [vmem:[%s7049_s15 + $0xc0] sm:$0xff] }
  0x2a   : > { %6152 = vmatpush1.bf16.msra.mxu0 %v6151_v31  ;;  %6215 = vmatpush3.bf16.msra.mxu1 %v6214_v32  ;;  %v6165_v58 = vpack.c.bf16 %v447_v54, %v440_v53  ;;  %v6167_v59 = vpack.c.bf16 %v462_v56, %v455_v55  ;;  %v454_v60 = vld [vmem:[%s7049_s15 + $0x80] sm:$0xff]  ;;  %v461_v61 = vld [vmem:[%s7049_s15 + $0xb8] sm:$0xff]  ;;  %v476_v63 = vld [vmem:[%s7049_s15 + $0x130] sm:$0xff] }
  0x2b   : > { %6154 = vmatprep.subr.bf16.mxu0 %v6153_v34  ;;  %6216 = vmatprep.subr.bf16.mxu1 %v6889_v0  ;;  %v469_v62 = vld [vmem:[%s7049_s15 + $0xf8] sm:$0xff]  ;;  %v6169_v2 = vpack.c.bf16 %v461_v61, %v454_v60  ;;  %v468_v4 = vld [vmem:[%s7049_s15 + $0xf0] sm:$0xff]  ;;  %v475_v5 = vld [vmem:[%s7049_s15 + $0x128] sm:$0xff] }
  0x2c   : > { %v6171_v3 = vpack.c.bf16 %v476_v63, %v469_v62  ;;  %v483_v6 = vld [vmem:[%s7049_s15 + $0x168] sm:$0xff]  ;;  %v490_v7 = vld [vmem:[%s7049_s15 + $0x1a0] sm:$0xff]  ;;  %v6173_v8 = vpack.c.bf16 %v475_v5, %v468_v4  ;;  %v489_v11 = vld [vmem:[%s7049_s15 + $0x198] sm:$0xff] }
  0x2d   : > { %v6175_v9 = vpack.c.bf16 %v490_v7, %v483_v6  ;;  %v482_v10 = vld [vmem:[%s7049_s15 + $0x160] sm:$0xff]  ;;  %v497_v12 = vld [vmem:[%s7049_s15 + $0x1d8] sm:$0xff]  ;;  %v504_v13 = vld [vmem:[%s7049_s15 + $0x210] sm:$0x7] }
  0x2e   : > { %6156 = vmatpush1.bf16.msra.mxu0 %v6155_v40  ;;  %6218 = vmatpush3.bf16.msra.mxu1 %v6217_v41  ;;  %v6177_v14 = vpack.c.bf16 %v489_v11, %v482_v10  ;;  %v6179_v15 = vpack.c.bf16 %v504_v13, %v497_v12  ;;  %v496_v16 = vld [vmem:[%s7049_s15 + $0x1d0] sm:$0xff]  ;;  %v503_v17 = vld [vmem:[%s7049_s15 + $0x208] sm:$0x7]  ;;  %v450_v19 = vld [vmem:[%s7049_s15 + $0x60] sm:$0xff] }
  0x2f   : > { %6159 = vmatprep.subr.msk.bf16.mxu0 %vm7085_vm3, %v6157_v43  ;;  %6219 = vmatprep.subr.bf16.mxu1 %v6889_v0  ;;  %v443_v18 = vld [vmem:[%s7049_s15 + $0x28] sm:$0xff]  ;;  %v6182_v20 = vpack.c.bf16 %v503_v17, %v496_v16  ;;  %v442_v22 = vld [vmem:[%s7049_s15 + $0x20] sm:$0xff]  ;;  %v449_v23 = vld [vmem:[%s7049_s15 + $0x58] sm:$0xff] }
  0x30   : > { %v6185_v21 = vpack.c.bf16 %v450_v19, %v443_v18  ;;  %v457_v24 = vld [vmem:[%s7049_s15 + $0x98] sm:$0xff]  ;;  %v464_v25 = vld [vmem:[%s7049_s15 + $0xd0] sm:$0xff]  ;;  %v6187_v26 = vpack.c.bf16 %v449_v23, %v442_v22  ;;  %v463_v29 = vld [vmem:[%s7049_s15 + $0xc8] sm:$0xff] }
  0x31   : > { %v6189_v27 = vpack.c.bf16 %v464_v25, %v457_v24  ;;  %v456_v28 = vld [vmem:[%s7049_s15 + $0x90] sm:$0xff]  ;;  %v471_v30 = vld [vmem:[%s7049_s15 + $0x108] sm:$0xff]  ;;  %v478_v31 = vld [vmem:[%s7049_s15 + $0x140] sm:$0xff] }
  0x32   : > { %6162 = vmatpush1.bf16.msk.msra.mxu0 %vm7085_vm3, %v6160_v50  ;;  %6222 = vmatpush3.bf16.msk.msra.mxu1 %vm7085_vm3, %v6220_v51  ;;  %v6191_v32 = vpack.c.bf16 %v463_v29, %v456_v28  ;;  %v6193_v33 = vpack.c.bf16 %v478_v31, %v471_v30  ;;  %v470_v34 = vld [vmem:[%s7049_s15 + $0x100] sm:$0xff]  ;;  %v477_v35 = vld [vmem:[%s7049_s15 + $0x138] sm:$0xff]  ;;  %v492_v37 = vld [vmem:[%s7049_s15 + $0x1b0] sm:$0xff] }
  0x33   : > { %6164 = vmatprep.subr.bf16.mxu0 %v6163_v52  ;;  %v485_v36 = vld [vmem:[%s7049_s15 + $0x178] sm:$0xff]  ;;  %v6195_v38 = vpack.c.bf16 %v477_v35, %v470_v34  ;;  %v484_v40 = vld [vmem:[%s7049_s15 + $0x170] sm:$0xff]  ;;  %v491_v41 = vld [vmem:[%s7049_s15 + $0x1a8] sm:$0xff] }
  0x34   : > { %v6197_v39 = vpack.c.bf16 %v492_v37, %v485_v36  ;;  %v499_v42 = vld [vmem:[%s7049_s15 + $0x1e8] sm:$0xff]  ;;  %v506_v43 = vld [vmem:[%s7049_s15 + $0x220] sm:$0x7]  ;;  %v6199_v44 = vpack.c.bf16 %v491_v41, %v484_v40  ;;  %v505_v48 = vld [vmem:[%s7049_s15 + $0x218] sm:$0x7] }
  0x35   : > { %5507 = vmatmul.mubr.msk.f32.vlgmr.msra.gmra.mrb[0].mxu0 %vm515_vm4, %v7105_v57  ;;  %5905 = vmatmul.mubr.msk.f32.vlgmr.msra.gmra.mrb[0].mxu1 %vm515_vm4, %v7105_v57  ;;  %v6201_v45 = vpack.c.bf16 %v506_v43, %v499_v42  ;;  %v498_v46 = vld [vmem:[%s7049_s15 + $0x1e0] sm:$0xff]  ;;  %v832_v49 = vld [vmem:[%s8675_s3 + $0x8] sm:$0xff]  ;;  %v834_v50 = vld [vmem:[%s8675_s3 + $0x18] sm:$0xff]  ;;  %s6895_s15 = smov 126  }
  0x36   : > { %6166 = vmatpush1.bf16.msra.mxu0 %v6165_v58  ;;  %676 = vmatprep.mubr.f32.mxu0 %v6890_v1  ;;  %v6204_v51 = vpack.c.bf16 %v505_v48, %v498_v46  ;;  %v6223_v52 = vpack.c.bf16 %v834_v50, %v832_v49  ;;  %v831_v53 = vld [vmem:[%s8675_s3] sm:$0xff]  ;;  %v833_v54 = vld [vmem:[%s8675_s3 + $0x10] sm:$0xff]  ;;  %v836_v55 = vld [vmem:[%s8675_s3 + $0x28] sm:$0xff] }
  0x37   : > { %6168 = vmatprep.subr.bf16.mxu0 %v6167_v59  ;;  %1404 = vmatprep.mubr.f32.mxu1 %v6890_v1  ;;  %v838_v56 = vld [vmem:[%s8675_s3 + $0x38] sm:$0xff]  ;;  %v6225_v58 = vpack.c.bf16 %v833_v54, %v831_v53  ;;  %v835_v60 = vld [vmem:[%s8675_s3 + $0x20] sm:$0xff]  ;;  %v837_v61 = vld [vmem:[%s8675_s3 + $0x30] sm:$0xff] }
  0x38   : > { %v6227_v59 = vpack.c.bf16 %v838_v56, %v836_v55  ;;  %v840_v62 = vld [vmem:[%s8675_s3 + $0x48] sm:$0xff]  ;;  %v6229_v63 = vpack.c.bf16 %v837_v61, %v835_v60  ;;  %v841_v4 = vld [vmem:[%s8675_s3 + $0x50] sm:$0xff]  ;;  %v850_v11 = vld [vmem:[%s8675_s3 + $0x98] sm:$0xff] }
  0x39   : > { %v844_v5 = vld [vmem:[%s8675_s3 + $0x68] sm:$0xff]  ;;  %v854_v17 = vld [vmem:[%s8675_s3 + $0xb8] sm:$0xff] }
  0x3a   : > { %6170 = vmatpush1.bf16.msra.mxu0 %v6169_v2  ;;  %v6231_v2 = vpack.c.bf16 %v842_v47, %v840_v62  ;;  %v848_v10 = vld [vmem:[%s8675_s3 + $0x88] sm:$0xff]  ;;  %v858_v23 = vld [vmem:[%s8675_s3 + $0xd8] sm:$0xff] }
  0x3b   : > { %6172 = vmatprep.subr.bf16.mxu0 %v6171_v3  ;;  %v839_v3 = vld [vmem:[%s8675_s3 + $0x40] sm:$0xff]  ;;  %v6239_v13 = vpack.c.bf16 %v850_v11, %v848_v10  ;;  %v852_v16 = vld [vmem:[%s8675_s3 + $0xa8] sm:$0xff]  ;;  %v862_v29 = vld [vmem:[%s8675_s3 + $0xf8] sm:$0xff] }
  0x3c   : > { %v6233_v6 = vpack.c.bf16 %v841_v4, %v839_v3  ;;  %v6243_v19 = vpack.c.bf16 %v854_v17, %v852_v16  ;;  %v856_v22 = vld [vmem:[%s8675_s3 + $0xc8] sm:$0xff]  ;;  %v866_v35 = vld [vmem:[%s8675_s3 + $0x118] sm:$0xff] }
  0x3d   : > { %v6247_v25 = vpack.c.bf16 %v858_v23, %v856_v22  ;;  %v860_v28 = vld [vmem:[%s8675_s3 + $0xe8] sm:$0xff]  ;;  %v870_v41 = vld [vmem:[%s8675_s3 + $0x138] sm:$0xff] }
  0x3e   : > { %6174 = vmatpush1.bf16.msra.mxu0 %v6173_v8  ;;  %v843_v8 = vld [vmem:[%s8675_s3 + $0x60] sm:$0xff]  ;;  %v6251_v31 = vpack.c.bf16 %v862_v29, %v860_v28  ;;  %v864_v34 = vld [vmem:[%s8675_s3 + $0x108] sm:$0xff]  ;;  %v874_v48 = vld [vmem:[%s8675_s3 + $0x158] sm:$0xff] }
  0x3f   : > { %6176 = vmatprep.subr.bf16.mxu0 %v6175_v9  ;;  %v845_v9 = vld [vmem:[%s8675_s3 + $0x70] sm:$0xff]  ;;  %v6255_v37 = vpack.c.bf16 %v866_v35, %v864_v34  ;;  %v868_v40 = vld [vmem:[%s8675_s3 + $0x128] sm:$0xff]  ;;  %v878_v54 = vld [vmem:[%s8675_s3 + $0x178] sm:$0xff] }
  0x40   : > { %v6237_v12 = vpack.c.bf16 %v845_v9, %v843_v8  ;;  %v6259_v43 = vpack.c.bf16 %v870_v41, %v868_v40  ;;  %v872_v46 = vld [vmem:[%s8675_s3 + $0x148] sm:$0xff]  ;;  %v882_v61 = vld [vmem:[%s8675_s3 + $0x198] sm:$0xff] }
  0x41   : > { %v6263_v50 = vpack.c.bf16 %v874_v48, %v872_v46  ;;  %v876_v53 = vld [vmem:[%s8675_s3 + $0x168] sm:$0xff]  ;;  %v886_v4 = vld [vmem:[%s8675_s3 + $0x1b8] sm:$0xff]  ;;  %v905_v46 = vld [vmem:[%s8675_s3 + $0x250] sm:$0xff] }
  0x42   : > { %6178 = vmatpush1.bf16.msra.mxu0 %v6177_v14  ;;  %v847_v14 = vld [vmem:[%s8675_s3 + $0x80] sm:$0xff]  ;;  %v6267_v56 = vpack.c.bf16 %v878_v54, %v876_v53  ;;  %v880_v60 = vld [vmem:[%s8675_s3 + $0x188] sm:$0xff]  ;;  %v890_v9 = vld [vmem:[%s8675_s3 + $0x1d8] sm:$0xff] }
  0x43   : > { %6181 = vmatprep.subr.msk.bf16.mxu0 %vm7085_vm3, %v6179_v15  ;;  %v849_v15 = vld [vmem:[%s8675_s3 + $0x90] sm:$0xff]  ;;  %v6271_v47 = vpack.c.bf16 %v882_v61, %v880_v60  ;;  %v884_v3 = vld [vmem:[%s8675_s3 + $0x1a8] sm:$0xff]  ;;  %v902_v34 = vld [vmem:[%s8675_s3 + $0x238] sm:$0xff] }
  0x44   : > { %v6241_v18 = vpack.c.bf16 %v849_v15, %v847_v14  ;;  %v888_v8 = vld [vmem:[%s8675_s3 + $0x1c8] sm:$0xff]  ;;  %v894_v15 = vld [vmem:[%s8675_s3 + $0x1f8] sm:$0xff] }
  0x45   : > { %v6279_v11 = vpack.c.bf16 %v890_v9, %v888_v8  ;;  %v892_v14 = vld [vmem:[%s8675_s3 + $0x1e8] sm:$0xff] }
  0x46   : > { %6184 = vmatpush1.bf16.msk.msra.mxu0 %vm7085_vm3, %v6182_v20  ;;  %v851_v20 = vld [vmem:[%s8675_s3 + $0xa0] sm:$0xff]  ;;  %v6283_v17 = vpack.c.bf16 %v894_v15, %v892_v14  ;;  %v904_v41 = vld [vmem:[%s8675_s3 + $0x248] sm:$0xff]  ;;  %v926_v14 = vld [vmem:[%s8675_s3 + $0x2f8] sm:$0xff] }
  0x47   : > { %6186 = vmatprep.subr.bf16.mxu0 %v6185_v21  ;;  %v853_v21 = vld [vmem:[%s8675_s3 + $0xb0] sm:$0xff]  ;;  %v908_v48 = vld [vmem:[%s8675_s3 + $0x268] sm:$0xff] }
  0x48   : > { %v6245_v24 = vpack.c.bf16 %v853_v21, %v851_v20  ;;  %v896_v20 = vld [vmem:[%s8675_s3 + $0x208] sm:$0xff]  ;;  %v898_v21 = vld [vmem:[%s8675_s3 + $0x218] sm:$0xff] }
  0x49   : > { %5510 = vmatmul.mubr.msk.f32.vlgmr.msra.gmra.mrb[2].mxu0 %vm515_vm4, %v7105_v57  ;;  %v6287_v23 = vpack.c.bf16 %v898_v21, %v896_v20  ;;  %v930_v20 = vld [vmem:[%s8675_s3 + $0x318] sm:$0xff] }
  0x4a   : > { %6188 = vmatpush1.bf16.msra.mxu0 %v6187_v26  ;;  %747 = vmatprep.mubr.f32.mxu0 %v6890_v1  ;;  %v855_v26 = vld [vmem:[%s8675_s3 + $0xc0] sm:$0xff] }
  0x4b   : > { %6190 = vmatprep.subr.bf16.mxu0 %v6189_v27  ;;  %v857_v27 = vld [vmem:[%s8675_s3 + $0xd0] sm:$0xff] }
  0x4c   : > { %v6249_v30 = vpack.c.bf16 %v857_v27, %v855_v26 }
  0x4e   : > { %6192 = vmatpush1.bf16.msra.mxu0 %v6191_v32  ;;  %v859_v32 = vld [vmem:[%s8675_s3 + $0xe0] sm:$0xff] }
  0x4f   : > { %6194 = vmatprep.subr.bf16.mxu0 %v6193_v33  ;;  %v861_v33 = vld [vmem:[%s8675_s3 + $0xf0] sm:$0xff] }
  0x50   : > { %v6253_v36 = vpack.c.bf16 %v861_v33, %v859_v32  ;;  %v897_v32 = vld [vmem:[%s8675_s3 + $0x210] sm:$0xff]  ;;  %v900_v33 = vld [vmem:[%s8675_s3 + $0x228] sm:$0xff] }
  0x52   : > { %6196 = vmatpush1.bf16.msra.mxu0 %v6195_v38  ;;  %v863_v38 = vld [vmem:[%s8675_s3 + $0x100] sm:$0xff] }
  0x53   : > { %6198 = vmatprep.subr.bf16.mxu0 %v6197_v39  ;;  %v865_v39 = vld [vmem:[%s8675_s3 + $0x110] sm:$0xff] }
  0x54   : > { %v6257_v42 = vpack.c.bf16 %v865_v39, %v863_v38  ;;  %v899_v38 = vld [vmem:[%s8675_s3 + $0x220] sm:$0xff]  ;;  %v901_v39 = vld [vmem:[%s8675_s3 + $0x230] sm:$0xff] }
  0x56   : > { %6200 = vmatpush1.bf16.msra.mxu0 %v6199_v44  ;;  %v867_v44 = vld [vmem:[%s8675_s3 + $0x120] sm:$0xff] }
  0x57   : > { %6203 = vmatprep.subr.msk.bf16.mxu0 %vm7085_vm3, %v6201_v45  ;;  %v869_v45 = vld [vmem:[%s8675_s3 + $0x130] sm:$0xff] }
  0x58   : > { %v6261_v49 = vpack.c.bf16 %v869_v45, %v867_v44  ;;  %v903_v45 = vld [vmem:[%s8675_s3 + $0x240] sm:$0xff] }
  0x5a   : > { %6206 = vmatpush1.bf16.msk.msra.mxu0 %vm7085_vm3, %v6204_v51  ;;  %v871_v51 = vld [vmem:[%s8675_s3 + $0x140] sm:$0xff]  ;;  %vm2311_vm3 = vcmask 818176  }
  0x5b   : > { %6224 = vmatprep.subr.bf16.mxu0 %v6223_v52  ;;  %v873_v52 = vld [vmem:[%s8675_s3 + $0x150] sm:$0xff] }
  0x5c   : > { %v6265_v55 = vpack.c.bf16 %v873_v52, %v871_v51  ;;  %v6297_v52 = vpack.c.bf16 %v905_v46, %v903_v45  ;;  %v939_v45 = vld [vmem:[%s8675_s3 + $0x360] sm:$0xff]  ;;  %v941_v46 = vld [vmem:[%s8675_s3 + $0x370] sm:$0xff] }
  0x5d   : > { %5513 = vmatmul.mubr.msk.f32.vlgmr.msra.gmra.mrb[4].mxu0 %vm515_vm4, %v7105_v57  ;;  %v846_v57 = vld [vmem:[%s8675_s3 + $0x78] sm:$0xff]  ;;  %vm2411_vm4 = vcmask 809984  }
  0x5e   : > { %6226 = vmatpush1.bf16.msra.mxu0 %v6225_v58  ;;  %v6235_v7 = vpack.c.bf16 %v846_v57, %v844_v5  ;;  %v875_v58 = vld [vmem:[%s8675_s3 + $0x160] sm:$0xff]  ;;  %v6275_v57 = vpack.c.bf16 %v886_v4, %v884_v3 }
  0x5f   : > { %6228 = vmatprep.subr.bf16.mxu0 %v6227_v59  ;;  %v877_v59 = vld [vmem:[%s8675_s3 + $0x170] sm:$0xff] }
  0x60   : > { %v6269_v62 = vpack.c.bf16 %v877_v59, %v875_v58  ;;  %v912_v58 = vld [vmem:[%s8675_s3 + $0x288] sm:$0xff]  ;;  %v914_v59 = vld [vmem:[%s8675_s3 + $0x298] sm:$0xff] }
  0x61   : > { %v6303_v61 = vpack.c.bf16 %v914_v59, %v912_v58 }
  0x62   : > { %6230 = vmatpush1.bf16.msra.mxu0 %v6229_v63  ;;  %v879_v63 = vld [vmem:[%s8675_s3 + $0x180] sm:$0xff] }
  0x63   : > { %6232 = vmatprep.subr.bf16.mxu0 %v6231_v2  ;;  %v881_v2 = vld [vmem:[%s8675_s3 + $0x190] sm:$0xff] }
  0x64   : > { %v6273_v5 = vpack.c.bf16 %v881_v2, %v879_v63  ;;  %v916_v63 = vld [vmem:[%s8675_s3 + $0x2a8] sm:$0xff]  ;;  %v918_v2 = vld [vmem:[%s8675_s3 + $0x2b8] sm:$0xff] }
  0x65   : > { %v6307_v4 = vpack.c.bf16 %v918_v2, %v916_v63 }
  0x66   : > { %6234 = vmatpush1.bf16.msra.mxu0 %v6233_v6  ;;  %v883_v6 = vld [vmem:[%s8675_s3 + $0x1a0] sm:$0xff] }
  0x67   : > { %6236 = vmatprep.subr.bf16.mxu0 %v6235_v7  ;;  %v885_v7 = vld [vmem:[%s8675_s3 + $0x1b0] sm:$0xff] }
  0x68   : > { %v6277_v10 = vpack.c.bf16 %v885_v7, %v883_v6  ;;  %v920_v6 = vld [vmem:[%s8675_s3 + $0x2c8] sm:$0xff]  ;;  %v922_v7 = vld [vmem:[%s8675_s3 + $0x2d8] sm:$0xff] }
  0x6a   : > { %6238 = vmatpush1.bf16.msra.mxu0 %v6237_v12  ;;  %v887_v12 = vld [vmem:[%s8675_s3 + $0x1c0] sm:$0xff] }
  0x6b   : > { %6240 = vmatprep.subr.bf16.mxu0 %v6239_v13  ;;  %v889_v13 = vld [vmem:[%s8675_s3 + $0x1d0] sm:$0xff] }
  0x6c   : > { %v6281_v16 = vpack.c.bf16 %v889_v13, %v887_v12  ;;  %v921_v12 = vld [vmem:[%s8675_s3 + $0x2d0] sm:$0xff]  ;;  %v924_v13 = vld [vmem:[%s8675_s3 + $0x2e8] sm:$0xff] }
  0x6e   : > { %6242 = vmatpush1.bf16.msra.mxu0 %v6241_v18  ;;  %v891_v18 = vld [vmem:[%s8675_s3 + $0x1e0] sm:$0xff] }
  0x6f   : > { %6244 = vmatprep.subr.bf16.mxu0 %v6243_v19  ;;  %v893_v19 = vld [vmem:[%s8675_s3 + $0x1f0] sm:$0xff] }
  0x70   : > { %v6285_v22 = vpack.c.bf16 %v893_v19, %v891_v18  ;;  %v925_v18 = vld [vmem:[%s8675_s3 + $0x2f0] sm:$0xff]  ;;  %v928_v19 = vld [vmem:[%s8675_s3 + $0x308] sm:$0xff] }
  0x72   : > { %6246 = vmatpush1.bf16.msra.mxu0 %v6245_v24 }
  0x73   : > { %6248 = vmatprep.subr.bf16.mxu0 %v6247_v25 }
  0x76   : > { %6250 = vmatpush1.bf16.msra.mxu0 %v6249_v30 }
  0x77   : > { %6252 = vmatprep.subr.bf16.mxu0 %v6251_v31  ;;  %v895_v31 = vld [vmem:[%s8675_s3 + $0x200] sm:$0xff] }
  0x78   : > { %v6289_v35 = vpack.c.bf16 %v897_v32, %v895_v31 }
  0x7a   : > { %6254 = vmatpush1.bf16.msra.mxu0 %v6253_v36 }
  0x7b   : > { %6256 = vmatprep.subr.bf16.mxu0 %v6255_v37  ;;  %v6291_v37 = vpack.c.bf16 %v902_v34, %v900_v33  ;;  %v931_v33 = vld [vmem:[%s8675_s3 + $0x320] sm:$0xff]  ;;  %v933_v34 = vld [vmem:[%s8675_s3 + $0x330] sm:$0xff] }
  0x7e   : > { %6258 = vmatpush1.bf16.msra.mxu0 %v6257_v42  ;;  %v906_v42 = vld [vmem:[%s8675_s3 + $0x258] sm:$0xff] }
  0x7f   : > { %6260 = vmatprep.subr.bf16.mxu0 %v6259_v43  ;;  %v6293_v43 = vpack.c.bf16 %v901_v39, %v899_v38  ;;  %v6295_v44 = vpack.c.bf16 %v906_v42, %v904_v41  ;;  %v935_v39 = vld [vmem:[%s8675_s3 + $0x340] sm:$0xff]  ;;  %v940_v41 = vld [vmem:[%s8675_s3 + $0x368] sm:$0xff]  ;;  %v942_v42 = vld [vmem:[%s8675_s3 + $0x378] sm:$0xff] }
  0x82   : > { %6262 = vmatpush1.bf16.msra.mxu0 %v6261_v49  ;;  %v910_v49 = vld [vmem:[%s8675_s3 + $0x278] sm:$0xff] }
  0x83   : > { %6264 = vmatprep.subr.bf16.mxu0 %v6263_v50  ;;  %v6299_v54 = vpack.c.bf16 %v910_v49, %v908_v48  ;;  %v944_v48 = vld [vmem:[%s8675_s3 + $0x388] sm:$0xff]  ;;  %v946_v49 = vld [vmem:[%s8675_s3 + $0x398] sm:$0xff] }
  0x86   : > { %6266 = vmatpush1.bf16.msra.mxu0 %v6265_v55  ;;  %v907_v55 = vld [vmem:[%s8675_s3 + $0x260] sm:$0xff] }
  0x87   : > { %6268 = vmatprep.subr.bf16.mxu0 %v6267_v56  ;;  %v909_v56 = vld [vmem:[%s8675_s3 + $0x270] sm:$0xff] }
  0x88   : > { %v6301_v60 = vpack.c.bf16 %v909_v56, %v907_v55  ;;  %v948_v55 = vld [vmem:[%s8675_s3 + $0x3a8] sm:$0xff]  ;;  %v950_v56 = vld [vmem:[%s8675_s3 + $0x3b8] sm:$0xff] }
  0x89   : > { %v6339_v59 = vpack.c.bf16 %v950_v56, %v948_v55  ;;  %v986_v55 = vld [vmem:[%s8675_s3 + $0x4d8] sm:$0xff] }
  0x8a   : > { %6270 = vmatpush1.bf16.msra.mxu0 %v6269_v62  ;;  %v911_v62 = vld [vmem:[%s8675_s3 + $0x280] sm:$0xff] }
  0x8b   : > { %6272 = vmatprep.subr.bf16.mxu0 %v6271_v47  ;;  %v913_v47 = vld [vmem:[%s8675_s3 + $0x290] sm:$0xff] }
  0x8c   : > { %v6305_v3 = vpack.c.bf16 %v913_v47, %v911_v62  ;;  %v952_v62 = vld [vmem:[%s8675_s3 + $0x3c8] sm:$0xff]  ;;  %v954_v47 = vld [vmem:[%s8675_s3 + $0x3d8] sm:$0xff] }
  0x8e   : > { %6274 = vmatpush1.bf16.msra.mxu0 %v6273_v5  ;;  %v915_v5 = vld [vmem:[%s8675_s3 + $0x2a0] sm:$0xff] }
  0x8f   : > { %6276 = vmatprep.subr.bf16.mxu0 %v6275_v57  ;;  %v917_v57 = vld [vmem:[%s8675_s3 + $0x2b0] sm:$0xff] }
  0x90   : > { %v6309_v8 = vpack.c.bf16 %v917_v57, %v915_v5  ;;  %v951_v5 = vld [vmem:[%s8675_s3 + $0x3c0] sm:$0xff]  ;;  %v953_v57 = vld [vmem:[%s8675_s3 + $0x3d0] sm:$0xff] }
  0x92   : > { %6278 = vmatpush1.bf16.msra.mxu0 %v6277_v10  ;;  %v6311_v10 = vpack.c.bf16 %v922_v7, %v920_v6  ;;  %v956_v6 = vld [vmem:[%s8675_s3 + $0x3e8] sm:$0xff]  ;;  %v6345_v7 = vpack.c.bf16 %v953_v57, %v951_v5  ;;  %v994_v5 = vld [vmem:[%s8675_s3 + $0x518] sm:$0xff] }
  0x93   : > { %6280 = vmatprep.subr.bf16.mxu0 %v6279_v11  ;;  %v919_v11 = vld [vmem:[%s8675_s3 + $0x2c0] sm:$0xff] }
  0x94   : > { %v6313_v15 = vpack.c.bf16 %v921_v12, %v919_v11  ;;  %v960_v11 = vld [vmem:[%s8675_s3 + $0x408] sm:$0xff]  ;;  %v962_v12 = vld [vmem:[%s8675_s3 + $0x418] sm:$0xff] }
  0x96   : > { %6282 = vmatpush1.bf16.msra.mxu0 %v6281_v16  ;;  %v6315_v16 = vpack.c.bf16 %v926_v14, %v924_v13  ;;  %v6351_v14 = vpack.c.bf16 %v962_v12, %v960_v11  ;;  %v995_v12 = vld [vmem:[%s8675_s3 + $0x520] sm:$0xff] }
  0x97   : > { %6284 = vmatprep.subr.bf16.mxu0 %v6283_v17  ;;  %v7358_v24 = vpop.permute.xlu0 %512  ;;  %v923_v17 = vld [vmem:[%s8675_s3 + $0x2e0] sm:$0xff] }
  0x9a   : > { %6286 = vmatpush1.bf16.msra.mxu0 %v6285_v22 }
  0x9b   : > { %6288 = vmatprep.subr.bf16.mxu0 %v6287_v23  ;;  %v6317_v23 = vpack.c.bf16 %v925_v18, %v923_v17  ;;  %v964_v17 = vld [vmem:[%s8675_s3 + $0x428] sm:$0xff]  ;;  %v966_v18 = vld [vmem:[%s8675_s3 + $0x438] sm:$0xff] }
 0x108   : > { %v607_v25 = vpop.f32.mrb[0].mxu0  ;;  %v7360_v26 = vpop.f32.mrb[0].mxu1 }
 0x109   : > { %v608_v27 = vadd.f32 %v607_v25, %v7358_v24  ;;  %v609_v28 = vpop.f32.mrb[1].mxu0  ;;  %v5906_v29 = vpop.f32.mrb[1].mxu1  ;;  %v6319_v25 = vpack.c.bf16 %v930_v20, %v928_v19  ;;  %v6355_v20 = vpack.c.bf16 %v966_v18, %v964_v17  ;;  %v999_v18 = vld [vmem:[%s8675_s3 + $0x540] sm:$0xff] }
 0x10a   : > { %v610_v30 = vadd.f32 %v609_v28, %v7358_v24  ;;  %v929_v28 = vld [vmem:[%s8675_s3 + $0x310] sm:$0xff]  ;;  %v932_v29 = vld [vmem:[%s8675_s3 + $0x328] sm:$0xff] }
 0x10c   : > { %6795 = vtanh.f32 %v610_v30  ;;  %v934_v30 = vld [vmem:[%s8675_s3 + $0x338] sm:$0xff] }
 0x10d   : > { %6797 = vtanh.f32 %v608_v27  ;;  %v927_v27 = vld [vmem:[%s8675_s3 + $0x300] sm:$0xff]  ;;  %v6323_v32 = vpack.c.bf16 %v934_v30, %v932_v29 }
 0x10e   : > { %v6321_v31 = vpack.c.bf16 %v929_v28, %v927_v27  ;;  %v968_v27 = vld [vmem:[%s8675_s3 + $0x448] sm:$0xff]  ;;  %v970_v28 = vld [vmem:[%s8675_s3 + $0x458] sm:$0xff] }
 0x116   : > { %v6796_v36 = vpop.eup %6795 }
 0x117   : > { %v6798_v40 = vpop.eup %6797  ;;  %1095 = vmatprep.mubr.f32.mxu0 %v6796_v36  ;;  %v938_v36 = vld [vmem:[%s8675_s3 + $0x358] sm:$0xff] }
 0x118   : > { %1096 = vmatmul.mubr.f32.vlgmr.msra.gmra.mrb[6].mxu0 %v6798_v40  ;;  %v937_v40 = vld [vmem:[%s8675_s3 + $0x350] sm:$0xff] }
 0x119   : > { %6290 = vmatpush1.bf16.msra.mxu0 %v6289_v35  ;;  %v936_v35 = vld [vmem:[%s8675_s3 + $0x348] sm:$0xff] }
 0x11a   : > { %6292 = vmatprep.subr.bf16.mxu0 %v6291_v37  ;;  %v6325_v37 = vpack.c.bf16 %v933_v34, %v931_v33  ;;  %v6327_v38 = vpack.c.bf16 %v938_v36, %v936_v35  ;;  %v969_v33 = vld [vmem:[%s8675_s3 + $0x450] sm:$0xff]  ;;  %v972_v34 = vld [vmem:[%s8675_s3 + $0x468] sm:$0xff]  ;;  %v974_v35 = vld [vmem:[%s8675_s3 + $0x478] sm:$0xff] }
 0x11c   : > { %v7400_v50 = vpop.f32.mrb[2].mxu0 }
 0x11d   : > { %6294 = vmatpush1.bf16.msra.mxu0 %v6293_v43  ;;  %v680_v51 = vpop.f32.mrb[3].mxu0  ;;  %v6329_v43 = vpack.c.bf16 %v937_v40, %v935_v39  ;;  %v679_v63 = vadd.f32 %v7400_v50, %v7358_v24  ;;  %v958_v50 = vld [vmem:[%s8675_s3 + $0x3f8] sm:$0xff]  ;;  %v973_v39 = vld [vmem:[%s8675_s3 + $0x470] sm:$0xff]  ;;  %v976_v40 = vld [vmem:[%s8675_s3 + $0x488] sm:$0xff] }
 0x11e   : > { %v681_v53 = vadd.f32 %v680_v51, %v7358_v24  ;;  %6296 = vmatprep.subr.bf16.mxu0 %v6295_v44  ;;  %v6331_v44 = vpack.c.bf16 %v942_v42, %v940_v41  ;;  %v6333_v51 = vpack.c.bf16 %v941_v46, %v939_v45  ;;  %v978_v41 = vld [vmem:[%s8675_s3 + $0x498] sm:$0xff]  ;;  %v977_v45 = vld [vmem:[%s8675_s3 + $0x490] sm:$0xff]  ;;  %v980_v46 = vld [vmem:[%s8675_s3 + $0x4a8] sm:$0xff] }
 0x120   : > { %6799 = vtanh.f32 %v681_v53  ;;  %v943_v53 = vld [vmem:[%s8675_s3 + $0x380] sm:$0xff] }
 0x121   : > { %6298 = vmatpush1.bf16.msra.mxu0 %v6297_v52  ;;  %v6335_v52 = vpack.c.bf16 %v946_v49, %v944_v48  ;;  %6801 = vtanh.f32 %v679_v63  ;;  %v982_v48 = vld [vmem:[%s8675_s3 + $0x4b8] sm:$0xff] }
 0x122   : > { %6300 = vmatprep.subr.bf16.mxu0 %v6299_v54  ;;  %v945_v54 = vld [vmem:[%s8675_s3 + $0x390] sm:$0xff] }
 0x123   : > { %v6337_v58 = vpack.c.bf16 %v945_v54, %v943_v53  ;;  %v981_v53 = vld [vmem:[%s8675_s3 + $0x4b0] sm:$0xff]  ;;  %v984_v54 = vld [vmem:[%s8675_s3 + $0x4c8] sm:$0xff] }
 0x125   : > { %6302 = vmatpush1.bf16.msra.mxu0 %v6301_v60  ;;  %v947_v60 = vld [vmem:[%s8675_s3 + $0x3a0] sm:$0xff] }
 0x126   : > { %6304 = vmatprep.subr.bf16.mxu0 %v6303_v61  ;;  %v949_v61 = vld [vmem:[%s8675_s3 + $0x3b0] sm:$0xff] }
 0x127   : > { %v6341_v2 = vpack.c.bf16 %v949_v61, %v947_v60  ;;  %v985_v60 = vld [vmem:[%s8675_s3 + $0x4d0] sm:$0xff]  ;;  %v988_v61 = vld [vmem:[%s8675_s3 + $0x4e8] sm:$0xff] }
 0x129   : > { %6306 = vmatpush1.bf16.msra.mxu0 %v6305_v3 }
 0x12a   : > { %v6800_v9 = vpop.eup %6799  ;;  %6308 = vmatprep.subr.bf16.mxu0 %v6307_v4  ;;  %v6343_v4 = vpack.c.bf16 %v954_v47, %v952_v62  ;;  %v990_v62 = vld [vmem:[%s8675_s3 + $0x4f8] sm:$0xff] }
 0x12b   : > { %1166 = vmatprep.mubr.f32.mxu0 %v6800_v9  ;;  %v955_v9 = vld [vmem:[%s8675_s3 + $0x3e0] sm:$0xff]  ;;  %v6379_v63 = vpack.c.bf16 %v990_v62, %v988_v61  ;;  %v1025_v62 = vld [vmem:[%s8675_s3 + $0x610] sm:$0xff] }
 0x12c   : > { %v1023_v61 = vld [vmem:[%s8675_s3 + $0x600] sm:$0xff] }
 0x12d   : > { %6310 = vmatpush1.bf16.msra.mxu0 %v6309_v8  ;;  %v6347_v8 = vpack.c.bf16 %v958_v50, %v956_v6  ;;  %v991_v50 = vld [vmem:[%s8675_s3 + $0x500] sm:$0xff] }
 0x12e   : > { %6312 = vmatprep.subr.bf16.mxu0 %v6311_v10  ;;  %v957_v10 = vld [vmem:[%s8675_s3 + $0x3f0] sm:$0xff] }
 0x12f   : > { %v6349_v13 = vpack.c.bf16 %v957_v10, %v955_v9  ;;  %v998_v9 = vld [vmem:[%s8675_s3 + $0x538] sm:$0xff] }
 0x130   : > { %v7463_v21 = vpop.f32.mrb[4].mxu0 }
 0x131   : > { %6314 = vmatpush1.bf16.msra.mxu0 %v6313_v15  ;;  %v751_v22 = vpop.f32.mrb[5].mxu0  ;;  %v959_v15 = vld [vmem:[%s8675_s3 + $0x400] sm:$0xff] }
 0x132   : > { %6316 = vmatprep.subr.bf16.mxu0 %v6315_v16  ;;  %v752_v3 = vadd.f32 %v751_v22, %v7358_v24  ;;  %v961_v16 = vld [vmem:[%s8675_s3 + $0x410] sm:$0xff]  ;;  %v963_v22 = vld [vmem:[%s8675_s3 + $0x420] sm:$0xff] }
 0x133   : > { %v6353_v19 = vpack.c.bf16 %v961_v16, %v959_v15  ;;  %v1002_v15 = vld [vmem:[%s8675_s3 + $0x558] sm:$0xff] }
 0x134   : > { %6803 = vtanh.f32 %v752_v3  ;;  %v989_v3 = vld [vmem:[%s8675_s3 + $0x4f0] sm:$0xff] }
 0x135   : > { %6318 = vmatpush1.bf16.msra.mxu0 %v6317_v23  ;;  %v965_v23 = vld [vmem:[%s8675_s3 + $0x430] sm:$0xff] }
 0x136   : > { %6320 = vmatprep.subr.bf16.mxu0 %v6319_v25  ;;  %v6802_v25 = vpop.eup %6801  ;;  %v6357_v30 = vpack.c.bf16 %v965_v23, %v963_v22  ;;  %v1006_v22 = vld [vmem:[%s8675_s3 + $0x578] sm:$0xff] }
 0x139   : > { %6322 = vmatpush1.bf16.msra.mxu0 %v6321_v31  ;;  %v6359_v31 = vpack.c.bf16 %v970_v28, %v968_v27  ;;  %v1003_v27 = vld [vmem:[%s8675_s3 + $0x560] sm:$0xff]  ;;  %v1005_v28 = vld [vmem:[%s8675_s3 + $0x570] sm:$0xff] }
 0x13a   : > { %6324 = vmatprep.subr.bf16.mxu0 %v6323_v32  ;;  %v967_v32 = vld [vmem:[%s8675_s3 + $0x440] sm:$0xff] }
 0x13b   : > { %v6361_v36 = vpack.c.bf16 %v969_v33, %v967_v32  ;;  %v1007_v33 = vld [vmem:[%s8675_s3 + $0x580] sm:$0xff] }
 0x13d   : > { %6326 = vmatpush1.bf16.msra.mxu0 %v6325_v37  ;;  %v6363_v37 = vpack.c.bf16 %v974_v35, %v972_v34  ;;  %v1009_v34 = vld [vmem:[%s8675_s3 + $0x590] sm:$0xff]  ;;  %v1012_v35 = vld [vmem:[%s8675_s3 + $0x5a8] sm:$0xff] }
 0x13e   : > { %6328 = vmatprep.subr.bf16.mxu0 %v6327_v38  ;;  %v6804_v29 = vpop.eup %6803  ;;  %v971_v38 = vld [vmem:[%s8675_s3 + $0x460] sm:$0xff] }
 0x13f   : > { %v6365_v42 = vpack.c.bf16 %v973_v39, %v971_v38  ;;  %v1011_v39 = vld [vmem:[%s8675_s3 + $0x5a0] sm:$0xff] }
 0x141   : > { %6330 = vmatpush1.bf16.msra.mxu0 %v6329_v43  ;;  %v6367_v43 = vpack.c.bf16 %v978_v41, %v976_v40  ;;  %v1013_v40 = vld [vmem:[%s8675_s3 + $0x5b0] sm:$0xff]  ;;  %v1016_v41 = vld [vmem:[%s8675_s3 + $0x5c8] sm:$0xff] }
 0x142   : > { %6332 = vmatprep.subr.bf16.mxu0 %v6331_v44  ;;  %v975_v44 = vld [vmem:[%s8675_s3 + $0x480] sm:$0xff] }
 0x143   : > { %v6369_v49 = vpack.c.bf16 %v977_v45, %v975_v44  ;;  %v6405_v44 = vpack.c.bf16 %v1013_v40, %v1011_v39  ;;  %v5552_v40 = vld [vmem:[%s8676_s4 + $0x68] sm:$0xff] }
 0x145   : > { %6334 = vmatpush1.bf16.msra.mxu0 %v6333_v51  ;;  %v6371_v51 = vpack.c.bf16 %v982_v48, %v980_v46  ;;  %v1015_v46 = vld [vmem:[%s8675_s3 + $0x5c0] sm:$0xff]  ;;  %v1017_v48 = vld [vmem:[%s8675_s3 + $0x5d0] sm:$0xff] }
 0x146   : > { %6336 = vmatprep.subr.bf16.mxu0 %v6335_v52  ;;  %v979_v52 = vld [vmem:[%s8675_s3 + $0x4a0] sm:$0xff] }
 0x147   : > { %v6373_v56 = vpack.c.bf16 %v981_v53, %v979_v52  ;;  %v1019_v53 = vld [vmem:[%s8675_s3 + $0x5e0] sm:$0xff] }
 0x149   : > { %6338 = vmatpush1.bf16.msra.mxu0 %v6337_v58  ;;  %v6375_v58 = vpack.c.bf16 %v986_v55, %v984_v54  ;;  %v1021_v54 = vld [vmem:[%s8675_s3 + $0x5f0] sm:$0xff]  ;;  %v1024_v55 = vld [vmem:[%s8675_s3 + $0x608] sm:$0xff] }
 0x14a   : > { %6340 = vmatprep.subr.bf16.mxu0 %v6339_v59  ;;  %v983_v59 = vld [vmem:[%s8675_s3 + $0x4c0] sm:$0xff] }
 0x14b   : > { %v6377_v47 = vpack.c.bf16 %v985_v60, %v983_v59  ;;  %v6413_v59 = vpack.c.bf16 %v1021_v54, %v1019_v53  ;;  %v3824_v53 = vld [vmem:[%s8678_s6] sm:$0xff]  ;;  %v3825_v54 = vld [vmem:[%s8678_s6 + $0x8] sm:$0xff] }
 0x14d   : > { %6342 = vmatpush1.bf16.msra.mxu0 %v6341_v2  ;;  %v987_v2 = vld [vmem:[%s8675_s3 + $0x4e0] sm:$0xff] }
 0x14e   : > { %6344 = vmatprep.subr.bf16.mxu0 %v6343_v4  ;;  %v992_v4 = vld [vmem:[%s8675_s3 + $0x508] sm:$0xff]  ;;  %v6381_v57 = vpack.c.bf16 %v989_v3, %v987_v2 }
 0x14f   : > { %v6383_v6 = vpack.c.bf16 %v994_v5, %v992_v4  ;;  %v3805_v3 = vld [vmem:[%s8677_s5 + $0x8] sm:$0xff] }
 0x151   : > { %6346 = vmatpush1.bf16.msra.mxu0 %v6345_v7  ;;  %v993_v7 = vld [vmem:[%s8675_s3 + $0x510] sm:$0xff] }
 0x152   : > { %6348 = vmatprep.subr.bf16.mxu0 %v6347_v8  ;;  %v996_v8 = vld [vmem:[%s8675_s3 + $0x528] sm:$0xff]  ;;  %v6385_v10 = vpack.c.bf16 %v993_v7, %v991_v50  ;;  %v5518_v7 = vld [vmem:[%s8676_s4 + $0x18] sm:$0xff] }
 0x153   : > { %v6387_v11 = vpack.c.bf16 %v998_v9, %v996_v8  ;;  %v1315_v9 = vld [vmem:[%s8676_s4] sm:$0xff] }
 0x155   : > { %6350 = vmatpush1.bf16.msra.mxu0 %v6349_v13  ;;  %v997_v13 = vld [vmem:[%s8675_s3 + $0x530] sm:$0xff] }
 0x156   : > { %6352 = vmatprep.subr.bf16.mxu0 %v6351_v14  ;;  %v1000_v14 = vld [vmem:[%s8675_s3 + $0x548] sm:$0xff]  ;;  %v6389_v16 = vpack.c.bf16 %v997_v13, %v995_v12 }
 0x157   : > { %v6391_v17 = vpack.c.bf16 %v1002_v15, %v1000_v14  ;;  %v1316_v12 = vld [vmem:[%s8676_s4 + $0x8] sm:$0xff]  ;;  %v5527_v14 = vld [vmem:[%s8676_s4 + $0x20] sm:$0xff] }
 0x158   : > { %1167 = vmatmul.mubr.f32.vlgmr.msra.gmra.mrb[6].mxu0 %v6802_v25 }
 0x159   : > { %6354 = vmatpush1.bf16.msra.mxu0 %v6353_v19  ;;  %1237 = vmatprep.mubr.f32.mxu0 %v6804_v29  ;;  %v1001_v19 = vld [vmem:[%s8675_s3 + $0x550] sm:$0xff]  ;;  %v1008_v29 = vld [vmem:[%s8675_s3 + $0x588] sm:$0xff] }
 0x15a   : > { %6356 = vmatprep.subr.bf16.mxu0 %v6355_v20  ;;  %v1004_v20 = vld [vmem:[%s8675_s3 + $0x568] sm:$0xff]  ;;  %v6393_v23 = vpack.c.bf16 %v1001_v19, %v999_v18  ;;  %v5533_v19 = vld [vmem:[%s8676_s4 + $0x30] sm:$0xff] }
 0x15b   : > { %v6395_v25 = vpack.c.bf16 %v1006_v22, %v1004_v20 }
 0x15d   : > { %6358 = vmatpush1.bf16.msra.mxu0 %v6357_v30  ;;  %v1010_v30 = vld [vmem:[%s8675_s3 + $0x598] sm:$0xff] }
 0x15e   : > { %6360 = vmatprep.subr.bf16.mxu0 %v6359_v31  ;;  %v6397_v31 = vpack.c.bf16 %v1005_v28, %v1003_v27  ;;  %v6399_v32 = vpack.c.bf16 %v1010_v30, %v1008_v29  ;;  %v5539_v27 = vld [vmem:[%s8676_s4 + $0x40] sm:$0xff]  ;;  %v5540_v30 = vld [vmem:[%s8676_s4 + $0x48] sm:$0xff] }
 0x161   : > { %6362 = vmatpush1.bf16.msra.mxu0 %v6361_v36  ;;  %v1014_v36 = vld [vmem:[%s8675_s3 + $0x5b8] sm:$0xff] }
 0x162   : > { %6364 = vmatprep.subr.bf16.mxu0 %v6363_v37  ;;  %v6401_v37 = vpack.c.bf16 %v1009_v34, %v1007_v33  ;;  %v6403_v38 = vpack.c.bf16 %v1014_v36, %v1012_v35  ;;  %v5546_v35 = vld [vmem:[%s8676_s4 + $0x58] sm:$0xff] }
 0x165   : > { %6366 = vmatpush1.bf16.msra.mxu0 %v6365_v42  ;;  %v1018_v42 = vld [vmem:[%s8675_s3 + $0x5d8] sm:$0xff] }
 0x166   : > { %6368 = vmatprep.subr.bf16.mxu0 %v6367_v43  ;;  %v750_v43 = vadd.f32 %v7463_v21, %v7358_v24  ;;  %v6407_v45 = vpack.c.bf16 %v1018_v42, %v1016_v41  ;;  %v1022_v21 = vld [vmem:[%s8675_s3 + $0x5f8] sm:$0xff]  ;;  %v5557_v42 = vld [vmem:[%s8676_s4 + $0x70] sm:$0xff] }
 0x168   : > { %6805 = vtanh.f32 %v750_v43 }
 0x169   : > { %6370 = vmatpush1.bf16.msra.mxu0 %v6369_v49  ;;  %v1020_v49 = vld [vmem:[%s8675_s3 + $0x5e8] sm:$0xff] }
 0x16a   : > { %6372 = vmatprep.subr.bf16.mxu0 %v6371_v51  ;;  %v6409_v51 = vpack.c.bf16 %v1017_v48, %v1015_v46  ;;  %v6411_v52 = vpack.c.bf16 %v1022_v21, %v1020_v49  ;;  %v5563_v48 = vld [vmem:[%s8676_s4 + $0x80] sm:$0xff] }
 0x16d   : > { %6374 = vmatpush1.bf16.msra.mxu0 %v6373_v56  ;;  %v1026_v56 = vld [vmem:[%s8675_s3 + $0x618] sm:$0xff] }
 0x16e   : > { %6376 = vmatprep.subr.bf16.mxu0 %v6375_v58  ;;  %v821_v58 = vadd.f32 %v7360_v26, %v7358_v24  ;;  %v6415_v60 = vpack.c.bf16 %v1026_v56, %v1024_v55  ;;  %v5569_v56 = vld [vmem:[%s8676_s4 + $0x90] sm:$0xff] }
 0x170   : > { %6807 = vtanh.f32 %v821_v58  ;;  %v6420_v58 = vpack.c.bf16 %v3825_v54, %v3824_v53 }
 0x171   : > { %6378 = vmatpush1.bf16.msra.mxu0 %v6377_v47  ;;  %v6417_v47 = vpack.c.bf16 %v1025_v62, %v1023_v61 }
 0x172   : > { %6380 = vmatprep.subr.bf16.mxu0 %v6379_v63  ;;  %v6806_v63 = vpop.eup %6805 }
 0x175   : > { %6382 = vmatpush1.bf16.msra.mxu0 %v6381_v57  ;;  %v5517_v57 = vld [vmem:[%s8676_s4 + $0x10] sm:$0xff] }
 0x176   : > { %6384 = vmatprep.subr.bf16.mxu0 %v6383_v6 }
 0x179   : > { %6386 = vmatpush1.bf16.msra.mxu0 %v6385_v10 }
 0x17a   : > { %6388 = vmatprep.subr.bf16.mxu0 %v6387_v11  ;;  %v6808_v24 = vpop.eup %6807 }
 0x17d   : > { %6390 = vmatpush1.bf16.msra.mxu0 %v6389_v16 }
 0x17e   : > { %6392 = vmatprep.subr.bf16.mxu0 %v6391_v17  ;;  %v5528_v17 = vld [vmem:[%s8676_s4 + $0x28] sm:$0xff] }
 0x181   : > { %6394 = vmatpush1.bf16.msra.mxu0 %v6393_v23  ;;  %v5534_v23 = vld [vmem:[%s8676_s4 + $0x38] sm:$0xff] }
 0x182   : > { %6396 = vmatprep.subr.bf16.mxu0 %v6395_v25 }
 0x185   : > { %6398 = vmatpush1.bf16.msra.mxu0 %v6397_v31 }
 0x186   : > { %6400 = vmatprep.subr.bf16.mxu0 %v6399_v32  ;;  %v5545_v32 = vld [vmem:[%s8676_s4 + $0x50] sm:$0xff] }
 0x189   : > { %6402 = vmatpush1.bf16.msra.mxu0 %v6401_v37  ;;  %v5551_v37 = vld [vmem:[%s8676_s4 + $0x60] sm:$0xff] }
 0x18a   : > { %6404 = vmatprep.subr.bf16.mxu0 %v6403_v38 }
 0x18d   : > { %6406 = vmatpush1.bf16.msra.mxu0 %v6405_v44 }
 0x18e   : > { %6408 = vmatprep.subr.bf16.mxu0 %v6407_v45  ;;  %v5558_v45 = vld [vmem:[%s8676_s4 + $0x78] sm:$0xff] }
 0x191   : > { %6410 = vmatpush1.bf16.msra.mxu0 %v6409_v51  ;;  %v5564_v51 = vld [vmem:[%s8676_s4 + $0x88] sm:$0xff] }
 0x192   : > { %6412 = vmatprep.subr.bf16.mxu0 %v6411_v52  ;;  %v3804_v52 = vld [vmem:[%s8677_s5] sm:$0xff] }
 0x195   : > { %6414 = vmatpush1.bf16.msra.mxu0 %v6413_v59  ;;  %v3826_v59 = vld [vmem:[%s8678_s6 + $0x10] sm:$0xff] }
 0x196   : > { %6416 = vmatprep.subr.bf16.mxu0 %v6415_v60  ;;  %v3827_v60 = vld [vmem:[%s8678_s6 + $0x18] sm:$0xff] }
 0x197   : > { %v6423_v61 = vpack.c.bf16 %v3827_v60, %v3826_v59 }
 0x198   : > { %1238 = vmatmul.mubr.f32.vlgmr.msra.gmra.mrb[6].mxu0 %v6806_v63  ;;  %v3829_v63 = vld [vmem:[%s8678_s6 + $0x28] sm:$0xff] }
 0x199   : > { %6418 = vmatpush1.bf16.msra.mxu0 %v6417_v47  ;;  %1308 = vmatprep.mubr.f32.mxu0 %v6890_v1  ;;  %v3828_v47 = vld [vmem:[%s8678_s6 + $0x20] sm:$0xff] }
 0x19a   : > { %6419 = vmatprep.subr.bf16.mxu0 %v6889_v0 }
 0x1a0   : > { %5516 = vmatmul.mubr.msk.f32.vlgmr.msra.gmra.mrb[6].mxu0 %vm1027_vm5, %v6808_v24  ;;  %vm2511_vm5 = vcmask 801792  }
 0x1a1   : > { %6421 = vmatpush1.bf16.msra.mxu0 %v6420_v58  ;;  %v5629_v58 = vld [vmem:[%s8676_s4 + $0x130] sm:$0xff] }
 0x1a2   : > { %6422 = vmatprep.subr.bf16.mxu0 %v6889_v0 }
 0x1a5   : > { %6424 = vmatpush1.bf16.msra.mxu0 %v6423_v61  ;;  %v5630_v61 = vld [vmem:[%s8676_s4 + $0x138] sm:$0xff] }
 0x1a6   : > { %6425 = vmatprep.subr.bf16.mxu0 %v6889_v0 }
 0x273   : > { %v7768_v26 = vpop.f32.mrb[6].mxu0 }
 0x274   : > { %1322 = vrot.lane.b32.xlu0 %v7768_v26, %s6894_s20  ;;  %v7771_v2 = vpop.f32.mrb[7].mxu0 }
 0x275   : > { %1324 = vrot.lane.b32.xlu1 %v7771_v2, %s6894_s20  ;;  %s6904_s20 = smov 99  }
 0x278   : > { %1509 = vrot.lane.b32.xlu0 %v7771_v2, %s6895_s15 }
 0x279   : > { %1507 = vrot.lane.b32.xlu1 %v7768_v26, %s6895_s15  ;;  %s6905_s15 = smov 98  }
 0x27c   : > { %1609 = vrot.lane.b32.xlu0 %v7771_v2, %s6896_s21 }
 0x27d   : > { %1607 = vrot.lane.b32.xlu1 %v7768_v26, %s6896_s21  ;;  %s6906_s21 = smov 97  }
 0x280   : > { %1709 = vrot.lane.b32.xlu0 %v7771_v2, %s6897_s22 }
 0x281   : > { %1707 = vrot.lane.b32.xlu1 %v7768_v26, %s6897_s22  ;;  %s6907_s22 = smov 96  }
 0x284   : > { %1809 = vrot.lane.b32.xlu0 %v7771_v2, %s6898_s23 }
 0x285   : > { %1807 = vrot.lane.b32.xlu1 %v7768_v26, %s6898_s23  ;;  %s6908_s23 = smov 86  }
 0x288   : > { %1909 = vrot.lane.b32.xlu0 %v7771_v2, %s6899_s24 }
 0x289   : > { %1907 = vrot.lane.b32.xlu1 %v7768_v26, %s6899_s24  ;;  %s6909_s24 = smov 85  }
 0x28c   : > { %2009 = vrot.lane.b32.xlu0 %v7771_v2, %s6900_s0 }
 0x28d   : > { %2007 = vrot.lane.b32.xlu1 %v7768_v26, %s6900_s0  ;;  %s6910_s0 = smov 84  }
 0x290   : > { %2109 = vrot.lane.b32.xlu0 %v7771_v2, %s6901_s1 }
 0x291   : > { %2107 = vrot.lane.b32.xlu1 %v7768_v26, %s6901_s1  ;;  %s6911_s1 = smov 83  }
 0x294   : > { %2209 = vrot.lane.b32.xlu0 %v7771_v2, %s6902_s30 }
 0x295   : > { %2207 = vrot.lane.b32.xlu1 %v7768_v26, %s6902_s30  ;;  %s6912_s30 = smov 82  }
 0x298   : > { %2309 = vrot.lane.b32.xlu0 %v7771_v2, %s6903_s16 }
 0x299   : > { %2307 = vrot.lane.b32.xlu1 %v7768_v26, %s6903_s16  ;;  %s6913_s16 = smov 72  }
 0x29c   : > { %2409 = vrot.lane.b32.xlu0 %v7771_v2, %s6904_s20 }
 0x29d   : > { %2407 = vrot.lane.b32.xlu1 %v7768_v26, %s6904_s20  ;;  %s6914_s20 = smov 71  }
 0x2a0   : > { %2509 = vrot.lane.b32.xlu0 %v7771_v2, %s6905_s15 }
 0x2a1   : > { %2507 = vrot.lane.b32.xlu1 %v7768_v26, %s6905_s15  ;;  %s6915_s15 = smov 70  }
 0x2a4   : > { %2609 = vrot.lane.b32.xlu0 %v7771_v2, %s6906_s21 }
 0x2a5   : > { %2607 = vrot.lane.b32.xlu1 %v7768_v26, %s6906_s21  ;;  %s6916_s21 = smov 69  }
 0x2a8   : > { %2709 = vrot.lane.b32.xlu0 %v7771_v2, %s6907_s22 }
 0x2a9   : > { %2707 = vrot.lane.b32.xlu1 %v7768_v26, %s6907_s22  ;;  %s6917_s22 = smov 68  }
 0x2ac   : > { %2809 = vrot.lane.b32.xlu0 %v7771_v2, %s6908_s23 }
 0x2ad   : > { %2807 = vrot.lane.b32.xlu1 %v7768_v26, %s6908_s23 }
 0x2b0   : > { %2909 = vrot.lane.b32.xlu0 %v7771_v2, %s6909_s24 }
 0x2b1   : > { %2907 = vrot.lane.b32.xlu1 %v7768_v26, %s6909_s24 }
 0x2b4   : > { %3009 = vrot.lane.b32.xlu0 %v7771_v2, %s6910_s0 }
 0x2b5   : > { %3007 = vrot.lane.b32.xlu1 %v7768_v26, %s6910_s0 }
 0x2b8   : > { %3109 = vrot.lane.b32.xlu0 %v7771_v2, %s6911_s1 }
 0x2b9   : > { %3107 = vrot.lane.b32.xlu1 %v7768_v26, %s6911_s1 }
 0x2bc   : > { %3209 = vrot.lane.b32.xlu0 %v7771_v2, %s6912_s30 }
 0x2bd   : > { %3207 = vrot.lane.b32.xlu1 %v7768_v26, %s6912_s30 }
 0x2c0   : > { %3309 = vrot.lane.b32.xlu0 %v7771_v2, %s6913_s16 }
 0x2c1   : > { %3307 = vrot.lane.b32.xlu1 %v7768_v26, %s6913_s16 }
 0x2c4   : > { %3409 = vrot.lane.b32.xlu0 %v7771_v2, %s6914_s20 }
 0x2c5   : > { %3407 = vrot.lane.b32.xlu1 %v7768_v26, %s6914_s20 }
 0x2c8   : > { %3509 = vrot.lane.b32.xlu0 %v7771_v2, %s6915_s15 }
 0x2c9   : > { %3507 = vrot.lane.b32.xlu1 %v7768_v26, %s6915_s15 }
 0x2cc   : > { %3609 = vrot.lane.b32.xlu0 %v7771_v2, %s6916_s21 }
 0x2cd   : > { %3607 = vrot.lane.b32.xlu1 %v7768_v26, %s6916_s21  ;;  %s431_s21 = sand.u32 1, %s6879_s26  }
 0x2ce   : > { %s432_s23 = scalar_lea.vmem [#allocation2], %s431_s21  ;;  %s5433_s30 = scalar_lea.sflag [#allocation3], %s431_s21 }
 0x2cf   : > { %s5445_s24 = sshll.u32 %s432_s23, 4  ;;  %s8631_s24 = int_to_ptr.vmem [resolvable:$true] %s5445_s24 }
 0x2d0   : > { %3709 = vrot.lane.b32.xlu0 %v7771_v2, %s6917_s22  ;;  %s6825_s16 = scalar_lea.vmem %s8631_s24, 16 }
 0x2d1   : > { %3707 = vrot.lane.b32.xlu1 %v7768_v26, %s6917_s22  ;;  %s5762_s22 = sshll.u32 %s7010_s29, 4  ;;  %p6826_p11 = scmp.ne.s32.totalorder %s8631_s24, %s6825_s16 }
 0x2d2   : > { %s8629_s1 = scalar_lea.hbm %s8685_s13, %s5762_s22  ;;  %s6918_s29 = smov [#allocation2]  }
 0x2d3   : > { %p6827_p12 = pnand %p6826_p11, %p7027_p5  ;;  %s6829_s20 = sshll.u32 %s6918_s29, 4  ;;  %s6830_s20 = int_to_ptr.vmem [resolvable:$false] %s6829_s20 }
 0x2d4   : > { %3813 = vperm.xlu0 %6793, %v3805_v3   ;;  %v3830_v3 = vld [vmem:[%s8678_s6 + $0x30] sm:$0xff]  ;;  %s6831_s15 = scalar_lea.vmem %s6830_s20, 32  ;;  %p6832_p0 = scmp.lt.s32.totalorder %s8631_s24, %s6830_s20 }
 0x2d5   : > { %3808 = vperm.xlu1 %6794, %v3804_v52   ;;  %v5623_v52 = vld [vmem:[%s8676_s4 + $0x120] sm:$0xff]  ;;  %p6828_p13 = pneg %p6827_p12  ;;  %p6833_p1 = scmp.lt.s32.totalorder %s6831_s15, %s6825_s16 }
 0x2d7   : > { %p6834_p2 = por %p6833_p1, %p6832_p0 }
 0x2d9   : > { %p6835_p3 = pnand %p6834_p2, %p6828_p13 }
 0x2e6   : > { %v1323_v4 = vpop.permute.xlu0 %1322 }
 0x2e7   : > { %v1325_v5 = vpop.permute.xlu1 %1324 }
 0x2e8   : > { %v1327_v6 = vsel %vm1326_vm6, %v1323_v4, %v1325_v5  ;;  %5519 = vmatprep.subr.msk.mxu1 %vm1335_vm7, %v1325_v5  ;;  %v3831_v4 = vld [vmem:[%s8678_s6 + $0x38] sm:$0xff]  ;;  %vm2611_vm6 = vcmask 793600  }
 0x2e9   : > { %5520 = vmatpush1.msk.msra.mxu1 %vm1335_vm7, %v1327_v6  ;;  %v6429_v6 = vpack.c.bf16 %v3831_v4, %v3830_v3  ;;  %v5641_v3 = vld [vmem:[%s8676_s4 + $0x150] sm:$0xff] }
 0x2ea   : > { %v1510_v50 = vpop.permute.xlu0 %1509  ;;  %5521 = vmatmul.mubr.msk.f32.vlgmr.msra.gmra.mrb[2].mxu1 %vm1328_vm8, %v5517_v57  ;;  %5523 = vmatprep.subr.msk.mxu1 %vm1335_vm7, %v7771_v2  ;;  %v6426_v2 = vpack.c.bf16 %v3829_v63, %v3828_v47  ;;  %v5575_v57 = vld [vmem:[%s8676_s4 + $0xa0] sm:$0xff] }
 0x2eb   : > { %5524 = vmatpush1.msk.msra.mxu1 %vm1335_vm7, %v7768_v26  ;;  %1410 = vmatprep.mubr.f32.mxu1 %v6890_v1  ;;  %v1508_v8 = vpop.permute.xlu1 %1507  ;;  %v5570_v26 = vld [vmem:[%s8676_s4 + $0x98] sm:$0xff]  ;;  %v5635_v47 = vld [vmem:[%s8676_s4 + $0x140] sm:$0xff] }
 0x2ec   : > { %5529 = vmatprep.subr.msk.mxu1 %vm1335_vm7, %v1510_v50  ;;  %v1512_v10 = vsel %vm1511_vm9, %v1508_v8, %v1510_v50  ;;  %6427 = vmatpush1.bf16.msra.mxu0 %v6426_v2  ;;  %v3833_v8 = vld [vmem:[%s8678_s6 + $0x48] sm:$0xff]  ;;  %vm2711_vm9 = vcmask 785408  }
 0x2ed   : > { %6428 = vmatprep.subr.bf16.mxu0 %v6889_v0 }
 0x2ee   : > { %5522 = vmatmul.mubr.msk.f32.gmra.mrb[4].mxu1 %vm1328_vm8, %v5518_v7  ;;  %v1610_v11 = vpop.permute.xlu0 %1609  ;;  %v3832_v7 = vld [vmem:[%s8678_s6 + $0x40] sm:$0xff] }
 0x2ef   : > { %1491 = vmatprep.mubr.f32.mxu1 %v6890_v1  ;;  %v1608_v13 = vpop.permute.xlu1 %1607 }
 0x2f0   : > { %v1612_v15 = vsel %vm1611_vm10, %v1608_v13, %v1610_v11  ;;  %6430 = vmatpush1.bf16.msra.mxu0 %v6429_v6  ;;  %v5581_v13 = vld [vmem:[%s8676_s4 + $0xb0] sm:$0xff]  ;;  %vm2811_vm10 = vcmask 703488  }
 0x2f1   : > { %6431 = vmatprep.subr.bf16.mxu0 %v6889_v0 }
 0x2f2   : > { %5525 = vmatmul.mubr.msk.f32.vlgmr.msra.gmra.mrb[2].mxu1 %vm1328_vm8, %v1315_v9  ;;  %v1710_v16 = vpop.permute.xlu0 %1709 }
 0x2f3   : > { %5530 = vmatpush1.msk.msra.mxu1 %vm1335_vm7, %v1512_v10  ;;  %1497 = vmatprep.mubr.f32.mxu1 %v6890_v1  ;;  %v1708_v18 = vpop.permute.xlu1 %1707  ;;  %v5576_v10 = vld [vmem:[%s8676_s4 + $0xa8] sm:$0xff] }
 0x2f4   : > { %5535 = vmatprep.subr.msk.mxu1 %vm1335_vm7, %v1610_v11  ;;  %v1712_v20 = vsel %vm1711_vm11, %v1708_v18, %v1710_v16  ;;  %v6432_v11 = vpack.c.bf16 %v3833_v8, %v3832_v7  ;;  %v5587_v18 = vld [vmem:[%s8676_s4 + $0xc0] sm:$0xff]  ;;  %vm2911_vm11 = vcmask 695296  }
 0x2f6   : > { %5526 = vmatmul.mubr.msk.f32.gmra.mrb[4].mxu1 %vm1328_vm8, %v1316_v12  ;;  %v1810_v22 = vpop.permute.xlu0 %1809  ;;  %6433 = vmatpush1.bf16.msra.mxu0 %v6432_v11  ;;  %v5653_v11 = vld [vmem:[%s8676_s4 + $0x170] sm:$0xff] }
 0x2f7   : > { %1587 = vmatprep.mubr.f32.mxu1 %v6890_v1  ;;  %v1808_v25 = vpop.permute.xlu1 %1807  ;;  %6434 = vmatprep.subr.bf16.mxu0 %v6889_v0 }
 0x2f8   : > { %v1812_v28 = vsel %vm1811_vm12, %v1808_v25, %v1810_v22  ;;  %v5593_v25 = vld [vmem:[%s8676_s4 + $0xd0] sm:$0xff]  ;;  %vm3011_vm12 = vcmask 687104  }
 0x2fa   : > { %5531 = vmatmul.mubr.msk.f32.vlgmr.msra.gmra.mrb[2].mxu1 %vm1328_vm8, %v5527_v14  ;;  %v1910_v29 = vpop.permute.xlu0 %1909 }
 0x2fb   : > { %5536 = vmatpush1.msk.msra.mxu1 %vm1335_vm7, %v1612_v15  ;;  %1593 = vmatprep.mubr.f32.mxu1 %v6890_v1  ;;  %v1908_v31 = vpop.permute.xlu1 %1907 }
 0x2fc   : > { %5541 = vmatprep.subr.msk.mxu1 %vm1335_vm7, %v1710_v16  ;;  %v1912_v33 = vsel %vm1911_vm13, %v1908_v31, %v1910_v29  ;;  %v5582_v16 = vld [vmem:[%s8676_s4 + $0xb8] sm:$0xff]  ;;  %v5599_v31 = vld [vmem:[%s8676_s4 + $0xe0] sm:$0xff]  ;;  %vm3111_vm13 = vcmask 678912  }
 0x2fe   : > { %5532 = vmatmul.mubr.msk.f32.gmra.mrb[4].mxu1 %vm1328_vm8, %v5528_v17  ;;  %v2010_v34 = vpop.permute.xlu0 %2009 }
 0x2ff   : > { %1687 = vmatprep.mubr.f32.mxu1 %v6890_v1  ;;  %v2008_v36 = vpop.permute.xlu1 %2007 }
 0x300   : > { %v2012_v38 = vsel %vm2011_vm14, %v2008_v36, %v2010_v34  ;;  %v5605_v36 = vld [vmem:[%s8676_s4 + $0xf0] sm:$0xff]  ;;  %vm3211_vm14 = vcmask 670720  }
 0x302   : > { %5537 = vmatmul.mubr.msk.f32.vlgmr.msra.gmra.mrb[2].mxu1 %vm1328_vm8, %v5533_v19  ;;  %v2110_v39 = vpop.permute.xlu0 %2109 }
 0x303   : > { %5542 = vmatpush1.msk.msra.mxu1 %vm1335_vm7, %v1712_v20  ;;  %1693 = vmatprep.mubr.f32.mxu1 %v6890_v1  ;;  %v2108_v41 = vpop.permute.xlu1 %2107 }
 0x304   : > { %5547 = vmatprep.subr.msk.mxu1 %vm1335_vm7, %v1810_v22  ;;  %v2112_v43 = vsel %vm2111_vm15, %v2108_v41, %v2110_v39  ;;  %v5588_v22 = vld [vmem:[%s8676_s4 + $0xc8] sm:$0xff]  ;;  %v5611_v41 = vld [vmem:[%s8676_s4 + $0x100] sm:$0xff]  ;;  %vm3311_vm15 = vcmask 588800  }
 0x306   : > { %5538 = vmatmul.mubr.msk.f32.gmra.mrb[4].mxu1 %vm1328_vm8, %v5534_v23  ;;  %v2210_v44 = vpop.permute.xlu0 %2209 }
 0x307   : > { %1787 = vmatprep.mubr.f32.mxu1 %v6890_v1  ;;  %v2208_v46 = vpop.permute.xlu1 %2207 }
 0x308   : > { %v2212_v49 = vsel %vm2211_vm1, %v2208_v46, %v2210_v44  ;;  %v5617_v46 = vld [vmem:[%s8676_s4 + $0x110] sm:$0xff]  ;;  %vm3411_vm1 = vcmask 580608  }
 0x30a   : > { %5543 = vmatmul.mubr.msk.f32.vlgmr.msra.gmra.mrb[2].mxu1 %vm1328_vm8, %v5539_v27  ;;  %v2310_v21 = vpop.permute.xlu0 %2309 }
 0x30b   : > { %5548 = vmatpush1.msk.msra.mxu1 %vm1335_vm7, %v1812_v28  ;;  %1793 = vmatprep.mubr.f32.mxu1 %v6890_v1  ;;  %v2308_v55 = vpop.permute.xlu1 %2307 }
 0x30c   : > { %5553 = vmatprep.subr.msk.mxu1 %vm1335_vm7, %v1910_v29  ;;  %v2312_v62 = vsel %vm2311_vm3, %v2308_v55, %v2310_v21  ;;  %v5594_v29 = vld [vmem:[%s8676_s4 + $0xd8] sm:$0xff]  ;;  %v5624_v55 = vld [vmem:[%s8676_s4 + $0x128] sm:$0xff]  ;;  %vm3511_vm3 = vcmask 572416  }
 0x30e   : > { %5544 = vmatmul.mubr.msk.f32.gmra.mrb[4].mxu1 %vm1328_vm8, %v5540_v30  ;;  %v2410_v24 = vpop.permute.xlu0 %2409 }
 0x30f   : > { %1887 = vmatprep.mubr.f32.mxu1 %v6890_v1  ;;  %v2408_v5 = vpop.permute.xlu1 %2407 }
 0x310   : > { %v2412_v50 = vsel %vm2411_vm4, %v2408_v5, %v2410_v24  ;;  %vm3611_vm4 = vcmask 564224  }
 0x312   : > { %5549 = vmatmul.mubr.msk.f32.vlgmr.msra.gmra.mrb[2].mxu1 %vm1328_vm8, %v5545_v32  ;;  %v2510_v9 = vpop.permute.xlu0 %2509 }
 0x313   : > { %5554 = vmatpush1.msk.msra.mxu1 %vm1335_vm7, %v1912_v33  ;;  %1893 = vmatprep.mubr.f32.mxu1 %v6890_v1  ;;  %v2508_v12 = vpop.permute.xlu1 %2507 }
 0x314   : > { %5559 = vmatprep.subr.msk.mxu1 %vm1335_vm7, %v2010_v34  ;;  %v2512_v14 = vsel %vm2511_vm5, %v2508_v12, %v2510_v9  ;;  %v5600_v34 = vld [vmem:[%s8676_s4 + $0xe8] sm:$0xff]  ;;  %vm3711_vm5 = vcmask 556032  }
 0x316   : > { %5550 = vmatmul.mubr.msk.f32.gmra.mrb[4].mxu1 %vm1328_vm8, %v5546_v35  ;;  %v2610_v15 = vpop.permute.xlu0 %2609 }
 0x317   : > { %1987 = vmatprep.mubr.f32.mxu1 %v6890_v1  ;;  %v2608_v17 = vpop.permute.xlu1 %2607 }
 0x318   : > { %v2612_v19 = vsel %vm2611_vm6, %v2608_v17, %v2610_v15  ;;  %v3835_v17 = vld [vmem:[%s8678_s6 + $0x58] sm:$0xff]  ;;  %vm3928_vm6 = vcmask 203776  }
 0x31a   : > { %5555 = vmatmul.mubr.msk.f32.vlgmr.msra.gmra.mrb[2].mxu1 %vm1328_vm8, %v5551_v37  ;;  %v2710_v20 = vpop.permute.xlu0 %2709 }
 0x31b   : > { %5560 = vmatpush1.msk.msra.mxu1 %vm1335_vm7, %v2012_v38  ;;  %1993 = vmatprep.mubr.f32.mxu1 %v6890_v1  ;;  %v2708_v23 = vpop.permute.xlu1 %2707 }
 0x31c   : > { %5565 = vmatprep.subr.msk.mxu1 %vm1335_vm7, %v2110_v39  ;;  %v2712_v27 = vsel %vm2711_vm9, %v2708_v23, %v2710_v20  ;;  %v5606_v39 = vld [vmem:[%s8676_s4 + $0xf8] sm:$0xff]  ;;  %v3838_v23 = vld [vmem:[%s8678_s6 + $0x70] sm:$0xff]  ;;  %vm5254_vm9 = vcmask 982016  }
 0x31e   : > { %5556 = vmatmul.mubr.msk.f32.gmra.mrb[4].mxu1 %vm1328_vm8, %v5552_v40  ;;  %v2810_v28 = vpop.permute.xlu0 %2809 }
 0x31f   : > { %2087 = vmatprep.mubr.f32.mxu1 %v6890_v1  ;;  %v2808_v30 = vpop.permute.xlu1 %2807 }
 0x320   : > { %v2812_v32 = vsel %vm2811_vm10, %v2808_v30, %v2810_v28  ;;  %v3925_v30 = vld [vmem:[%s8679_s7 + $0x8] sm:$0xff]  ;;  %vm5418_vm10 = vcmask 73728  }
 0x322   : > { %5561 = vmatmul.mubr.msk.f32.vlgmr.msra.gmra.mrb[2].mxu1 %vm1328_vm8, %v5557_v42  ;;  %v2910_v33 = vpop.permute.xlu0 %2909 }
 0x323   : > { %5566 = vmatpush1.msk.msra.mxu1 %vm1335_vm7, %v2112_v43  ;;  %2093 = vmatprep.mubr.f32.mxu1 %v6890_v1  ;;  %v2908_v35 = vpop.permute.xlu1 %2907 }
 0x324   : > { %5571 = vmatprep.subr.msk.mxu1 %vm1335_vm7, %v2210_v44  ;;  %v2912_v37 = vsel %vm2911_vm11, %v2908_v35, %v2910_v33  ;;  %v5612_v44 = vld [vmem:[%s8676_s4 + $0x108] sm:$0xff]  ;;  %v5248_v35 = vld [vmem:[%s8681_s9 + $0x50] sm:$0xff] }
 0x326   : > { %5562 = vmatmul.mubr.msk.f32.gmra.mrb[4].mxu1 %vm1328_vm8, %v5558_v45  ;;  %v3010_v38 = vpop.permute.xlu0 %3009 }
 0x327   : > { %2187 = vmatprep.mubr.f32.mxu1 %v6890_v1  ;;  %v3008_v40 = vpop.permute.xlu1 %3007 }
 0x328   : > { %v3012_v42 = vsel %vm3011_vm12, %v3008_v40, %v3010_v38 }
 0x32a   : > { %5567 = vmatmul.mubr.msk.f32.vlgmr.msra.gmra.mrb[2].mxu1 %vm1328_vm8, %v5563_v48  ;;  %v3110_v43 = vpop.permute.xlu0 %3109 }
 0x32b   : > { %5572 = vmatpush1.msk.msra.mxu1 %vm1335_vm7, %v2212_v49  ;;  %2193 = vmatprep.mubr.f32.mxu1 %v6890_v1  ;;  %v3108_v45 = vpop.permute.xlu1 %3107 }
 0x32c   : > { %5577 = vmatprep.subr.msk.mxu1 %vm1335_vm7, %v2310_v21  ;;  %v3112_v48 = vsel %vm3111_vm13, %v3108_v45, %v3110_v43  ;;  %v5618_v21 = vld [vmem:[%s8676_s4 + $0x118] sm:$0xff] }
 0x32e   : > { %5568 = vmatmul.mubr.msk.f32.gmra.mrb[4].mxu1 %vm1328_vm8, %v5564_v51  ;;  %v3210_v49 = vpop.permute.xlu0 %3209 }
 0x32f   : > { %2287 = vmatprep.mubr.f32.mxu1 %v6890_v1  ;;  %v3208_v51 = vpop.permute.xlu1 %3207 }
 0x330   : > { %v3212_v53 = vsel %vm3211_vm14, %v3208_v51, %v3210_v49  ;;  %v5238_v51 = vld [vmem:[%s8681_s9] sm:$0xff] }
 0x332   : > { %5573 = vmatmul.mubr.msk.f32.vlgmr.msra.gmra.mrb[2].mxu1 %vm1328_vm8, %v5569_v56  ;;  %v3310_v54 = vpop.permute.xlu0 %3309 }
 0x333   : > { %5578 = vmatpush1.msk.msra.mxu1 %vm1335_vm7, %v2312_v62  ;;  %2293 = vmatprep.mubr.f32.mxu1 %v6890_v1  ;;  %v3308_v56 = vpop.permute.xlu1 %3307 }
 0x334   : > { %5583 = vmatprep.subr.msk.mxu1 %vm1335_vm7, %v2410_v24  ;;  %v3312_v59 = vsel %vm3311_vm15, %v3308_v56, %v3310_v54  ;;  %v5669_v56 = vld [vmem:[%s8679_s7 + $0x20] sm:$0xff] }
 0x336   : > { %5574 = vmatmul.mubr.msk.f32.gmra.mrb[4].mxu1 %vm1328_vm8, %v5570_v26  ;;  %v3410_v60 = vpop.permute.xlu0 %3409  ;;  %v5636_v26 = vld [vmem:[%s8676_s4 + $0x148] sm:$0xff] }
 0x337   : > { %2387 = vmatprep.mubr.f32.mxu1 %v6890_v1  ;;  %v3408_v62 = vpop.permute.xlu1 %3407 }
 0x338   : > { %v3412_v63 = vsel %vm3411_vm1, %v3408_v62, %v3410_v60 }
 0x33a   : > { %5579 = vmatmul.mubr.msk.f32.vlgmr.msra.gmra.mrb[2].mxu1 %vm1328_vm8, %v5575_v57  ;;  %v3510_v24 = vpop.permute.xlu0 %3509  ;;  %v5642_v57 = vld [vmem:[%s8676_s4 + $0x158] sm:$0xff] }
 0x33b   : > { %5584 = vmatpush1.msk.msra.mxu1 %vm1335_vm7, %v2412_v50  ;;  %2393 = vmatprep.mubr.f32.mxu1 %v6890_v1  ;;  %v3508_v2 = vpop.permute.xlu1 %3507  ;;  %v5647_v50 = vld [vmem:[%s8676_s4 + $0x160] sm:$0xff] }
 0x33c   : > { %5589 = vmatprep.subr.msk.mxu1 %vm1335_vm7, %v2510_v9  ;;  %v3512_v4 = vsel %vm3511_vm3, %v3508_v2, %v3510_v24  ;;  %v5648_v9 = vld [vmem:[%s8676_s4 + $0x168] sm:$0xff] }
 0x33e   : > { %5580 = vmatmul.mubr.msk.f32.gmra.mrb[4].mxu1 %vm1328_vm8, %v5576_v10  ;;  %v3610_v5 = vpop.permute.xlu0 %3609 }
 0x33f   : > { %2487 = vmatprep.mubr.f32.mxu1 %v6890_v1  ;;  %v3608_v6 = vpop.permute.xlu1 %3607 }
 0x340   : > { %v3612_v7 = vsel %vm3611_vm4, %v3608_v6, %v3610_v5  ;;  %v5676_v6 = vld [vmem:[%s8679_s7 + $0x48] sm:$0xff] }
 0x342   : > { %5585 = vmatmul.mubr.msk.f32.vlgmr.msra.gmra.mrb[2].mxu1 %vm1328_vm8, %v5581_v13  ;;  %v3710_v8 = vpop.permute.xlu0 %3709  ;;  %v5654_v13 = vld [vmem:[%s8676_s4 + $0x178] sm:$0xff] }
 0x343   : > { %5590 = vmatpush1.msk.msra.mxu1 %vm1335_vm7, %v2512_v14  ;;  %2493 = vmatprep.mubr.f32.mxu1 %v6890_v1  ;;  %v3708_v10 = vpop.permute.xlu1 %3707  ;;  %v5659_v14 = vld [vmem:[%s8676_s4 + $0x180] sm:$0xff] }
 0x344   : > { %5595 = vmatprep.subr.msk.mxu1 %vm1335_vm7, %v2610_v15  ;;  %v3712_v12 = vsel %vm3711_vm5, %v3708_v10, %v3710_v8  ;;  %v5660_v15 = vld [vmem:[%s8676_s4 + $0x188] sm:$0xff] }
 0x346   : > { %5586 = vmatmul.mubr.msk.f32.gmra.mrb[4].mxu1 %vm1328_vm8, %v5582_v16  ;;  %v3834_v16 = vld [vmem:[%s8678_s6 + $0x50] sm:$0xff] }
 0x347   : > { %2587 = vmatprep.mubr.f32.mxu1 %v6890_v1 }
 0x34a   : > { %5591 = vmatmul.mubr.msk.f32.vlgmr.msra.gmra.mrb[2].mxu1 %vm1328_vm8, %v5587_v18  ;;  %v6435_v18 = vpack.c.bf16 %v3835_v17, %v3834_v16 }
 0x34b   : > { %5596 = vmatpush1.msk.msra.mxu1 %vm1335_vm7, %v2612_v19  ;;  %2593 = vmatprep.mubr.f32.mxu1 %v6890_v1  ;;  %v3836_v19 = vld [vmem:[%s8678_s6 + $0x60] sm:$0xff] }
 0x34c   : > { %5601 = vmatprep.subr.msk.mxu1 %vm1335_vm7, %v2710_v20  ;;  %6436 = vmatpush1.bf16.msra.mxu0 %v6435_v18  ;;  %v3837_v20 = vld [vmem:[%s8678_s6 + $0x68] sm:$0xff]  ;;  %v5683_v18 = vld [vmem:[%s8679_s7 + $0x70] sm:$0xff] }
 0x34d   : > { %6437 = vmatprep.subr.bf16.mxu0 %v6889_v0 }
 0x34e   : > { %5592 = vmatmul.mubr.msk.f32.gmra.mrb[4].mxu1 %vm1328_vm8, %v5588_v22  ;;  %v6438_v22 = vpack.c.bf16 %v3837_v20, %v3836_v19  ;;  %v5684_v19 = vld [vmem:[%s8679_s7 + $0x78] sm:$0x1] }
 0x34f   : > { %2687 = vmatprep.mubr.f32.mxu1 %v6890_v1  ;;  %v6468_v20 = vpack.c.bf16 %v5684_v19, %v5683_v18 }
 0x350   : > { %6439 = vmatpush1.bf16.msra.mxu0 %v6438_v22  ;;  %v5687_v22 = vld [vmem:[%s8679_s7 + $0x80] sm:$0xff] }
 0x351   : > { %6440 = vmatprep.subr.bf16.mxu0 %v6889_v0 }
 0x352   : > { %5597 = vmatmul.mubr.msk.f32.vlgmr.msra.gmra.mrb[2].mxu1 %vm1328_vm8, %v5593_v25  ;;  %v3839_v25 = vld [vmem:[%s8678_s6 + $0x78] sm:$0xff] }
 0x353   : > { %5602 = vmatpush1.msk.msra.mxu1 %vm1335_vm7, %v2712_v27  ;;  %2693 = vmatprep.mubr.f32.mxu1 %v6890_v1  ;;  %v6441_v27 = vpack.c.bf16 %v3839_v25, %v3838_v23  ;;  %v5688_v23 = vld [vmem:[%s8679_s7 + $0x88] sm:$0xff] }
 0x354   : > { %5607 = vmatprep.subr.msk.mxu1 %vm1335_vm7, %v2810_v28  ;;  %v3840_v28 = vld [vmem:[%s8678_s6 + $0x80] sm:$0xff]  ;;  %v6472_v25 = vpack.c.bf16 %v5688_v23, %v5687_v22  ;;  %v5738_v22 = vld [vmem:[%s8679_s7 + $0x198] sm:$0x1] }
 0x355   : > { %6442 = vmatpush1.bf16.msra.mxu0 %v6441_v27 }
 0x356   : > { %5598 = vmatmul.mubr.msk.f32.gmra.mrb[4].mxu1 %vm1328_vm8, %v5594_v29  ;;  %3880 = vmatprep.subr.mxu0 %v6890_v1  ;;  %v3924_v29 = vld [vmem:[%s8679_s7] sm:$0xff] }
 0x357   : > { %2787 = vmatprep.mubr.f32.mxu1 %v6890_v1 }
 0x359   : > { %3881 = vmatpush1.msra.mxu0 %v3840_v28  ;;  %v5689_v28 = vld [vmem:[%s8679_s7 + $0x90] sm:$0xff] }
 0x35a   : > { %5603 = vmatmul.mubr.msk.f32.vlgmr.msra.gmra.mrb[2].mxu1 %vm1328_vm8, %v5599_v31  ;;  %6555 = vmatprep.subr.bf16.mxu0 %v6889_v0  ;;  %v3926_v31 = vld [vmem:[%s8679_s7 + $0x10] sm:$0xff] }
 0x35b   : > { %5608 = vmatpush1.msk.msra.mxu1 %vm1335_vm7, %v2812_v32  ;;  %2793 = vmatprep.mubr.f32.mxu1 %v6890_v1  ;;  %v6444_v32 = vpack.c.bf16 %v3925_v30, %v3924_v29  ;;  %v5690_v29 = vld [vmem:[%s8679_s7 + $0x98] sm:$0x1] }
 0x35c   : > { %5613 = vmatprep.subr.msk.mxu1 %vm1335_vm7, %v2910_v33  ;;  %v3927_v33 = vld [vmem:[%s8679_s7 + $0x18] sm:$0x1]  ;;  %v6475_v30 = vpack.c.bf16 %v5690_v29, %v5689_v28 }
 0x35e   : > { %5604 = vmatmul.mubr.msk.f32.gmra.mrb[4].mxu1 %vm1328_vm8, %v5600_v34  ;;  %v6447_v34 = vpack.c.bf16 %v3927_v33, %v3926_v31  ;;  %v5693_v31 = vld [vmem:[%s8679_s7 + $0xa0] sm:$0xff] }
 0x35f   : > { %2887 = vmatprep.mubr.f32.mxu1 %v6890_v1 }
 0x362   : > { %5609 = vmatmul.mubr.msk.f32.vlgmr.msra.gmra.mrb[2].mxu1 %vm1328_vm8, %v5605_v36  ;;  %v3809_v36 = vpop.permute.xlu1 %3808 }
 0x363   : > { %5614 = vmatpush1.msk.msra.mxu1 %vm1335_vm7, %v2912_v37  ;;  %2893 = vmatprep.mubr.f32.mxu1 %v6890_v1 }
 0x364   : > { %5619 = vmatprep.subr.msk.mxu1 %vm1335_vm7, %v3010_v38 }
 0x366   : > { %5610 = vmatmul.mubr.msk.f32.gmra.mrb[4].mxu1 %vm1328_vm8, %v5606_v39 }
 0x367   : > { %2987 = vmatprep.mubr.f32.mxu1 %v6890_v1 }
 0x36a   : > { %5615 = vmatmul.mubr.msk.f32.vlgmr.msra.gmra.mrb[2].mxu1 %vm1328_vm8, %v5611_v41  ;;  %v3814_v41 = vpop.permute.xlu0 %3813 }
 0x36b   : > { %5620 = vmatpush1.msk.msra.mxu1 %vm1335_vm7, %v3012_v42  ;;  %2993 = vmatprep.mubr.f32.mxu1 %v6890_v1 }
 0x36c   : > { %5625 = vmatprep.subr.msk.mxu1 %vm1335_vm7, %v3110_v43 }
 0x36e   : > { %5616 = vmatmul.mubr.msk.f32.gmra.mrb[4].mxu1 %vm1328_vm8, %v5612_v44 }
 0x36f   : > { %3087 = vmatprep.mubr.f32.mxu1 %v6890_v1 }
 0x372   : > { %5621 = vmatmul.mubr.msk.f32.vlgmr.msra.gmra.mrb[2].mxu1 %vm1328_vm8, %v5617_v46 }
 0x373   : > { %5626 = vmatpush1.msk.msra.mxu1 %vm1335_vm7, %v3112_v48  ;;  %3093 = vmatprep.mubr.f32.mxu1 %v6890_v1 }
 0x374   : > { %5631 = vmatprep.subr.msk.mxu1 %vm1335_vm7, %v3210_v49 }
 0x376   : > { %5622 = vmatmul.mubr.msk.f32.gmra.mrb[4].mxu1 %vm1328_vm8, %v5618_v21 }
 0x377   : > { %3187 = vmatprep.mubr.f32.mxu1 %v6890_v1 }
 0x37a   : > { %5627 = vmatmul.mubr.msk.f32.vlgmr.msra.gmra.mrb[2].mxu1 %vm1328_vm8, %v5623_v52  ;;  %v5239_v52 = vld [vmem:[%s8681_s9 + $0x8] sm:$0xff] }
 0x37b   : > { %5632 = vmatpush1.msk.msra.mxu1 %vm1335_vm7, %v3212_v53  ;;  %3193 = vmatprep.mubr.f32.mxu1 %v6890_v1  ;;  %v5240_v53 = vld [vmem:[%s8681_s9 + $0x10] sm:$0xff] }
 0x37c   : > { %5637 = vmatprep.subr.msk.mxu1 %vm1335_vm7, %v3310_v54  ;;  %v6556_v54 = vpack.c.bf16 %v5239_v52, %v5238_v51  ;;  %v5707_v51 = vld [vmem:[%s8679_s7 + $0xf0] sm:$0xff]  ;;  %v5708_v52 = vld [vmem:[%s8679_s7 + $0xf8] sm:$0x1] }
 0x37e   : > { %5628 = vmatmul.mubr.msk.f32.gmra.mrb[4].mxu1 %vm1328_vm8, %v5624_v55  ;;  %v5241_v55 = vld [vmem:[%s8681_s9 + $0x18] sm:$0xff] }
 0x37f   : > { %3287 = vmatprep.mubr.f32.mxu1 %v6890_v1 }
 0x382   : > { %5633 = vmatmul.mubr.msk.f32.vlgmr.msra.gmra.mrb[2].mxu1 %vm1328_vm8, %v5629_v58  ;;  %v5670_v58 = vld [vmem:[%s8679_s7 + $0x28] sm:$0xff] }
 0x383   : > { %5638 = vmatpush1.msk.msra.mxu1 %vm1335_vm7, %v3312_v59  ;;  %3293 = vmatprep.mubr.f32.mxu1 %v6890_v1  ;;  %v6559_v59 = vpack.c.bf16 %v5241_v55, %v5240_v53  ;;  %v6451_v62 = vpack.c.bf16 %v5670_v58, %v5669_v56  ;;  %v6496_v53 = vpack.c.bf16 %v5708_v52, %v5707_v51  ;;  %v5712_v55 = vld [vmem:[%s8679_s7 + $0x108] sm:$0xff] }
 0x384   : > { %5643 = vmatprep.subr.msk.mxu1 %vm1335_vm7, %v3410_v60  ;;  %v5242_v60 = vld [vmem:[%s8681_s9 + $0x20] sm:$0xff]  ;;  %v5247_v51 = vld [vmem:[%s8681_s9 + $0x48] sm:$0xff] }
 0x386   : > { %5634 = vmatmul.mubr.msk.f32.gmra.mrb[4].mxu1 %vm1328_vm8, %v5630_v61  ;;  %v5243_v61 = vld [vmem:[%s8681_s9 + $0x28] sm:$0xff] }
 0x387   : > { %3387 = vmatprep.mubr.f32.mxu1 %v6890_v1 }
 0x38a   : > { %5639 = vmatmul.mubr.msk.f32.vlgmr.msra.gmra.mrb[2].mxu1 %vm1328_vm8, %v5635_v47  ;;  %v5671_v47 = vld [vmem:[%s8679_s7 + $0x30] sm:$0xff] }
 0x38b   : > { %5644 = vmatpush1.msk.msra.mxu1 %vm1335_vm7, %v3412_v63  ;;  %3393 = vmatprep.mubr.f32.mxu1 %v6890_v1  ;;  %v5672_v63 = vld [vmem:[%s8679_s7 + $0x38] sm:$0x1] }
 0x38c   : > { %5649 = vmatprep.subr.msk.mxu1 %vm1335_vm7, %v3510_v24 }
 0x38e   : > { %5640 = vmatmul.mubr.msk.f32.gmra.mrb[4].mxu1 %vm1328_vm8, %v5636_v26  ;;  %v6562_v26 = vpack.c.bf16 %v5243_v61, %v5242_v60  ;;  %v5714_v60 = vld [vmem:[%s8679_s7 + $0x118] sm:$0x1] }
 0x38f   : > { %3487 = vmatprep.mubr.f32.mxu1 %v6890_v1 }
 0x392   : > { %5645 = vmatmul.mubr.msk.f32.vlgmr.msra.gmra.mrb[2].mxu1 %vm1328_vm8, %v5641_v3  ;;  %v5244_v3 = vld [vmem:[%s8681_s9 + $0x30] sm:$0xff] }
 0x393   : > { %5650 = vmatpush1.msk.msra.mxu1 %vm1335_vm7, %v3512_v4  ;;  %3493 = vmatprep.mubr.f32.mxu1 %v6890_v1  ;;  %v5245_v4 = vld [vmem:[%s8681_s9 + $0x38] sm:$0xff] }
 0x394   : > { %5655 = vmatprep.subr.msk.mxu1 %vm1335_vm7, %v3610_v5  ;;  %v6454_v5 = vpack.c.bf16 %v5672_v63, %v5671_v47  ;;  %v5718_v47 = vld [vmem:[%s8679_s7 + $0x128] sm:$0xff] }
 0x396   : > { %5646 = vmatmul.mubr.msk.f32.gmra.mrb[4].mxu1 %vm1328_vm8, %v5642_v57  ;;  %v5675_v57 = vld [vmem:[%s8679_s7 + $0x40] sm:$0xff] }
 0x397   : > { %3587 = vmatprep.mubr.f32.mxu1 %v6890_v1 }
 0x39a   : > { %5651 = vmatmul.mubr.msk.f32.vlgmr.msra.gmra.mrb[2].mxu1 %vm1328_vm8, %v5647_v50 }
 0x39b   : > { %5656 = vmatpush1.msk.msra.mxu1 %vm1335_vm7, %v3612_v7  ;;  %3593 = vmatprep.mubr.f32.mxu1 %v6890_v1  ;;  %v6565_v7 = vpack.c.bf16 %v5245_v4, %v5244_v3  ;;  %v5723_v3 = vld [vmem:[%s8679_s7 + $0x140] sm:$0xff]  ;;  %v5724_v4 = vld [vmem:[%s8679_s7 + $0x148] sm:$0xff] }
 0x39c   : > { %5661 = vmatprep.subr.msk.mxu1 %vm1335_vm7, %v3710_v8 }
 0x39e   : > { %5652 = vmatmul.mubr.msk.f32.gmra.mrb[4].mxu1 %vm1328_vm8, %v5648_v9  ;;  %v6458_v9 = vpack.c.bf16 %v5676_v6, %v5675_v57  ;;  %v5725_v6 = vld [vmem:[%s8679_s7 + $0x150] sm:$0xff] }
 0x39f   : > { %3687 = vmatprep.mubr.f32.mxu1 %v6890_v1 }
 0x3a2   : > { %5657 = vmatmul.mubr.msk.f32.vlgmr.msra.gmra.mrb[2].mxu1 %vm1328_vm8, %v5653_v11  ;;  %v5677_v11 = vld [vmem:[%s8679_s7 + $0x50] sm:$0xff] }
 0x3a3   : > { %5662 = vmatpush1.msk.msra.mxu1 %vm1335_vm7, %v3712_v12  ;;  %3693 = vmatprep.mubr.f32.mxu1 %v6890_v1  ;;  %vm3932_vm7 = vcmask 1040384   ;;  %v5678_v12 = vld [vmem:[%s8679_s7 + $0x58] sm:$0x1] }
 0x3a4   : > { %6443 = vmatprep.subr.bf16.mxu1 %v6889_v0 }
 0x3a6   : > { %5658 = vmatmul.mubr.msk.f32.gmra.mrb[4].mxu1 %vm1328_vm8, %v5654_v13  ;;  %v6461_v13 = vpack.c.bf16 %v5678_v12, %v5677_v11 }
 0x3a7   : > { %3787 = vmatprep.mubr.f32.mxu1 %v6890_v1 }
 0x3aa   : > { %5663 = vmatmul.mubr.msk.f32.vlgmr.msra.gmra.mrb[2].mxu1 %vm1328_vm8, %v5659_v14  ;;  %v5681_v14 = vld [vmem:[%s8679_s7 + $0x60] sm:$0xff] }
 0x3ab   : > { %3793 = vmatprep.mubr.f32.mxu1 %v6890_v1  ;;  %6445 = vmatpush3.bf16.msra.mxu1 %v6444_v32  ;;  %v5694_v32 = vld [vmem:[%s8679_s7 + $0xa8] sm:$0xff] }
 0x3ac   : > { %6446 = vmatprep.subr.bf16.mxu1 %v6889_v0  ;;  %v6479_v33 = vpack.c.bf16 %v5694_v32, %v5693_v31  ;;  %v5744_v31 = vld [vmem:[%s8679_s7 + $0x1b8] sm:$0x1] }
 0x3ae   : > { %5664 = vmatmul.mubr.msk.f32.gmra.mrb[4].mxu1 %vm1328_vm8, %v5660_v15  ;;  %vm8204_vm8 = vmpackc.low %vm3932_vm7, %vm6893_vm2  ;;  %vm3841_vm2 = vcmask 64512   ;;  %v5682_v15 = vld [vmem:[%s8679_s7 + $0x68] sm:$0xff] }
 0x3af   : > { %5915 = vmatprep.mubr.msk.f32.mxu1 %vm6891_vm0, %v6890_v1  ;;  %6449 = vmatpush3.bf16.msk.msra.mxu1 %vm8204_vm8, %v6447_v34  ;;  %v6465_v16 = vpack.c.bf16 %v5682_v15, %v5681_v14  ;;  %v5732_v14 = vld [vmem:[%s8679_s7 + $0x178] sm:$0x1] }
 0x3b0   : > { %6450 = vmatprep.subr.bf16.mxu1 %v6889_v0 }
 0x47d   : > { %v3789_v37 = vpop.f32.mrb[2].mxu1 }
 0x47e   : > { %v3816_v38 = vadd.f32 %v3809_v36, %v3789_v37  ;;  %v3791_v39 = vpop.f32.mrb[3].mxu1  ;;  %v5696_v37 = vld [vmem:[%s8679_s7 + $0xb8] sm:$0x1] }
 0x47f   : > { %v3817_v40 = vadd.f32 %v3809_v36, %v3791_v39  ;;  %v5695_v36 = vld [vmem:[%s8679_s7 + $0xb0] sm:$0xff]  ;;  %v5699_v39 = vld [vmem:[%s8679_s7 + $0xc0] sm:$0xff] }
 0x481   : > { %6809 = vtanh.f32 %v3817_v40  ;;  %v3795_v42 = vpop.f32.mrb[4].mxu1  ;;  %v5700_v40 = vld [vmem:[%s8679_s7 + $0xc8] sm:$0xff] }
 0x482   : > { %6811 = vtanh.f32 %v3816_v38  ;;  %v3818_v43 = vadd.f32 %v3814_v41, %v3795_v42  ;;  %v3797_v44 = vpop.f32.mrb[5].mxu1  ;;  %v6482_v38 = vpack.c.bf16 %v5696_v37, %v5695_v36 }
 0x483   : > { %v3819_v45 = vadd.f32 %v3814_v41, %v3797_v44  ;;  %v6486_v41 = vpack.c.bf16 %v5700_v40, %v5699_v39  ;;  %v5702_v44 = vld [vmem:[%s8679_s7 + $0xd8] sm:$0x1] }
 0x484   : > { %v5750_v39 = vld [vmem:[%s8679_s7 + $0x1d8] sm:$0x1] }
 0x485   : > { %6813 = vtanh.f32 %v3819_v45 }
 0x486   : > { %6815 = vtanh.f32 %v3818_v43  ;;  %v5701_v43 = vld [vmem:[%s8679_s7 + $0xd0] sm:$0xff] }
 0x487   : > { %v6489_v45 = vpack.c.bf16 %v5702_v44, %v5701_v43 }
 0x48b   : > { %v6810_v46 = vpop.eup %6809 }
 0x48c   : > { %v6812_v48 = vpop.eup %6811  ;;  %5665 = vmatprep.mubr.msk.f32.mxu0 %vm3841_vm2, %v6810_v46  ;;  %v5705_v46 = vld [vmem:[%s8679_s7 + $0xe0] sm:$0xff] }
 0x48d   : > { %3913 = vmatmul.mubr.f32.vlgmr.msra.gmra.mrb[8].mxu0 %v6812_v48  ;;  %v5706_v48 = vld [vmem:[%s8679_s7 + $0xe8] sm:$0xff] }
 0x48e   : > { %6557 = vmatpush3.bf16.msra.mxu0 %v6556_v54  ;;  %v5711_v54 = vld [vmem:[%s8679_s7 + $0x100] sm:$0xff] }
 0x48f   : > { %v6814_v49 = vpop.eup %6813  ;;  %6558 = vmatprep.subr.bf16.mxu0 %v6889_v0  ;;  %v6500_v56 = vpack.c.bf16 %v5712_v55, %v5711_v54  ;;  %v5251_v55 = vld [vmem:[%s8681_s9 + $0x68] sm:$0xff] }
 0x490   : > { %v6816_v21 = vpop.eup %6815  ;;  %5666 = vmatprep.mubr.msk.f32.mxu0 %vm3841_vm2, %v6814_v49  ;;  %v6493_v49 = vpack.c.bf16 %v5706_v48, %v5705_v46  ;;  %v5756_v46 = vld [vmem:[%s8679_s7 + $0x1f8] sm:$0x1] }
 0x491   : > { %3918 = vmatmul.mubr.f32.gmra.mrb[10].mxu0 %v6816_v21 }
 0x492   : > { %6113 = vmatprep.mubr.msk.f32.mxu0 %vm6891_vm0, %v6890_v1  ;;  %6560 = vmatpush3.bf16.msra.mxu0 %v6559_v59  ;;  %v5713_v59 = vld [vmem:[%s8679_s7 + $0x110] sm:$0xff] }
 0x493   : > { %6561 = vmatprep.subr.bf16.mxu0 %v6889_v0  ;;  %v6503_v61 = vpack.c.bf16 %v5714_v60, %v5713_v59  ;;  %v3923_v59 = vld [vmem:[%s8680_s8] sm:$0x1] }
 0x496   : > { %6563 = vmatpush3.bf16.msra.mxu0 %v6562_v26  ;;  %v5720_v26 = vld [vmem:[%s8679_s7 + $0x138] sm:$0x1] }
 0x497   : > { %6564 = vmatprep.subr.bf16.mxu0 %v6889_v0 }
 0x49a   : > { %6566 = vmatpush3.bf16.msra.mxu0 %v6565_v7  ;;  %v5726_v7 = vld [vmem:[%s8679_s7 + $0x158] sm:$0x1] }
 0x49b   : > { %6567 = vmatprep.subr.bf16.mxu0 %v6889_v0 }
 0x560   : > { %v8245_v24 = vpop.f32.mrb[8].mxu0 }
 0x561   : > { %v3916_v2 = vpop.f32.mrb[9].mxu0  ;;  %5916 = vmatmul.mubr.msk.f32.vlgmr.msra.gmra.mrb[6].mxu1 %vm3928_vm6, %v8245_v24  ;;  %v4012_v10 = vrot.slane %v8245_v24, 1  ;;  %v4094_v17 = vrot.slane %v8245_v24, 2  ;;  %v4176_v27 = vrot.slane %v8245_v24, 3  ;;  %v4258_v34 = vrot.slane %v8245_v24, 4 }
 0x562   : > { %6452 = vmatpush3.bf16.msra.mxu1 %v6451_v62  ;;  %5926 = vmatprep.mubr.msk.f32.mxu1 %vm6891_vm0, %v6890_v1  ;;  %v4340_v42 = vrot.slane %v8245_v24, 5  ;;  %v4422_v21 = vrot.slane %v8245_v24, 6  ;;  %v4504_v58 = vrot.slane %v8245_v24, 7  ;;  %v5717_v62 = vld [vmem:[%s8679_s7 + $0x120] sm:$0xff]  ;;  %v5719_v24 = vld [vmem:[%s8679_s7 + $0x130] sm:$0xff] }
 0x563   : > { %6453 = vmatprep.subr.bf16.mxu1 %v6889_v0  ;;  %v6507_v63 = vpack.c.bf16 %v5718_v47, %v5717_v62  ;;  %v6510_v2 = vpack.c.bf16 %v5720_v26, %v5719_v24  ;;  %v5329_v47 = vld [vmem:[%s8683_s11] sm:$0xff]  ;;  %v5331_v26 = vld [vmem:[%s8683_s11 + $0x10] sm:$0xff] }
 0x564   : > { %v8265_v50 = vpop.f32.mrb[10].mxu0 }
 0x565   : > { %v3921_v8 = vpop.f32.mrb[11].mxu0  ;;  %v4668_v57 = vrot.slane %v8265_v50, 1  ;;  %v4750_v12 = vrot.slane %v8265_v50, 2  ;;  %v4832_v19 = vrot.slane %v8265_v50, 3  ;;  %v4914_v29 = vrot.slane %v8265_v50, 4 }
 0x566   : > { %6456 = vmatpush3.bf16.msk.msra.mxu1 %vm8204_vm8, %v6454_v5  ;;  %v6514_v5 = vpack.c.bf16 %v5724_v4, %v5723_v3  ;;  %v6517_v8 = vpack.c.bf16 %v5726_v7, %v5725_v6  ;;  %v4996_v37 = vrot.slane %v8265_v50, 5  ;;  %v5078_v44 = vrot.slane %v8265_v50, 6  ;;  %v5335_v7 = vld [vmem:[%s8683_s11 + $0x30] sm:$0xff] }
 0x567   : > { %6457 = vmatprep.subr.bf16.mxu1 %v6889_v0 }
 0x569   : > { %5927 = vmatmul.mubr.msk.f32.vlgmr.msra.gmra.mrb[6].mxu1 %vm3928_vm6, %v4012_v10  ;;  %v5730_v10 = vld [vmem:[%s8679_s7 + $0x168] sm:$0xff] }
 0x56a   : > { %6459 = vmatpush3.bf16.msra.mxu1 %v6458_v9  ;;  %5937 = vmatprep.mubr.msk.f32.mxu1 %vm6891_vm0, %v6890_v1  ;;  %v5729_v9 = vld [vmem:[%s8679_s7 + $0x160] sm:$0xff] }
 0x56b   : > { %6460 = vmatprep.subr.bf16.mxu1 %v6889_v0  ;;  %v6521_v11 = vpack.c.bf16 %v5730_v10, %v5729_v9  ;;  %v5337_v9 = vld [vmem:[%s8683_s11 + $0x40] sm:$0xff] }
 0x56e   : > { %6463 = vmatpush3.bf16.msk.msra.mxu1 %vm8204_vm8, %v6461_v13  ;;  %v5731_v13 = vld [vmem:[%s8679_s7 + $0x170] sm:$0xff] }
 0x56f   : > { %6464 = vmatprep.subr.bf16.mxu1 %v6889_v0  ;;  %v6524_v15 = vpack.c.bf16 %v5732_v14, %v5731_v13  ;;  %v5339_v13 = vld [vmem:[%s8683_s11 + $0x50] sm:$0xf]  ;;  %v5253_v14 = vld [vmem:[%s8682_s10] sm:$0x1] }
 0x571   : > { %5938 = vmatmul.mubr.msk.f32.vlgmr.msra.gmra.mrb[6].mxu1 %vm3928_vm6, %v4094_v17  ;;  %v5736_v17 = vld [vmem:[%s8679_s7 + $0x188] sm:$0xff] }
 0x572   : > { %6466 = vmatpush3.bf16.msra.mxu1 %v6465_v16  ;;  %5948 = vmatprep.mubr.msk.f32.mxu1 %vm6891_vm0, %v6890_v1  ;;  %v5735_v16 = vld [vmem:[%s8679_s7 + $0x180] sm:$0xff] }
 0x573   : > { %6467 = vmatprep.subr.bf16.mxu1 %v6889_v0  ;;  %v6528_v18 = vpack.c.bf16 %v5736_v17, %v5735_v16 }
 0x576   : > { %6470 = vmatpush3.bf16.msk.msra.mxu1 %vm8204_vm8, %v6468_v20  ;;  %v5737_v20 = vld [vmem:[%s8679_s7 + $0x190] sm:$0xff] }
 0x577   : > { %6471 = vmatprep.subr.bf16.mxu1 %v6889_v0  ;;  %v6531_v23 = vpack.c.bf16 %v5738_v22, %v5737_v20 }
 0x579   : > { %5949 = vmatmul.mubr.msk.f32.vlgmr.msra.gmra.mrb[6].mxu1 %vm3928_vm6, %v4176_v27  ;;  %v5742_v27 = vld [vmem:[%s8679_s7 + $0x1a8] sm:$0xff] }
 0x57a   : > { %6473 = vmatpush3.bf16.msra.mxu1 %v6472_v25  ;;  %5959 = vmatprep.mubr.msk.f32.mxu1 %vm6891_vm0, %v6890_v1  ;;  %v5741_v25 = vld [vmem:[%s8679_s7 + $0x1a0] sm:$0xff] }
 0x57b   : > { %6474 = vmatprep.subr.bf16.mxu1 %v6889_v0  ;;  %v6535_v28 = vpack.c.bf16 %v5742_v27, %v5741_v25 }
 0x57e   : > { %6477 = vmatpush3.bf16.msk.msra.mxu1 %vm8204_vm8, %v6475_v30  ;;  %v5743_v30 = vld [vmem:[%s8679_s7 + $0x1b0] sm:$0xff] }
 0x57f   : > { %6478 = vmatprep.subr.bf16.mxu1 %v6889_v0  ;;  %v6538_v32 = vpack.c.bf16 %v5744_v31, %v5743_v30 }
 0x581   : > { %5960 = vmatmul.mubr.msk.f32.vlgmr.msra.gmra.mrb[6].mxu1 %vm3928_vm6, %v4258_v34  ;;  %v5748_v34 = vld [vmem:[%s8679_s7 + $0x1c8] sm:$0xff] }
 0x582   : > { %6480 = vmatpush3.bf16.msra.mxu1 %v6479_v33  ;;  %5970 = vmatprep.mubr.msk.f32.mxu1 %vm6891_vm0, %v6890_v1  ;;  %v5747_v33 = vld [vmem:[%s8679_s7 + $0x1c0] sm:$0xff] }
 0x583   : > { %6481 = vmatprep.subr.bf16.mxu1 %v6889_v0  ;;  %v6542_v36 = vpack.c.bf16 %v5748_v34, %v5747_v33 }
 0x586   : > { %6484 = vmatpush3.bf16.msk.msra.mxu1 %vm8204_vm8, %v6482_v38  ;;  %v5749_v38 = vld [vmem:[%s8679_s7 + $0x1d0] sm:$0xff] }
 0x587   : > { %6485 = vmatprep.subr.bf16.mxu1 %v6889_v0  ;;  %v6545_v40 = vpack.c.bf16 %v5750_v39, %v5749_v38 }
 0x589   : > { %5971 = vmatmul.mubr.msk.f32.vlgmr.msra.gmra.mrb[6].mxu1 %vm3928_vm6, %v4340_v42  ;;  %v5754_v42 = vld [vmem:[%s8679_s7 + $0x1e8] sm:$0xff] }
 0x58a   : > { %6487 = vmatpush3.bf16.msra.mxu1 %v6486_v41  ;;  %5981 = vmatprep.mubr.msk.f32.mxu1 %vm6891_vm0, %v6890_v1  ;;  %v5753_v41 = vld [vmem:[%s8679_s7 + $0x1e0] sm:$0xff] }
 0x58b   : > { %6488 = vmatprep.subr.bf16.mxu1 %v6889_v0  ;;  %v6549_v43 = vpack.c.bf16 %v5754_v42, %v5753_v41 }
 0x58e   : > { %6491 = vmatpush3.bf16.msk.msra.mxu1 %vm8204_vm8, %v6489_v45  ;;  %v5755_v45 = vld [vmem:[%s8679_s7 + $0x1f0] sm:$0xff] }
 0x58f   : > { %6492 = vmatprep.subr.bf16.mxu1 %v6889_v0  ;;  %v6552_v48 = vpack.c.bf16 %v5756_v46, %v5755_v45 }
 0x591   : > { %5982 = vmatmul.mubr.msk.f32.vlgmr.msra.gmra.mrb[6].mxu1 %vm3928_vm6, %v4422_v21  ;;  %v5246_v21 = vld [vmem:[%s8681_s9 + $0x40] sm:$0xff] }
 0x592   : > { %6494 = vmatpush3.bf16.msra.mxu1 %v6493_v49  ;;  %5992 = vmatprep.mubr.msk.f32.mxu1 %vm6891_vm0, %v6890_v1  ;;  %v5160_v49 = vrot.slane %v8265_v50, 7  ;;  %v6568_v52 = vpack.c.bf16 %v5247_v51, %v5246_v21 }
 0x593   : > { %6495 = vmatprep.subr.bf16.mxu1 %v6889_v0 }
 0x594   : > { %6569 = vmatpush3.bf16.msra.mxu0 %v6568_v52 }
 0x595   : > { %6570 = vmatprep.subr.bf16.mxu0 %v6889_v0 }
 0x596   : > { %6498 = vmatpush3.bf16.msk.msra.mxu1 %vm8204_vm8, %v6496_v53  ;;  %v5250_v53 = vld [vmem:[%s8681_s9 + $0x60] sm:$0xff] }
 0x597   : > { %6499 = vmatprep.subr.bf16.mxu1 %v6889_v0 }
 0x599   : > { %5993 = vmatmul.mubr.msk.f32.vlgmr.msra.gmra.mrb[6].mxu1 %vm3928_vm6, %v4504_v58  ;;  %v5252_v58 = vld [vmem:[%s8681_s9 + $0x70] sm:$0xff] }
 0x59a   : > { %6501 = vmatpush3.bf16.msra.mxu1 %v6500_v56  ;;  %6003 = vmatprep.mubr.msk.f32.mxu1 %vm6891_vm0, %v6890_v1  ;;  %v6574_v56 = vpack.c.bf16 %v5251_v55, %v5250_v53 }
 0x59b   : > { %6502 = vmatprep.subr.bf16.mxu1 %v6889_v0 }
 0x59e   : > { %6505 = vmatpush3.bf16.msk.msra.mxu1 %vm8204_vm8, %v6503_v61 }
 0x59f   : > { %6506 = vmatprep.subr.bf16.mxu1 %v6889_v0 }
 0x5a1   : > { %6004 = vmatmul.mubr.msk.f32.vlgmr.msra.gmra.mrb[6].mxu1 %vm3928_vm6, %v8265_v50  ;;  %v5249_v50 = vld [vmem:[%s8681_s9 + $0x58] sm:$0xff] }
 0x5a2   : > { %6508 = vmatpush3.bf16.msra.mxu1 %v6507_v63  ;;  %6014 = vmatprep.mubr.msk.f32.mxu1 %vm6891_vm0, %v6890_v1  ;;  %v6571_v54 = vpack.c.bf16 %v5249_v50, %v5248_v35  ;;  %v5330_v63 = vld [vmem:[%s8683_s11 + $0x8] sm:$0xff] }
 0x5a3   : > { %6509 = vmatprep.subr.bf16.mxu1 %v6889_v0  ;;  %v6577_v24 = vpack.c.bf16 %v5330_v63, %v5329_v47 }
 0x5a4   : > { %6572 = vmatpush3.bf16.msra.mxu0 %v6571_v54 }
 0x5a5   : > { %6573 = vmatprep.subr.bf16.mxu0 %v6889_v0 }
 0x5a6   : > { %6512 = vmatpush3.bf16.msk.msra.mxu1 %vm8204_vm8, %v6510_v2  ;;  %v5332_v2 = vld [vmem:[%s8683_s11 + $0x18] sm:$0xff] }
 0x5a7   : > { %6513 = vmatprep.subr.bf16.mxu1 %v6889_v0  ;;  %v6580_v4 = vpack.c.bf16 %v5332_v2, %v5331_v26 }
 0x5a8   : > { %6575 = vmatpush3.bf16.msra.mxu0 %v6574_v56 }
 0x5a9   : > { %6015 = vmatmul.mubr.msk.f32.vlgmr.msra.gmra.mrb[6].mxu1 %vm3928_vm6, %v4668_v57  ;;  %6111 = vmatprep.subr.mxu0 %v6890_v1  ;;  %v5334_v57 = vld [vmem:[%s8683_s11 + $0x28] sm:$0xff] }
 0x5aa   : > { %6515 = vmatpush3.bf16.msra.mxu1 %v6514_v5  ;;  %6025 = vmatprep.mubr.msk.f32.mxu1 %vm6891_vm0, %v6890_v1  ;;  %v5333_v5 = vld [vmem:[%s8683_s11 + $0x20] sm:$0xff] }
 0x5ab   : > { %6516 = vmatprep.subr.bf16.mxu1 %v6889_v0  ;;  %v6583_v6 = vpack.c.bf16 %v5334_v57, %v5333_v5 }
 0x5ac   : > { %6112 = vmatpush3.msra.mxu0 %v5252_v58 }
 0x5ad   : > { %6576 = vmatprep.subr.bf16.mxu0 %v6889_v0 }
 0x5ae   : > { %6519 = vmatpush3.bf16.msk.msra.mxu1 %vm8204_vm8, %v6517_v8  ;;  %v5336_v8 = vld [vmem:[%s8683_s11 + $0x38] sm:$0xff] }
 0x5af   : > { %6520 = vmatprep.subr.bf16.mxu1 %v6889_v0  ;;  %v6586_v10 = vpack.c.bf16 %v5336_v8, %v5335_v7 }
 0x5b1   : > { %6026 = vmatmul.mubr.msk.f32.vlgmr.msra.gmra.mrb[6].mxu1 %vm3928_vm6, %v4750_v12 }
 0x5b2   : > { %6522 = vmatpush3.bf16.msra.mxu1 %v6521_v11  ;;  %6036 = vmatprep.mubr.msk.f32.mxu1 %vm6891_vm0, %v6890_v1  ;;  %v5338_v11 = vld [vmem:[%s8683_s11 + $0x48] sm:$0xff] }
 0x5b3   : > { %6523 = vmatprep.subr.bf16.mxu1 %v6889_v0  ;;  %v6589_v12 = vpack.c.bf16 %v5338_v11, %v5337_v9 }
 0x5b6   : > { %6526 = vmatpush3.bf16.msk.msra.mxu1 %vm8204_vm8, %v6524_v15 }
 0x5b7   : > { %6527 = vmatprep.subr.bf16.mxu1 %v6889_v0 }
 0x5b9   : > { %6037 = vmatmul.mubr.msk.f32.vlgmr.msra.gmra.mrb[6].mxu1 %vm3928_vm6, %v4832_v19 }
 0x5ba   : > { %6529 = vmatpush3.bf16.msra.mxu1 %v6528_v18  ;;  %6047 = vmatprep.mubr.msk.f32.mxu1 %vm6891_vm0, %v6890_v1 }
 0x5bb   : > { %6530 = vmatprep.subr.bf16.mxu1 %v6889_v0 }
 0x5be   : > { %6533 = vmatpush3.bf16.msk.msra.mxu1 %vm8204_vm8, %v6531_v23 }
 0x5bf   : > { %6534 = vmatprep.subr.bf16.mxu1 %v6889_v0 }
 0x5c1   : > { %6048 = vmatmul.mubr.msk.f32.vlgmr.msra.gmra.mrb[6].mxu1 %vm3928_vm6, %v4914_v29 }
 0x5c2   : > { %6536 = vmatpush3.bf16.msra.mxu1 %v6535_v28  ;;  %6058 = vmatprep.mubr.msk.f32.mxu1 %vm6891_vm0, %v6890_v1 }
 0x5c3   : > { %6537 = vmatprep.subr.bf16.mxu1 %v6889_v0 }
 0x5c6   : > { %6540 = vmatpush3.bf16.msk.msra.mxu1 %vm8204_vm8, %v6538_v32 }
 0x5c7   : > { %6541 = vmatprep.subr.bf16.mxu1 %v6889_v0 }
 0x5c9   : > { %6059 = vmatmul.mubr.msk.f32.vlgmr.msra.gmra.mrb[6].mxu1 %vm3928_vm6, %v4996_v37 }
 0x5ca   : > { %6543 = vmatpush3.bf16.msra.mxu1 %v6542_v36  ;;  %6069 = vmatprep.mubr.msk.f32.mxu1 %vm6891_vm0, %v6890_v1 }
 0x5cb   : > { %6544 = vmatprep.subr.bf16.mxu1 %v6889_v0 }
 0x5ce   : > { %6547 = vmatpush3.bf16.msk.msra.mxu1 %vm8204_vm8, %v6545_v40 }
 0x5cf   : > { %6548 = vmatprep.subr.bf16.mxu1 %v6889_v0 }
 0x5d1   : > { %6070 = vmatmul.mubr.msk.f32.vlgmr.msra.gmra.mrb[6].mxu1 %vm3928_vm6, %v5078_v44 }
 0x5d2   : > { %6550 = vmatpush3.bf16.msra.mxu1 %v6549_v43  ;;  %6080 = vmatprep.mubr.msk.f32.mxu1 %vm6891_vm0, %v6890_v1 }
 0x5d3   : > { %6551 = vmatprep.subr.bf16.mxu1 %v6889_v0 }
 0x5d6   : > { %6554 = vmatpush3.bf16.msk.msra.mxu1 %vm8204_vm8, %v6552_v48 }
 0x5d9   : > { %6081 = vmatmul.mubr.msk.f32.vlgmr.msra.gmra.mrb[6].mxu1 %vm3928_vm6, %v5160_v49 }
 0x6ac   : > { %v5232_v60 = vpop.f32.mrb[6].mxu1 }
 0x6ad   : > { %v6591_v61 = vadd.f32 %v5232_v60, %v3923_v59  ;;  %v6082_v62 = vpop.f32.mrb[7].mxu1 }
 0x6af   : > { %6817 = vtanh.f32 %v6591_v61 }
 0x6b9   : > { %v6818_v3 = vpop.eup %6817 }
 0x6ba   : > { %6114 = vmatmul.mubr.msk.f32.vlgmr.msra.gmra.mrb[12].mxu0 %vm5254_vm9, %v6818_v3 }
 0x6bb   : > { %6578 = vmatpush3.bf16.msra.mxu0 %v6577_v24  ;;  %6138 = vmatprep.mubr.msk.f32.mxu0 %vm6891_vm0, %v6890_v1  ;;  %vm5344_vm0 = vcmask 1043456  }
 0x6bc   : > { %6579 = vmatprep.subr.bf16.mxu0 %v6889_v0 }
 0x6bf   : > { %6581 = vmatpush3.bf16.msra.mxu0 %v6580_v4 }
 0x6c0   : > { %6582 = vmatprep.subr.bf16.mxu0 %v6889_v0 }
 0x6c3   : > { %6584 = vmatpush3.bf16.msra.mxu0 %v6583_v6 }
 0x6c4   : > { %6585 = vmatprep.subr.bf16.mxu0 %v6889_v0 }
 0x6c7   : > { %6587 = vmatpush3.bf16.msra.mxu0 %v6586_v10 }
 0x6c8   : > { %6588 = vmatprep.subr.bf16.mxu0 %v6889_v0  ;;  %v5340_v0 = vld [vmem:[%s8684_s12] sm:$0x1] }
 0x6cb   : > { %6590 = vmatpush3.bf16.msra.mxu0 %v6589_v12 }
 0x6cc   : > { %6136 = vmatprep.subr.mxu0 %v6890_v1 }
 0x6cf   : > { %6137 = vmatpush3.msk.msra.mxu0 %vm5344_vm0, %v5339_v13 }
 0x78d   : > { %v5324_v15 = vpop.f32.mrb[12].mxu0 }
 0x78e   : > { %v5325_v16 = vadd.f32 %v5324_v15, %v5253_v14  ;;  %v6115_v17 = vpop.f32.mrb[13].mxu0 }
 0x790   : > { %6819 = vtanh.f32 %v5325_v16 }
 0x79a   : > { %v6820_v18 = vpop.eup %6819 }
 0x79b   : > { %6139 = vmatmul.mubr.msk.f32.vlgmr.msra.gmra.mrb[14].mxu0 %vm3011_vm12, %v6820_v18 }
 0x86e   : > { %v5414_v1 = vpop.f32.mrb[14].mxu0 }
 0x86f   : > { %v5415_v19 = vadd.f32 %v5414_v1, %v5340_v0  ;;  %v6140_v20 = vpop.f32.mrb[15].mxu0 }
 0x871   : > { %v5419_v22 = vsel %vm5418_vm10, %v5415_v19, -inf }
 0x872   : > { %5420 = vmax.xlane.f32.xlu1 %v5419_v22 }
 0x8ff   : > { %v5421_v23 = vpop.xlane.xlu1 %5420 }
 0x900   : > { %v5422_v25 = vsub.f32 %v5415_v19, %v5421_v23 }
 0x902   : > { %v5423_v27 = vmul.f32 1.442695, %v5422_v25 }
 0x904   : > { %6821 = vpow2.f32 %v5423_v27 }
 0x90e   : > { %v6822_v28 = vpop.eup %6821 }
 0x90f   : > { %v5425_v29 = vsel %vm5418_vm10, %v6822_v28, 0.0 }
 0x910   : > { %5426 = vadd.xlane.f32.xlu0 %v5425_v29 }
 0x99d   : > { %v5427_v30 = vpop.xlane.xlu0 %5426 }
 0x99e   : > { %6823 = vlog2.f32 %v5427_v30 }
 0x9a8   : > { %v6824_v31 = vpop.eup %6823 }
 0x9a9   : > { %v5429_v32 = vmul.f32 0.6931472, %v6824_v31 }
 0x9ab   : > { %v5430_v33 = vsub.f32 %v5422_v25, %v5429_v32 }
 0x9ad   : > { %5431 = vst.msk [vmem:[%s432_s23] sm:$0x1] %vm5418_vm10, %v5430_v33 }
 0x9ae   : > { %6838 = shalt.err (!%p6835_p3)
}
 0x9af   : > { %s6839_s21 = scalar_lea.hbm %s8629_s1, 16  ;;  %s6843_s0 = scalar_lea.hbm %s8685_s13, 32 }
 0x9b0   : > { %p6840_p4 = scmp.ne.s32.totalorder %s8629_s1, %s6839_s21  ;;  %p6844_p9 = scmp.lt.u32.totalorder %s8629_s1, %s8685_s13 }
 0x9b1   : > { %p6845_p10 = scmp.lt.u32.totalorder %s6843_s0, %s6839_s21  ;;  %p6847_p12 = scmp.lt.u32.totalorder %s6839_s21, %s8629_s1 }
 0x9b2   : > { %p6841_p7 = pnand %p6840_p4, %p7027_p5 }
 0x9b3   : > { %p6846_p11 = por %p6845_p10, %p6844_p9 }
 0x9b4   : > { %p6842_p8 = pneg %p6841_p7 }
 0x9b5   : > { %p6848_p13 = por %p6847_p12, %p6846_p11 }
 0x9b7   : > { %p6849_p0 = pnand %p6848_p13, %p6842_p8 }
 0x9b9   : > { %6852 = shalt.err (!%p6849_p0)
}
 0x9ba   : > { %6725 = dma.vmem_to_hbm [thread:$0]  (%p7027_p5), %s8631_s24, 16, %s8629_s1, %s5433_s30  }
 0x9bb PF: > { %p6731_p1 = scmp.ge.s32.totalorder %s6887_s28, 2  ;;  %s5457_s16 = sand.u32 1, %s6875_s25  }
 0x9bc   : > { %s5458_s20 = scalar_lea.sflag [#allocation3], %s5457_s16 }
 0x9bd   : > { %p6728_p2 = pnand %p6731_p1, %p7031_p6 }
 0x9bf   : > { %6870 = dma.done.wait (!%p6728_p2), %s5458_s20, 16  }
 0x9c0   : > { %6872 = vsyncadd (!%p6728_p2), %s5458_s20, 4294967280  ;;  %p23_p3 = scmp.ge.s32.totalorder %s7014_s14, 4   ;;  %s8698_s25 = smov %s6879_s26 }
 0x9c1   : > { %s8699_s26 = smov %s6883_s27  ;;  %s8700_s27 = smov %s7025_s17 }
 0x9c2   : > { %s8701_s28 = smov %s7014_s14  ;;  %25 = sbr.rel (!%p23_p3) target bundleno = 7 (0x7), region = 146 }
 0x9c9   :  { %5462 = vsyncpa [#allocation3], 1 }
 0x9ca   :  { %5464 = vsyncpa [#allocation3 + $0x1], 1 }

</bundles_post_ra>
